<compile_context>
chip_gen: v6e
topology: v6e:2x2x1
jax: 0.10.0
libtpu: 0.0.40
codegen_flags: <defaults>
</compile_context>

<pallas_src>
import jax
import jax.numpy as jnp
from jax import lax
from jax.experimental import pallas as pl
from jax.experimental.pallas import tpu as pltpu

EPS = 1e-5  # PyTorch GroupNorm default eps


# ---------------------------------------------------------------------------
# Fused kernel: maxpool -> conv1+GN+ReLU -> conv2+GN+ReLU -> + temb
# ---------------------------------------------------------------------------
def _down_fused_kernel(x_ref, t_ref, mask_ref,
                       w1_ref, b1_ref, g1_ref, be1_ref,
                       w2_ref, b2_ref, g2_ref, be2_ref,
                       wemb_ref, bemb_ref,
                       out_ref, pad1_ref, pad2_ref):
    # static shapes
    H = x_ref.shape[1]            # pre-pool height
    W2 = x_ref.shape[2]           # pooled width
    Cin = x_ref.shape[3] // 2
    H2 = H // 2                   # pooled height
    Wp = W2 + 2                   # padded width of the flat working grid
    M = out_ref.shape[1]          # = H2 * Wp  (includes 2 junk columns per row)
    Cout = out_ref.shape[2]
    inv_cnt = 1.0 / float(H2 * W2 * Cout)

    # fresh zero borders every grid step (scratch persists across steps)
    pad1_ref[...] = jnp.zeros_like(pad1_ref)
    pad2_ref[...] = jnp.zeros_like(pad2_ref)

    mask = mask_ref[...]          # (M, 1): 1.0 on valid pixels, 0.0 on junk cols

    # ---- fused 2x2 max-pool, written straight into the padded scratch ----
    # x_ref holds the sample as (H, W/2, 2*Cin): the even/odd x neighbours are
    # the two Cin-wide halves of the last (lane) dim.
    for y in range(H2):
        vmax = jnp.maximum(x_ref[0, 2 * y], x_ref[0, 2 * y + 1])   # (W2, 2*Cin)
        row = jnp.maximum(vmax[:, :Cin], vmax[:, Cin:])            # (W2, Cin)
        pad1_ref[pl.ds((y + 1) * Wp + 1, W2), :] = row

    def conv3x3_gn_relu(src_ref, w_ref, b_ref, g_ref, be_ref):
        # 3x3 conv as 9 shifted (M, C) x (C, Cout) matmuls; bf16 MXU, f32 acc.
        acc = jnp.zeros((M, Cout), jnp.float32)
        for k in range(9):
            off = (k // 3) * Wp + (k % 3)
            slab = src_ref[pl.ds(off, M), :].astype(jnp.bfloat16)
            acc = acc + jnp.dot(slab, w_ref[k],
                                preferred_element_type=jnp.float32)
        y = acc + b_ref[...]
        # GroupNorm(num_groups=1): per-sample stats over the valid pixels only,
        # computed in one masked pass (sum & sum-of-squares) in f32.
        ym = y * mask
        s1 = jnp.sum(ym)
        s2 = jnp.sum(ym * ym)
        mean = s1 * inv_cnt
        var = s2 * inv_cnt - mean * mean
        y = (y - mean) * lax.rsqrt(var + EPS)
        y = jnp.maximum(y * g_ref[...] + be_ref[...], 0.0)
        return y * mask            # zero the junk columns

    y1 = conv3x3_gn_relu(pad1_ref, w1_ref, b1_ref, g1_ref, be1_ref)
    # re-pad for conv2: interior placement is a constant shift (+Wp+1) in the
    # flat grid, so one contiguous store suffices.
    pad2_ref[pl.ds(Wp + 1, M), :] = y1

    y2 = conv3x3_gn_relu(pad2_ref, w2_ref, b2_ref, g2_ref, be2_ref)

    # ---- time embedding: Linear(ReLU(t)), broadcast over spatial -----------
    temb = jnp.dot(jnp.maximum(t_ref[0], 0.0), wemb_ref[...],
                   preferred_element_type=jnp.float32) + bemb_ref[...]  # (1, Cout)

    out_ref[0] = (y2 + temb).astype(out_ref.dtype)


# ---------------------------------------------------------------------------
# Wrapper
# ---------------------------------------------------------------------------
def down_forward(params, x_nchw, t):
    """x: (N, Cin, H, W) NCHW (PyTorch convention), t: (N, emb_dim)."""
    N, Cin, H, W = x_nchw.shape
    Cout = params["w1"].shape[0]
    emb_dim = t.shape[-1]
    H2, W2 = H // 2, W // 2
    Wp = W2 + 2
    M = H2 * Wp
    padded_rows = (H2 + 2) * Wp + 2   # +2: shifted slabs may read 2 rows past

    # layout glue (row-major-free reshapes + one boundary transpose):
    # NCHW -> NHWC -> (N, H, W/2, 2*Cin) so horizontal pool partners share a row
    x_nhwc = jnp.transpose(x_nchw, (0, 2, 3, 1))
    xr = x_nhwc.reshape(N, H, W2, 2 * Cin)
    tr = t.reshape(N, 1, emb_dim)

    # conv weights: (Cout, Cin, 3, 3) -> (9, Cin, Cout), bf16 for the MXU
    w1r = jnp.transpose(params["w1"], (2, 3, 1, 0)).reshape(9, Cin, Cout)
    w2r = jnp.transpose(params["w2"], (2, 3, 1, 0)).reshape(9, Cout, Cout)
    w1r = w1r.astype(jnp.bfloat16)
    w2r = w2r.astype(jnp.bfloat16)
    b1 = params["b1"].reshape(1, Cout)
    g1 = params["g1"].reshape(1, Cout)
    be1 = params["be1"].reshape(1, Cout)
    b2 = params["b2"].reshape(1, Cout)
    g2 = params["g2"].reshape(1, Cout)
    be2 = params["be2"].reshape(1, Cout)
    wembT = params["w_emb"].T                 # (emb_dim, Cout), f32
    bemb = params["b_emb"].reshape(1, Cout)

    # validity mask over the flat padded-width grid (junk columns x >= W2)
    mask = (jnp.arange(M, dtype=jnp.int32) % Wp < W2)
    mask = mask.astype(jnp.float32).reshape(M, 1)

    def const_spec(shape):
        n = len(shape)
        return pl.BlockSpec(shape, lambda i: (0,) * n)

    out = pl.pallas_call(
        _down_fused_kernel,
        out_shape=jax.ShapeDtypeStruct((N, M, Cout), jnp.float32),
        grid=(N,),
        in_specs=[
            pl.BlockSpec((1, H, W2, 2 * Cin), lambda i: (i, 0, 0, 0)),
            pl.BlockSpec((1, 1, emb_dim), lambda i: (i, 0, 0)),
            const_spec((M, 1)),
            const_spec((9, Cin, Cout)), const_spec((1, Cout)),
            const_spec((1, Cout)), const_spec((1, Cout)),
            const_spec((9, Cout, Cout)), const_spec((1, Cout)),
            const_spec((1, Cout)), const_spec((1, Cout)),
            const_spec((emb_dim, Cout)), const_spec((1, Cout)),
        ],
        out_specs=pl.BlockSpec((1, M, Cout), lambda i: (i, 0, 0)),
        scratch_shapes=[
            pltpu.VMEM((padded_rows, Cin), jnp.float32),   # padded pooled input
            pltpu.VMEM((padded_rows, Cout), jnp.float32),  # padded conv1 output
        ],
        compiler_params=pltpu.CompilerParams(
            dimension_semantics=("parallel",),   # N>=2 keeps both v7x TCs busy
            vmem_limit_bytes=32 * 1024 * 1024),
    )(xr, tr, mask, w1r, b1, g1, be1, w2r, b2, g2, be2, wembT, bemb)

    # drop the 2 junk columns per row, back to NCHW
    out = out.reshape(N, H2, Wp, Cout)[:, :, :W2, :]
    return jnp.transpose(out, (0, 3, 1, 2))


# ---------------------------------------------------------------------------
if __name__ == "__main__":
    in_c, out_c, emb_dim = 4, 8, 128
    N, H, W = 2, 16, 16

    key = jax.random.PRNGKey(0)
    ks = jax.random.split(key, 8)
    x = jax.random.normal(ks[0], (N, in_c, H, W), jnp.float32)
    t = jax.random.normal(ks[1], (N, emb_dim), jnp.float32)

    params = {
        # conv1: Conv2d(in_c, out_c, 3, padding=1) + GroupNorm(1, out_c)
        "w1": 0.1 * jax.random.normal(ks[2], (out_c, in_c, 3, 3), jnp.float32),
        "b1": 0.1 * jax.random.normal(ks[3], (out_c,), jnp.float32),
        "g1": jnp.ones((out_c,), jnp.float32),
        "be1": jnp.zeros((out_c,), jnp.float32),
        # conv2: Conv2d(out_c, out_c, 3, padding=1) + GroupNorm(1, out_c)
        "w2": 0.1 * jax.random.normal(ks[4], (out_c, out_c, 3, 3), jnp.float32),
        "b2": 0.1 * jax.random.normal(ks[5], (out_c,), jnp.float32),
        "g2": jnp.ones((out_c,), jnp.float32),
        "be2": jnp.zeros((out_c,), jnp.float32),
        # emb_layer: Linear(emb_dim, out_c)
        "w_emb": 0.1 * jax.random.normal(ks[6], (out_c, emb_dim), jnp.float32),
        "b_emb": 0.1 * jax.random.normal(ks[7], (out_c,), jnp.float32),
    }

    out = jax.jit(down_forward)(params, x, t)
    out = jax.block_until_ready(out)
    assert out.shape == (N, out_c, H // 2, W // 2)
    assert bool(jnp.all(jnp.isfinite(out)))
    print("KERNEL_OK")
</pallas_src>

<mosaic_0001>
module attributes {stable_mosaic.version = 11 : i64} {
  func.func @_down_fused_kernel(%arg0: i32, %arg1: memref<1x16x8x8xf32, #tpu.memory_space<vmem>>, %arg2: memref<1x1x128xf32, #tpu.memory_space<vmem>>, %arg3: memref<80x1xf32, #tpu.memory_space<vmem>>, %arg4: memref<9x4x8xbf16, #tpu.memory_space<vmem>>, %arg5: memref<1x8xf32, #tpu.memory_space<vmem>>, %arg6: memref<1x8xf32, #tpu.memory_space<vmem>>, %arg7: memref<1x8xf32, #tpu.memory_space<vmem>>, %arg8: memref<9x8x8xbf16, #tpu.memory_space<vmem>>, %arg9: memref<1x8xf32, #tpu.memory_space<vmem>>, %arg10: memref<1x8xf32, #tpu.memory_space<vmem>>, %arg11: memref<1x8xf32, #tpu.memory_space<vmem>>, %arg12: memref<128x8xf32, #tpu.memory_space<vmem>>, %arg13: memref<1x8xf32, #tpu.memory_space<vmem>>, %arg14: memref<1x80x8xf32, #tpu.memory_space<vmem>>, %arg15: memref<102x4xf32, #tpu.memory_space<vmem>>, %arg16: memref<102x8xf32, #tpu.memory_space<vmem>>) attributes {dimension_semantics = [#tpu.dimension_semantics<parallel>], iteration_bounds = array<i64: 2>, scalar_prefetch = 0 : i64, scratch_operands = 2 : i64, tpu.core_type = #tpu.core_type<tc>, window_params = [{transform_indices = @transform_0, window_bounds = array<i64: 1, 16, 8, 8>}, {transform_indices = @transform_1, window_bounds = array<i64: 1, 1, 128>}, {pipeline_mode = #tpu.pipeline_mode<synchronous>, transform_indices = @transform_2, window_bounds = array<i64: 80, 1>}, {pipeline_mode = #tpu.pipeline_mode<synchronous>, transform_indices = @transform_3, window_bounds = array<i64: 9, 4, 8>}, {pipeline_mode = #tpu.pipeline_mode<synchronous>, transform_indices = @transform_4, window_bounds = array<i64: 1, 8>}, {pipeline_mode = #tpu.pipeline_mode<synchronous>, transform_indices = @transform_5, window_bounds = array<i64: 1, 8>}, {pipeline_mode = #tpu.pipeline_mode<synchronous>, transform_indices = @transform_6, window_bounds = array<i64: 1, 8>}, {pipeline_mode = #tpu.pipeline_mode<synchronous>, transform_indices = @transform_7, window_bounds = array<i64: 9, 8, 8>}, {pipeline_mode = #tpu.pipeline_mode<synchronous>, transform_indices = @transform_8, window_bounds = array<i64: 1, 8>}, {pipeline_mode = #tpu.pipeline_mode<synchronous>, transform_indices = @transform_9, window_bounds = array<i64: 1, 8>}, {pipeline_mode = #tpu.pipeline_mode<synchronous>, transform_indices = @transform_10, window_bounds = array<i64: 1, 8>}, {pipeline_mode = #tpu.pipeline_mode<synchronous>, transform_indices = @transform_11, window_bounds = array<i64: 128, 8>}, {pipeline_mode = #tpu.pipeline_mode<synchronous>, transform_indices = @transform_12, window_bounds = array<i64: 1, 8>}, {transform_indices = @transform_13, window_bounds = array<i64: 1, 80, 8>}]} {
    %cst = arith.constant 0.000000e+00 : f32
    %0 = vector.broadcast %cst : f32 to vector<102x4xf32>
    %c0 = arith.constant 0 : index
    %c0_0 = arith.constant 0 : index
    %1 = vector.load %arg15[%c0, %c0_0] : memref<102x4xf32, #tpu.memory_space<vmem>>, vector<102x4xf32>
    tpu.vector_store %arg15[%c0, %c0_0], %0 {strides = array<i32>} : memref<102x4xf32, #tpu.memory_space<vmem>>, vector<102x4xf32>,
    %cst_1 = arith.constant 0.000000e+00 : f32
    %2 = vector.broadcast %cst_1 : f32 to vector<102x8xf32>
    %c0_2 = arith.constant 0 : index
    %c0_3 = arith.constant 0 : index
    %3 = vector.load %arg16[%c0_2, %c0_3] : memref<102x8xf32, #tpu.memory_space<vmem>>, vector<102x8xf32>
    tpu.vector_store %arg16[%c0_2, %c0_3], %2 {strides = array<i32>} : memref<102x8xf32, #tpu.memory_space<vmem>>, vector<102x8xf32>,
    %c0_4 = arith.constant 0 : index
    %c0_5 = arith.constant 0 : index
    %4 = vector.load %arg3[%c0_4, %c0_5] : memref<80x1xf32, #tpu.memory_space<vmem>>, vector<80x1xf32>
    %c0_6 = arith.constant 0 : index
    %c0_7 = arith.constant 0 : index
    %c0_8 = arith.constant 0 : index
    %c0_9 = arith.constant 0 : index
    %5 = vector.load %arg1[%c0_6, %c0_7, %c0_8, %c0_9] : memref<1x16x8x8xf32, #tpu.memory_space<vmem>>, vector<1x1x8x8xf32>
    %6 = vector.shape_cast %5 : vector<1x1x8x8xf32> to vector<8x8xf32>
    %c0_10 = arith.constant 0 : index
    %c1 = arith.constant 1 : index
    %c0_11 = arith.constant 0 : index
    %c0_12 = arith.constant 0 : index
    %7 = vector.load %arg1[%c0_10, %c1, %c0_11, %c0_12] : memref<1x16x8x8xf32, #tpu.memory_space<vmem>>, vector<1x1x8x8xf32>
    %8 = vector.shape_cast %7 : vector<1x1x8x8xf32> to vector<8x8xf32>
    %9 = arith.maximumf %6, %8 : vector<8x8xf32>
    %10 = vector.extract_strided_slice %9 {offsets = [0, 0], sizes = [8, 4], strides = [1, 1]} : vector<8x8xf32> to vector<8x4xf32>
    %11 = vector.extract_strided_slice %9 {offsets = [0, 4], sizes = [8, 4], strides = [1, 1]} : vector<8x8xf32> to vector<8x4xf32>
    %12 = arith.maximumf %10, %11 : vector<8x4xf32>
    %c11 = arith.constant 11 : index
    %c0_13 = arith.constant 0 : index
    %13 = vector.load %arg15[%c11, %c0_13] : memref<102x4xf32, #tpu.memory_space<vmem>>, vector<8x4xf32>
    tpu.vector_store %arg15[%c11, %c0_13], %12 {strides = array<i32>} : memref<102x4xf32, #tpu.memory_space<vmem>>, vector<8x4xf32>,
    %c0_14 = arith.constant 0 : index
    %c2 = arith.constant 2 : index
    %c0_15 = arith.constant 0 : index
    %c0_16 = arith.constant 0 : index
    %14 = vector.load %arg1[%c0_14, %c2, %c0_15, %c0_16] : memref<1x16x8x8xf32, #tpu.memory_space<vmem>>, vector<1x1x8x8xf32>
    %15 = vector.shape_cast %14 : vector<1x1x8x8xf32> to vector<8x8xf32>
    %c0_17 = arith.constant 0 : index
    %c3 = arith.constant 3 : index
    %c0_18 = arith.constant 0 : index
    %c0_19 = arith.constant 0 : index
    %16 = vector.load %arg1[%c0_17, %c3, %c0_18, %c0_19] : memref<1x16x8x8xf32, #tpu.memory_space<vmem>>, vector<1x1x8x8xf32>
    %17 = vector.shape_cast %16 : vector<1x1x8x8xf32> to vector<8x8xf32>
    %18 = arith.maximumf %15, %17 : vector<8x8xf32>
    %19 = vector.extract_strided_slice %18 {offsets = [0, 0], sizes = [8, 4], strides = [1, 1]} : vector<8x8xf32> to vector<8x4xf32>
    %20 = vector.extract_strided_slice %18 {offsets = [0, 4], sizes = [8, 4], strides = [1, 1]} : vector<8x8xf32> to vector<8x4xf32>
    %21 = arith.maximumf %19, %20 : vector<8x4xf32>
    %c21 = arith.constant 21 : index
    %c0_20 = arith.constant 0 : index
    %22 = vector.load %arg15[%c21, %c0_20] : memref<102x4xf32, #tpu.memory_space<vmem>>, vector<8x4xf32>
    tpu.vector_store %arg15[%c21, %c0_20], %21 {strides = array<i32>} : memref<102x4xf32, #tpu.memory_space<vmem>>, vector<8x4xf32>,
    %c0_21 = arith.constant 0 : index
    %c4 = arith.constant 4 : index
    %c0_22 = arith.constant 0 : index
    %c0_23 = arith.constant 0 : index
    %23 = vector.load %arg1[%c0_21, %c4, %c0_22, %c0_23] : memref<1x16x8x8xf32, #tpu.memory_space<vmem>>, vector<1x1x8x8xf32>
    %24 = vector.shape_cast %23 : vector<1x1x8x8xf32> to vector<8x8xf32>
    %c0_24 = arith.constant 0 : index
    %c5 = arith.constant 5 : index
    %c0_25 = arith.constant 0 : index
    %c0_26 = arith.constant 0 : index
    %25 = vector.load %arg1[%c0_24, %c5, %c0_25, %c0_26] : memref<1x16x8x8xf32, #tpu.memory_space<vmem>>, vector<1x1x8x8xf32>
    %26 = vector.shape_cast %25 : vector<1x1x8x8xf32> to vector<8x8xf32>
    %27 = arith.maximumf %24, %26 : vector<8x8xf32>
    %28 = vector.extract_strided_slice %27 {offsets = [0, 0], sizes = [8, 4], strides = [1, 1]} : vector<8x8xf32> to vector<8x4xf32>
    %29 = vector.extract_strided_slice %27 {offsets = [0, 4], sizes = [8, 4], strides = [1, 1]} : vector<8x8xf32> to vector<8x4xf32>
    %30 = arith.maximumf %28, %29 : vector<8x4xf32>
    %c31 = arith.constant 31 : index
    %c0_27 = arith.constant 0 : index
    %31 = vector.load %arg15[%c31, %c0_27] : memref<102x4xf32, #tpu.memory_space<vmem>>, vector<8x4xf32>
    tpu.vector_store %arg15[%c31, %c0_27], %30 {strides = array<i32>} : memref<102x4xf32, #tpu.memory_space<vmem>>, vector<8x4xf32>,
    %c0_28 = arith.constant 0 : index
    %c6 = arith.constant 6 : index
    %c0_29 = arith.constant 0 : index
    %c0_30 = arith.constant 0 : index
    %32 = vector.load %arg1[%c0_28, %c6, %c0_29, %c0_30] : memref<1x16x8x8xf32, #tpu.memory_space<vmem>>, vector<1x1x8x8xf32>
    %33 = vector.shape_cast %32 : vector<1x1x8x8xf32> to vector<8x8xf32>
    %c0_31 = arith.constant 0 : index
    %c7 = arith.constant 7 : index
    %c0_32 = arith.constant 0 : index
    %c0_33 = arith.constant 0 : index
    %34 = vector.load %arg1[%c0_31, %c7, %c0_32, %c0_33] : memref<1x16x8x8xf32, #tpu.memory_space<vmem>>, vector<1x1x8x8xf32>
    %35 = vector.shape_cast %34 : vector<1x1x8x8xf32> to vector<8x8xf32>
    %36 = arith.maximumf %33, %35 : vector<8x8xf32>
    %37 = vector.extract_strided_slice %36 {offsets = [0, 0], sizes = [8, 4], strides = [1, 1]} : vector<8x8xf32> to vector<8x4xf32>
    %38 = vector.extract_strided_slice %36 {offsets = [0, 4], sizes = [8, 4], strides = [1, 1]} : vector<8x8xf32> to vector<8x4xf32>
    %39 = arith.maximumf %37, %38 : vector<8x4xf32>
    %c41 = arith.constant 41 : index
    %c0_34 = arith.constant 0 : index
    %40 = vector.load %arg15[%c41, %c0_34] : memref<102x4xf32, #tpu.memory_space<vmem>>, vector<8x4xf32>
    tpu.vector_store %arg15[%c41, %c0_34], %39 {strides = array<i32>} : memref<102x4xf32, #tpu.memory_space<vmem>>, vector<8x4xf32>,
    %c0_35 = arith.constant 0 : index
    %c8 = arith.constant 8 : index
    %c0_36 = arith.constant 0 : index
    %c0_37 = arith.constant 0 : index
    %41 = vector.load %arg1[%c0_35, %c8, %c0_36, %c0_37] : memref<1x16x8x8xf32, #tpu.memory_space<vmem>>, vector<1x1x8x8xf32>
    %42 = vector.shape_cast %41 : vector<1x1x8x8xf32> to vector<8x8xf32>
    %c0_38 = arith.constant 0 : index
    %c9 = arith.constant 9 : index
    %c0_39 = arith.constant 0 : index
    %c0_40 = arith.constant 0 : index
    %43 = vector.load %arg1[%c0_38, %c9, %c0_39, %c0_40] : memref<1x16x8x8xf32, #tpu.memory_space<vmem>>, vector<1x1x8x8xf32>
    %44 = vector.shape_cast %43 : vector<1x1x8x8xf32> to vector<8x8xf32>
    %45 = arith.maximumf %42, %44 : vector<8x8xf32>
    %46 = vector.extract_strided_slice %45 {offsets = [0, 0], sizes = [8, 4], strides = [1, 1]} : vector<8x8xf32> to vector<8x4xf32>
    %47 = vector.extract_strided_slice %45 {offsets = [0, 4], sizes = [8, 4], strides = [1, 1]} : vector<8x8xf32> to vector<8x4xf32>
    %48 = arith.maximumf %46, %47 : vector<8x4xf32>
    %c51 = arith.constant 51 : index
    %c0_41 = arith.constant 0 : index
    %49 = vector.load %arg15[%c51, %c0_41] : memref<102x4xf32, #tpu.memory_space<vmem>>, vector<8x4xf32>
    tpu.vector_store %arg15[%c51, %c0_41], %48 {strides = array<i32>} : memref<102x4xf32, #tpu.memory_space<vmem>>, vector<8x4xf32>,
    %c0_42 = arith.constant 0 : index
    %c10 = arith.constant 10 : index
    %c0_43 = arith.constant 0 : index
    %c0_44 = arith.constant 0 : index
    %50 = vector.load %arg1[%c0_42, %c10, %c0_43, %c0_44] : memref<1x16x8x8xf32, #tpu.memory_space<vmem>>, vector<1x1x8x8xf32>
    %51 = vector.shape_cast %50 : vector<1x1x8x8xf32> to vector<8x8xf32>
    %c0_45 = arith.constant 0 : index
    %c11_46 = arith.constant 11 : index
    %c0_47 = arith.constant 0 : index
    %c0_48 = arith.constant 0 : index
    %52 = vector.load %arg1[%c0_45, %c11_46, %c0_47, %c0_48] : memref<1x16x8x8xf32, #tpu.memory_space<vmem>>, vector<1x1x8x8xf32>
    %53 = vector.shape_cast %52 : vector<1x1x8x8xf32> to vector<8x8xf32>
    %54 = arith.maximumf %51, %53 : vector<8x8xf32>
    %55 = vector.extract_strided_slice %54 {offsets = [0, 0], sizes = [8, 4], strides = [1, 1]} : vector<8x8xf32> to vector<8x4xf32>
    %56 = vector.extract_strided_slice %54 {offsets = [0, 4], sizes = [8, 4], strides = [1, 1]} : vector<8x8xf32> to vector<8x4xf32>
    %57 = arith.maximumf %55, %56 : vector<8x4xf32>
    %c61 = arith.constant 61 : index
    %c0_49 = arith.constant 0 : index
    %58 = vector.load %arg15[%c61, %c0_49] : memref<102x4xf32, #tpu.memory_space<vmem>>, vector<8x4xf32>
    tpu.vector_store %arg15[%c61, %c0_49], %57 {strides = array<i32>} : memref<102x4xf32, #tpu.memory_space<vmem>>, vector<8x4xf32>,
    %c0_50 = arith.constant 0 : index
    %c12 = arith.constant 12 : index
    %c0_51 = arith.constant 0 : index
    %c0_52 = arith.constant 0 : index
    %59 = vector.load %arg1[%c0_50, %c12, %c0_51, %c0_52] : memref<1x16x8x8xf32, #tpu.memory_space<vmem>>, vector<1x1x8x8xf32>
    %60 = vector.shape_cast %59 : vector<1x1x8x8xf32> to vector<8x8xf32>
    %c0_53 = arith.constant 0 : index
    %c13 = arith.constant 13 : index
    %c0_54 = arith.constant 0 : index
    %c0_55 = arith.constant 0 : index
    %61 = vector.load %arg1[%c0_53, %c13, %c0_54, %c0_55] : memref<1x16x8x8xf32, #tpu.memory_space<vmem>>, vector<1x1x8x8xf32>
    %62 = vector.shape_cast %61 : vector<1x1x8x8xf32> to vector<8x8xf32>
    %63 = arith.maximumf %60, %62 : vector<8x8xf32>
    %64 = vector.extract_strided_slice %63 {offsets = [0, 0], sizes = [8, 4], strides = [1, 1]} : vector<8x8xf32> to vector<8x4xf32>
    %65 = vector.extract_strided_slice %63 {offsets = [0, 4], sizes = [8, 4], strides = [1, 1]} : vector<8x8xf32> to vector<8x4xf32>
    %66 = arith.maximumf %64, %65 : vector<8x4xf32>
    %c71 = arith.constant 71 : index
    %c0_56 = arith.constant 0 : index
    %67 = vector.load %arg15[%c71, %c0_56] : memref<102x4xf32, #tpu.memory_space<vmem>>, vector<8x4xf32>
    tpu.vector_store %arg15[%c71, %c0_56], %66 {strides = array<i32>} : memref<102x4xf32, #tpu.memory_space<vmem>>, vector<8x4xf32>,
    %c0_57 = arith.constant 0 : index
    %c14 = arith.constant 14 : index
    %c0_58 = arith.constant 0 : index
    %c0_59 = arith.constant 0 : index
    %68 = vector.load %arg1[%c0_57, %c14, %c0_58, %c0_59] : memref<1x16x8x8xf32, #tpu.memory_space<vmem>>, vector<1x1x8x8xf32>
    %69 = vector.shape_cast %68 : vector<1x1x8x8xf32> to vector<8x8xf32>
    %c0_60 = arith.constant 0 : index
    %c15 = arith.constant 15 : index
    %c0_61 = arith.constant 0 : index
    %c0_62 = arith.constant 0 : index
    %70 = vector.load %arg1[%c0_60, %c15, %c0_61, %c0_62] : memref<1x16x8x8xf32, #tpu.memory_space<vmem>>, vector<1x1x8x8xf32>
    %71 = vector.shape_cast %70 : vector<1x1x8x8xf32> to vector<8x8xf32>
    %72 = arith.maximumf %69, %71 : vector<8x8xf32>
    %73 = vector.extract_strided_slice %72 {offsets = [0, 0], sizes = [8, 4], strides = [1, 1]} : vector<8x8xf32> to vector<8x4xf32>
    %74 = vector.extract_strided_slice %72 {offsets = [0, 4], sizes = [8, 4], strides = [1, 1]} : vector<8x8xf32> to vector<8x4xf32>
    %75 = arith.maximumf %73, %74 : vector<8x4xf32>
    %c81 = arith.constant 81 : index
    %c0_63 = arith.constant 0 : index
    %76 = vector.load %arg15[%c81, %c0_63] : memref<102x4xf32, #tpu.memory_space<vmem>>, vector<8x4xf32>
    tpu.vector_store %arg15[%c81, %c0_63], %75 {strides = array<i32>} : memref<102x4xf32, #tpu.memory_space<vmem>>, vector<8x4xf32>,
    %cst_64 = arith.constant 0.000000e+00 : f32
    %77 = vector.broadcast %cst_64 : f32 to vector<80x8xf32>
    %c0_65 = arith.constant 0 : index
    %c0_66 = arith.constant 0 : index
    %78 = vector.load %arg15[%c0_65, %c0_66] : memref<102x4xf32, #tpu.memory_space<vmem>>, vector<80x4xf32>
    %79 = arith.truncf %78 : vector<80x4xf32> to vector<80x4xbf16>
    %c0_67 = arith.constant 0 : index
    %c0_68 = arith.constant 0 : index
    %c0_69 = arith.constant 0 : index
    %80 = vector.load %arg4[%c0_67, %c0_68, %c0_69] : memref<9x4x8xbf16, #tpu.memory_space<vmem>>, vector<1x4x8xbf16>
    %81 = vector.shape_cast %80 : vector<1x4x8xbf16> to vector<4x8xbf16>
    %cst_70 = arith.constant dense<0.000000e+00> : vector<80x8xf32>
    %82 = tpu.matmul %79, %81, %cst_70 {dimension_numbers = #tpu.dot_dimension_numbers<[1], [0], [0], [1], [0, 0, 1, 1], [], []>} : vector<80x4xbf16>, vector<4x8xbf16>, vector<80x8xf32> -> vector<80x8xf32>
    %83 = arith.addf %77, %82 : vector<80x8xf32>
    %c1_71 = arith.constant 1 : index
    %c0_72 = arith.constant 0 : index
    %84 = vector.load %arg15[%c1_71, %c0_72] : memref<102x4xf32, #tpu.memory_space<vmem>>, vector<80x4xf32>
    %85 = arith.truncf %84 : vector<80x4xf32> to vector<80x4xbf16>
    %c1_73 = arith.constant 1 : index
    %c0_74 = arith.constant 0 : index
    %c0_75 = arith.constant 0 : index
    %86 = vector.load %arg4[%c1_73, %c0_74, %c0_75] : memref<9x4x8xbf16, #tpu.memory_space<vmem>>, vector<1x4x8xbf16>
    %87 = vector.shape_cast %86 : vector<1x4x8xbf16> to vector<4x8xbf16>
    %cst_76 = arith.constant dense<0.000000e+00> : vector<80x8xf32>
    %88 = tpu.matmul %85, %87, %cst_76 {dimension_numbers = #tpu.dot_dimension_numbers<[1], [0], [0], [1], [0, 0, 1, 1], [], []>} : vector<80x4xbf16>, vector<4x8xbf16>, vector<80x8xf32> -> vector<80x8xf32>
    %89 = arith.addf %83, %88 : vector<80x8xf32>
    %c2_77 = arith.constant 2 : index
    %c0_78 = arith.constant 0 : index
    %90 = vector.load %arg15[%c2_77, %c0_78] : memref<102x4xf32, #tpu.memory_space<vmem>>, vector<80x4xf32>
    %91 = arith.truncf %90 : vector<80x4xf32> to vector<80x4xbf16>
    %c2_79 = arith.constant 2 : index
    %c0_80 = arith.constant 0 : index
    %c0_81 = arith.constant 0 : index
    %92 = vector.load %arg4[%c2_79, %c0_80, %c0_81] : memref<9x4x8xbf16, #tpu.memory_space<vmem>>, vector<1x4x8xbf16>
    %93 = vector.shape_cast %92 : vector<1x4x8xbf16> to vector<4x8xbf16>
    %cst_82 = arith.constant dense<0.000000e+00> : vector<80x8xf32>
    %94 = tpu.matmul %91, %93, %cst_82 {dimension_numbers = #tpu.dot_dimension_numbers<[1], [0], [0], [1], [0, 0, 1, 1], [], []>} : vector<80x4xbf16>, vector<4x8xbf16>, vector<80x8xf32> -> vector<80x8xf32>
    %95 = arith.addf %89, %94 : vector<80x8xf32>
    %c10_83 = arith.constant 10 : index
    %c0_84 = arith.constant 0 : index
    %96 = vector.load %arg15[%c10_83, %c0_84] : memref<102x4xf32, #tpu.memory_space<vmem>>, vector<80x4xf32>
    %97 = arith.truncf %96 : vector<80x4xf32> to vector<80x4xbf16>
    %c3_85 = arith.constant 3 : index
    %c0_86 = arith.constant 0 : index
    %c0_87 = arith.constant 0 : index
    %98 = vector.load %arg4[%c3_85, %c0_86, %c0_87] : memref<9x4x8xbf16, #tpu.memory_space<vmem>>, vector<1x4x8xbf16>
    %99 = vector.shape_cast %98 : vector<1x4x8xbf16> to vector<4x8xbf16>
    %cst_88 = arith.constant dense<0.000000e+00> : vector<80x8xf32>
    %100 = tpu.matmul %97, %99, %cst_88 {dimension_numbers = #tpu.dot_dimension_numbers<[1], [0], [0], [1], [0, 0, 1, 1], [], []>} : vector<80x4xbf16>, vector<4x8xbf16>, vector<80x8xf32> -> vector<80x8xf32>
    %101 = arith.addf %95, %100 : vector<80x8xf32>
    %c11_89 = arith.constant 11 : index
    %c0_90 = arith.constant 0 : index
    %102 = vector.load %arg15[%c11_89, %c0_90] : memref<102x4xf32, #tpu.memory_space<vmem>>, vector<80x4xf32>
    %103 = arith.truncf %102 : vector<80x4xf32> to vector<80x4xbf16>
    %c4_91 = arith.constant 4 : index
    %c0_92 = arith.constant 0 : index
    %c0_93 = arith.constant 0 : index
    %104 = vector.load %arg4[%c4_91, %c0_92, %c0_93] : memref<9x4x8xbf16, #tpu.memory_space<vmem>>, vector<1x4x8xbf16>
    %105 = vector.shape_cast %104 : vector<1x4x8xbf16> to vector<4x8xbf16>
    %cst_94 = arith.constant dense<0.000000e+00> : vector<80x8xf32>
    %106 = tpu.matmul %103, %105, %cst_94 {dimension_numbers = #tpu.dot_dimension_numbers<[1], [0], [0], [1], [0, 0, 1, 1], [], []>} : vector<80x4xbf16>, vector<4x8xbf16>, vector<80x8xf32> -> vector<80x8xf32>
    %107 = arith.addf %101, %106 : vector<80x8xf32>
    %c12_95 = arith.constant 12 : index
    %c0_96 = arith.constant 0 : index
    %108 = vector.load %arg15[%c12_95, %c0_96] : memref<102x4xf32, #tpu.memory_space<vmem>>, vector<80x4xf32>
    %109 = arith.truncf %108 : vector<80x4xf32> to vector<80x4xbf16>
    %c5_97 = arith.constant 5 : index
    %c0_98 = arith.constant 0 : index
    %c0_99 = arith.constant 0 : index
    %110 = vector.load %arg4[%c5_97, %c0_98, %c0_99] : memref<9x4x8xbf16, #tpu.memory_space<vmem>>, vector<1x4x8xbf16>
    %111 = vector.shape_cast %110 : vector<1x4x8xbf16> to vector<4x8xbf16>
    %cst_100 = arith.constant dense<0.000000e+00> : vector<80x8xf32>
    %112 = tpu.matmul %109, %111, %cst_100 {dimension_numbers = #tpu.dot_dimension_numbers<[1], [0], [0], [1], [0, 0, 1, 1], [], []>} : vector<80x4xbf16>, vector<4x8xbf16>, vector<80x8xf32> -> vector<80x8xf32>
    %113 = arith.addf %107, %112 : vector<80x8xf32>
    %c20 = arith.constant 20 : index
    %c0_101 = arith.constant 0 : index
    %114 = vector.load %arg15[%c20, %c0_101] : memref<102x4xf32, #tpu.memory_space<vmem>>, vector<80x4xf32>
    %115 = arith.truncf %114 : vector<80x4xf32> to vector<80x4xbf16>
    %c6_102 = arith.constant 6 : index
    %c0_103 = arith.constant 0 : index
    %c0_104 = arith.constant 0 : index
    %116 = vector.load %arg4[%c6_102, %c0_103, %c0_104] : memref<9x4x8xbf16, #tpu.memory_space<vmem>>, vector<1x4x8xbf16>
    %117 = vector.shape_cast %116 : vector<1x4x8xbf16> to vector<4x8xbf16>
    %cst_105 = arith.constant dense<0.000000e+00> : vector<80x8xf32>
    %118 = tpu.matmul %115, %117, %cst_105 {dimension_numbers = #tpu.dot_dimension_numbers<[1], [0], [0], [1], [0, 0, 1, 1], [], []>} : vector<80x4xbf16>, vector<4x8xbf16>, vector<80x8xf32> -> vector<80x8xf32>
    %119 = arith.addf %113, %118 : vector<80x8xf32>
    %c21_106 = arith.constant 21 : index
    %c0_107 = arith.constant 0 : index
    %120 = vector.load %arg15[%c21_106, %c0_107] : memref<102x4xf32, #tpu.memory_space<vmem>>, vector<80x4xf32>
    %121 = arith.truncf %120 : vector<80x4xf32> to vector<80x4xbf16>
    %c7_108 = arith.constant 7 : index
    %c0_109 = arith.constant 0 : index
    %c0_110 = arith.constant 0 : index
    %122 = vector.load %arg4[%c7_108, %c0_109, %c0_110] : memref<9x4x8xbf16, #tpu.memory_space<vmem>>, vector<1x4x8xbf16>
    %123 = vector.shape_cast %122 : vector<1x4x8xbf16> to vector<4x8xbf16>
    %cst_111 = arith.constant dense<0.000000e+00> : vector<80x8xf32>
    %124 = tpu.matmul %121, %123, %cst_111 {dimension_numbers = #tpu.dot_dimension_numbers<[1], [0], [0], [1], [0, 0, 1, 1], [], []>} : vector<80x4xbf16>, vector<4x8xbf16>, vector<80x8xf32> -> vector<80x8xf32>
    %125 = arith.addf %119, %124 : vector<80x8xf32>
    %c22 = arith.constant 22 : index
    %c0_112 = arith.constant 0 : index
    %126 = vector.load %arg15[%c22, %c0_112] : memref<102x4xf32, #tpu.memory_space<vmem>>, vector<80x4xf32>
    %127 = arith.truncf %126 : vector<80x4xf32> to vector<80x4xbf16>
    %c8_113 = arith.constant 8 : index
    %c0_114 = arith.constant 0 : index
    %c0_115 = arith.constant 0 : index
    %128 = vector.load %arg4[%c8_113, %c0_114, %c0_115] : memref<9x4x8xbf16, #tpu.memory_space<vmem>>, vector<1x4x8xbf16>
    %129 = vector.shape_cast %128 : vector<1x4x8xbf16> to vector<4x8xbf16>
    %cst_116 = arith.constant dense<0.000000e+00> : vector<80x8xf32>
    %130 = tpu.matmul %127, %129, %cst_116 {dimension_numbers = #tpu.dot_dimension_numbers<[1], [0], [0], [1], [0, 0, 1, 1], [], []>} : vector<80x4xbf16>, vector<4x8xbf16>, vector<80x8xf32> -> vector<80x8xf32>
    %131 = arith.addf %125, %130 : vector<80x8xf32>
    %c0_117 = arith.constant 0 : index
    %c0_118 = arith.constant 0 : index
    %132 = vector.load %arg5[%c0_117, %c0_118] : memref<1x8xf32, #tpu.memory_space<vmem>>, vector<1x8xf32>
    %133 = vector.broadcast %132 : vector<1x8xf32> to vector<80x8xf32>
    %134 = arith.addf %131, %133 : vector<80x8xf32>
    %135 = vector.broadcast %4 : vector<80x1xf32> to vector<80x8xf32>
    %136 = arith.mulf %134, %135 : vector<80x8xf32>
    %137 = vector.shape_cast %136 : vector<80x8xf32> to vector<1x80x8xf32>
    %cst_119 = arith.constant dense<0.000000e+00> : vector<1xf32>
    %138 = vector.multi_reduction <add>, %137, %cst_119 [1, 2] : vector<1x80x8xf32> to vector<1xf32>
    %139 = vector.shape_cast %138 : vector<1xf32> to vector<1x1x1xf32>
    %140 = vector.extract %139[0, 0, 0] : f32 from vector<1x1x1xf32>
    %141 = arith.mulf %136, %136 : vector<80x8xf32>
    %142 = vector.shape_cast %141 : vector<80x8xf32> to vector<1x80x8xf32>
    %cst_120 = arith.constant dense<0.000000e+00> : vector<1xf32>
    %143 = vector.multi_reduction <add>, %142, %cst_120 [1, 2] : vector<1x80x8xf32> to vector<1xf32>
    %144 = vector.shape_cast %143 : vector<1xf32> to vector<1x1x1xf32>
    %145 = vector.extract %144[0, 0, 0] : f32 from vector<1x1x1xf32>
    %cst_121 = arith.constant 0.001953125 : f32
    %146 = arith.mulf %140, %cst_121 : f32
    %cst_122 = arith.constant 0.001953125 : f32
    %147 = arith.mulf %145, %cst_122 : f32
    %148 = arith.mulf %146, %146 : f32
    %149 = arith.subf %147, %148 : f32
    %150 = vector.broadcast %146 : f32 to vector<80x8xf32>
    %151 = arith.subf %134, %150 : vector<80x8xf32>
    %cst_123 = arith.constant 9.99999974E-6 : f32
    %152 = arith.addf %149, %cst_123 : f32
    %153 = math.rsqrt %152 : f32
    %154 = vector.broadcast %153 : f32 to vector<80x8xf32>
    %155 = arith.mulf %151, %154 : vector<80x8xf32>
    %c0_124 = arith.constant 0 : index
    %c0_125 = arith.constant 0 : index
    %156 = vector.load %arg6[%c0_124, %c0_125] : memref<1x8xf32, #tpu.memory_space<vmem>>, vector<1x8xf32>
    %157 = vector.broadcast %156 : vector<1x8xf32> to vector<80x8xf32>
    %158 = arith.mulf %155, %157 : vector<80x8xf32>
    %c0_126 = arith.constant 0 : index
    %c0_127 = arith.constant 0 : index
    %159 = vector.load %arg7[%c0_126, %c0_127] : memref<1x8xf32, #tpu.memory_space<vmem>>, vector<1x8xf32>
    %160 = vector.broadcast %159 : vector<1x8xf32> to vector<80x8xf32>
    %161 = arith.addf %158, %160 : vector<80x8xf32>
    %cst_128 = arith.constant 0.000000e+00 : f32
    %162 = vector.broadcast %cst_128 : f32 to vector<80x8xf32>
    %163 = arith.maximumf %161, %162 : vector<80x8xf32>
    %164 = vector.broadcast %4 : vector<80x1xf32> to vector<80x8xf32>
    %165 = arith.mulf %163, %164 : vector<80x8xf32>
    %c11_129 = arith.constant 11 : index
    %c0_130 = arith.constant 0 : index
    %166 = vector.load %arg16[%c11_129, %c0_130] : memref<102x8xf32, #tpu.memory_space<vmem>>, vector<80x8xf32>
    tpu.vector_store %arg16[%c11_129, %c0_130], %165 {strides = array<i32>} : memref<102x8xf32, #tpu.memory_space<vmem>>, vector<80x8xf32>,
    %cst_131 = arith.constant 0.000000e+00 : f32
    %167 = vector.broadcast %cst_131 : f32 to vector<80x8xf32>
    %c0_132 = arith.constant 0 : index
    %c0_133 = arith.constant 0 : index
    %168 = vector.load %arg16[%c0_132, %c0_133] : memref<102x8xf32, #tpu.memory_space<vmem>>, vector<80x8xf32>
    %169 = arith.truncf %168 : vector<80x8xf32> to vector<80x8xbf16>
    %c0_134 = arith.constant 0 : index
    %c0_135 = arith.constant 0 : index
    %c0_136 = arith.constant 0 : index
    %170 = vector.load %arg8[%c0_134, %c0_135, %c0_136] : memref<9x8x8xbf16, #tpu.memory_space<vmem>>, vector<1x8x8xbf16>
    %171 = vector.shape_cast %170 : vector<1x8x8xbf16> to vector<8x8xbf16>
    %cst_137 = arith.constant dense<0.000000e+00> : vector<80x8xf32>
    %172 = tpu.matmul %169, %171, %cst_137 {dimension_numbers = #tpu.dot_dimension_numbers<[1], [0], [0], [1], [0, 0, 1, 1], [], []>} : vector<80x8xbf16>, vector<8x8xbf16>, vector<80x8xf32> -> vector<80x8xf32>
    %173 = arith.addf %167, %172 : vector<80x8xf32>
    %c1_138 = arith.constant 1 : index
    %c0_139 = arith.constant 0 : index
    %174 = vector.load %arg16[%c1_138, %c0_139] : memref<102x8xf32, #tpu.memory_space<vmem>>, vector<80x8xf32>
    %175 = arith.truncf %174 : vector<80x8xf32> to vector<80x8xbf16>
    %c1_140 = arith.constant 1 : index
    %c0_141 = arith.constant 0 : index
    %c0_142 = arith.constant 0 : index
    %176 = vector.load %arg8[%c1_140, %c0_141, %c0_142] : memref<9x8x8xbf16, #tpu.memory_space<vmem>>, vector<1x8x8xbf16>
    %177 = vector.shape_cast %176 : vector<1x8x8xbf16> to vector<8x8xbf16>
    %cst_143 = arith.constant dense<0.000000e+00> : vector<80x8xf32>
    %178 = tpu.matmul %175, %177, %cst_143 {dimension_numbers = #tpu.dot_dimension_numbers<[1], [0], [0], [1], [0, 0, 1, 1], [], []>} : vector<80x8xbf16>, vector<8x8xbf16>, vector<80x8xf32> -> vector<80x8xf32>
    %179 = arith.addf %173, %178 : vector<80x8xf32>
    %c2_144 = arith.constant 2 : index
    %c0_145 = arith.constant 0 : index
    %180 = vector.load %arg16[%c2_144, %c0_145] : memref<102x8xf32, #tpu.memory_space<vmem>>, vector<80x8xf32>
    %181 = arith.truncf %180 : vector<80x8xf32> to vector<80x8xbf16>
    %c2_146 = arith.constant 2 : index
    %c0_147 = arith.constant 0 : index
    %c0_148 = arith.constant 0 : index
    %182 = vector.load %arg8[%c2_146, %c0_147, %c0_148] : memref<9x8x8xbf16, #tpu.memory_space<vmem>>, vector<1x8x8xbf16>
    %183 = vector.shape_cast %182 : vector<1x8x8xbf16> to vector<8x8xbf16>
    %cst_149 = arith.constant dense<0.000000e+00> : vector<80x8xf32>
    %184 = tpu.matmul %181, %183, %cst_149 {dimension_numbers = #tpu.dot_dimension_numbers<[1], [0], [0], [1], [0, 0, 1, 1], [], []>} : vector<80x8xbf16>, vector<8x8xbf16>, vector<80x8xf32> -> vector<80x8xf32>
    %185 = arith.addf %179, %184 : vector<80x8xf32>
    %c10_150 = arith.constant 10 : index
    %c0_151 = arith.constant 0 : index
    %186 = vector.load %arg16[%c10_150, %c0_151] : memref<102x8xf32, #tpu.memory_space<vmem>>, vector<80x8xf32>
    %187 = arith.truncf %186 : vector<80x8xf32> to vector<80x8xbf16>
    %c3_152 = arith.constant 3 : index
    %c0_153 = arith.constant 0 : index
    %c0_154 = arith.constant 0 : index
    %188 = vector.load %arg8[%c3_152, %c0_153, %c0_154] : memref<9x8x8xbf16, #tpu.memory_space<vmem>>, vector<1x8x8xbf16>
    %189 = vector.shape_cast %188 : vector<1x8x8xbf16> to vector<8x8xbf16>
    %cst_155 = arith.constant dense<0.000000e+00> : vector<80x8xf32>
    %190 = tpu.matmul %187, %189, %cst_155 {dimension_numbers = #tpu.dot_dimension_numbers<[1], [0], [0], [1], [0, 0, 1, 1], [], []>} : vector<80x8xbf16>, vector<8x8xbf16>, vector<80x8xf32> -> vector<80x8xf32>
    %191 = arith.addf %185, %190 : vector<80x8xf32>
    %c11_156 = arith.constant 11 : index
    %c0_157 = arith.constant 0 : index
    %192 = vector.load %arg16[%c11_156, %c0_157] : memref<102x8xf32, #tpu.memory_space<vmem>>, vector<80x8xf32>
    %193 = arith.truncf %192 : vector<80x8xf32> to vector<80x8xbf16>
    %c4_158 = arith.constant 4 : index
    %c0_159 = arith.constant 0 : index
    %c0_160 = arith.constant 0 : index
    %194 = vector.load %arg8[%c4_158, %c0_159, %c0_160] : memref<9x8x8xbf16, #tpu.memory_space<vmem>>, vector<1x8x8xbf16>
    %195 = vector.shape_cast %194 : vector<1x8x8xbf16> to vector<8x8xbf16>
    %cst_161 = arith.constant dense<0.000000e+00> : vector<80x8xf32>
    %196 = tpu.matmul %193, %195, %cst_161 {dimension_numbers = #tpu.dot_dimension_numbers<[1], [0], [0], [1], [0, 0, 1, 1], [], []>} : vector<80x8xbf16>, vector<8x8xbf16>, vector<80x8xf32> -> vector<80x8xf32>
    %197 = arith.addf %191, %196 : vector<80x8xf32>
    %c12_162 = arith.constant 12 : index
    %c0_163 = arith.constant 0 : index
    %198 = vector.load %arg16[%c12_162, %c0_163] : memref<102x8xf32, #tpu.memory_space<vmem>>, vector<80x8xf32>
    %199 = arith.truncf %198 : vector<80x8xf32> to vector<80x8xbf16>
    %c5_164 = arith.constant 5 : index
    %c0_165 = arith.constant 0 : index
    %c0_166 = arith.constant 0 : index
    %200 = vector.load %arg8[%c5_164, %c0_165, %c0_166] : memref<9x8x8xbf16, #tpu.memory_space<vmem>>, vector<1x8x8xbf16>
    %201 = vector.shape_cast %200 : vector<1x8x8xbf16> to vector<8x8xbf16>
    %cst_167 = arith.constant dense<0.000000e+00> : vector<80x8xf32>
    %202 = tpu.matmul %199, %201, %cst_167 {dimension_numbers = #tpu.dot_dimension_numbers<[1], [0], [0], [1], [0, 0, 1, 1], [], []>} : vector<80x8xbf16>, vector<8x8xbf16>, vector<80x8xf32> -> vector<80x8xf32>
    %203 = arith.addf %197, %202 : vector<80x8xf32>
    %c20_168 = arith.constant 20 : index
    %c0_169 = arith.constant 0 : index
    %204 = vector.load %arg16[%c20_168, %c0_169] : memref<102x8xf32, #tpu.memory_space<vmem>>, vector<80x8xf32>
    %205 = arith.truncf %204 : vector<80x8xf32> to vector<80x8xbf16>
    %c6_170 = arith.constant 6 : index
    %c0_171 = arith.constant 0 : index
    %c0_172 = arith.constant 0 : index
    %206 = vector.load %arg8[%c6_170, %c0_171, %c0_172] : memref<9x8x8xbf16, #tpu.memory_space<vmem>>, vector<1x8x8xbf16>
    %207 = vector.shape_cast %206 : vector<1x8x8xbf16> to vector<8x8xbf16>
    %cst_173 = arith.constant dense<0.000000e+00> : vector<80x8xf32>
    %208 = tpu.matmul %205, %207, %cst_173 {dimension_numbers = #tpu.dot_dimension_numbers<[1], [0], [0], [1], [0, 0, 1, 1], [], []>} : vector<80x8xbf16>, vector<8x8xbf16>, vector<80x8xf32> -> vector<80x8xf32>
    %209 = arith.addf %203, %208 : vector<80x8xf32>
    %c21_174 = arith.constant 21 : index
    %c0_175 = arith.constant 0 : index
    %210 = vector.load %arg16[%c21_174, %c0_175] : memref<102x8xf32, #tpu.memory_space<vmem>>, vector<80x8xf32>
    %211 = arith.truncf %210 : vector<80x8xf32> to vector<80x8xbf16>
    %c7_176 = arith.constant 7 : index
    %c0_177 = arith.constant 0 : index
    %c0_178 = arith.constant 0 : index
    %212 = vector.load %arg8[%c7_176, %c0_177, %c0_178] : memref<9x8x8xbf16, #tpu.memory_space<vmem>>, vector<1x8x8xbf16>
    %213 = vector.shape_cast %212 : vector<1x8x8xbf16> to vector<8x8xbf16>
    %cst_179 = arith.constant dense<0.000000e+00> : vector<80x8xf32>
    %214 = tpu.matmul %211, %213, %cst_179 {dimension_numbers = #tpu.dot_dimension_numbers<[1], [0], [0], [1], [0, 0, 1, 1], [], []>} : vector<80x8xbf16>, vector<8x8xbf16>, vector<80x8xf32> -> vector<80x8xf32>
    %215 = arith.addf %209, %214 : vector<80x8xf32>
    %c22_180 = arith.constant 22 : index
    %c0_181 = arith.constant 0 : index
    %216 = vector.load %arg16[%c22_180, %c0_181] : memref<102x8xf32, #tpu.memory_space<vmem>>, vector<80x8xf32>
    %217 = arith.truncf %216 : vector<80x8xf32> to vector<80x8xbf16>
    %c8_182 = arith.constant 8 : index
    %c0_183 = arith.constant 0 : index
    %c0_184 = arith.constant 0 : index
    %218 = vector.load %arg8[%c8_182, %c0_183, %c0_184] : memref<9x8x8xbf16, #tpu.memory_space<vmem>>, vector<1x8x8xbf16>
    %219 = vector.shape_cast %218 : vector<1x8x8xbf16> to vector<8x8xbf16>
    %cst_185 = arith.constant dense<0.000000e+00> : vector<80x8xf32>
    %220 = tpu.matmul %217, %219, %cst_185 {dimension_numbers = #tpu.dot_dimension_numbers<[1], [0], [0], [1], [0, 0, 1, 1], [], []>} : vector<80x8xbf16>, vector<8x8xbf16>, vector<80x8xf32> -> vector<80x8xf32>
    %221 = arith.addf %215, %220 : vector<80x8xf32>
    %c0_186 = arith.constant 0 : index
    %c0_187 = arith.constant 0 : index
    %222 = vector.load %arg9[%c0_186, %c0_187] : memref<1x8xf32, #tpu.memory_space<vmem>>, vector<1x8xf32>
    %223 = vector.broadcast %222 : vector<1x8xf32> to vector<80x8xf32>
    %224 = arith.addf %221, %223 : vector<80x8xf32>
    %225 = vector.broadcast %4 : vector<80x1xf32> to vector<80x8xf32>
    %226 = arith.mulf %224, %225 : vector<80x8xf32>
    %227 = vector.shape_cast %226 : vector<80x8xf32> to vector<1x80x8xf32>
    %cst_188 = arith.constant dense<0.000000e+00> : vector<1xf32>
    %228 = vector.multi_reduction <add>, %227, %cst_188 [1, 2] : vector<1x80x8xf32> to vector<1xf32>
    %229 = vector.shape_cast %228 : vector<1xf32> to vector<1x1x1xf32>
    %230 = vector.extract %229[0, 0, 0] : f32 from vector<1x1x1xf32>
    %231 = arith.mulf %226, %226 : vector<80x8xf32>
    %232 = vector.shape_cast %231 : vector<80x8xf32> to vector<1x80x8xf32>
    %cst_189 = arith.constant dense<0.000000e+00> : vector<1xf32>
    %233 = vector.multi_reduction <add>, %232, %cst_189 [1, 2] : vector<1x80x8xf32> to vector<1xf32>
    %234 = vector.shape_cast %233 : vector<1xf32> to vector<1x1x1xf32>
    %235 = vector.extract %234[0, 0, 0] : f32 from vector<1x1x1xf32>
    %cst_190 = arith.constant 0.001953125 : f32
    %236 = arith.mulf %230, %cst_190 : f32
    %cst_191 = arith.constant 0.001953125 : f32
    %237 = arith.mulf %235, %cst_191 : f32
    %238 = arith.mulf %236, %236 : f32
    %239 = arith.subf %237, %238 : f32
    %240 = vector.broadcast %236 : f32 to vector<80x8xf32>
    %241 = arith.subf %224, %240 : vector<80x8xf32>
    %cst_192 = arith.constant 9.99999974E-6 : f32
    %242 = arith.addf %239, %cst_192 : f32
    %243 = math.rsqrt %242 : f32
    %244 = vector.broadcast %243 : f32 to vector<80x8xf32>
    %245 = arith.mulf %241, %244 : vector<80x8xf32>
    %c0_193 = arith.constant 0 : index
    %c0_194 = arith.constant 0 : index
    %246 = vector.load %arg10[%c0_193, %c0_194] : memref<1x8xf32, #tpu.memory_space<vmem>>, vector<1x8xf32>
    %247 = vector.broadcast %246 : vector<1x8xf32> to vector<80x8xf32>
    %248 = arith.mulf %245, %247 : vector<80x8xf32>
    %c0_195 = arith.constant 0 : index
    %c0_196 = arith.constant 0 : index
    %249 = vector.load %arg11[%c0_195, %c0_196] : memref<1x8xf32, #tpu.memory_space<vmem>>, vector<1x8xf32>
    %250 = vector.broadcast %249 : vector<1x8xf32> to vector<80x8xf32>
    %251 = arith.addf %248, %250 : vector<80x8xf32>
    %cst_197 = arith.constant 0.000000e+00 : f32
    %252 = vector.broadcast %cst_197 : f32 to vector<80x8xf32>
    %253 = arith.maximumf %251, %252 : vector<80x8xf32>
    %254 = vector.broadcast %4 : vector<80x1xf32> to vector<80x8xf32>
    %255 = arith.mulf %253, %254 : vector<80x8xf32>
    %c0_198 = arith.constant 0 : index
    %c0_199 = arith.constant 0 : index
    %c0_200 = arith.constant 0 : index
    %256 = vector.load %arg2[%c0_198, %c0_199, %c0_200] : memref<1x1x128xf32, #tpu.memory_space<vmem>>, vector<1x1x128xf32>
    %257 = vector.shape_cast %256 : vector<1x1x128xf32> to vector<1x128xf32>
    %cst_201 = arith.constant 0.000000e+00 : f32
    %258 = vector.broadcast %cst_201 : f32 to vector<1x128xf32>
    %259 = arith.maximumf %257, %258 : vector<1x128xf32>
    %c0_202 = arith.constant 0 : index
    %c0_203 = arith.constant 0 : index
    %260 = vector.load %arg12[%c0_202, %c0_203] : memref<128x8xf32, #tpu.memory_space<vmem>>, vector<128x8xf32>
    %cst_204 = arith.constant dense<0.000000e+00> : vector<1x8xf32>
    %261 = tpu.matmul %259, %260, %cst_204 {dimension_numbers = #tpu.dot_dimension_numbers<[1], [0], [0], [1], [0, 0, 1, 1], [], []>} : vector<1x128xf32>, vector<128x8xf32>, vector<1x8xf32> -> vector<1x8xf32>
    %c0_205 = arith.constant 0 : index
    %c0_206 = arith.constant 0 : index
    %262 = vector.load %arg13[%c0_205, %c0_206] : memref<1x8xf32, #tpu.memory_space<vmem>>, vector<1x8xf32>
    %263 = arith.addf %261, %262 : vector<1x8xf32>
    %264 = vector.broadcast %263 : vector<1x8xf32> to vector<80x8xf32>
    %265 = arith.addf %255, %264 : vector<80x8xf32>
    %c0_207 = arith.constant 0 : index
    %c0_208 = arith.constant 0 : index
    %c0_209 = arith.constant 0 : index
    %266 = vector.load %arg14[%c0_207, %c0_208, %c0_209] : memref<1x80x8xf32, #tpu.memory_space<vmem>>, vector<1x80x8xf32>
    %267 = vector.shape_cast %266 : vector<1x80x8xf32> to vector<80x8xf32>
    %268 = vector.shape_cast %265 : vector<80x8xf32> to vector<1x80x8xf32>
    tpu.vector_store %arg14[%c0_207, %c0_208, %c0_209], %268 {strides = array<i32>} : memref<1x80x8xf32, #tpu.memory_space<vmem>>, vector<1x80x8xf32>,
    return
  }
  func.func @transform_0(%arg0: i32) -> (i32, i32, i32, i32) {
    %c0_i32 = arith.constant 0 : i32
    %c0_i32_0 = arith.constant 0 : i32
    %c0_i32_1 = arith.constant 0 : i32
    %c0_i32_2 = arith.constant 0 : i32
    return %arg0, %c0_i32, %c0_i32_0, %c0_i32_1 : i32, i32, i32, i32
  }
  func.func @transform_1(%arg0: i32) -> (i32, i32, i32) {
    %c0_i32 = arith.constant 0 : i32
    %c0_i32_0 = arith.constant 0 : i32
    %c0_i32_1 = arith.constant 0 : i32
    return %arg0, %c0_i32, %c0_i32_0 : i32, i32, i32
  }
  func.func @transform_2(%arg0: i32) -> (i32, i32) {
    %c0_i32 = arith.constant 0 : i32
    %c0_i32_0 = arith.constant 0 : i32
    %c0_i32_1 = arith.constant 0 : i32
    return %c0_i32, %c0_i32_0 : i32, i32
  }
  func.func @transform_3(%arg0: i32) -> (i32, i32, i32) {
    %c0_i32 = arith.constant 0 : i32
    %c0_i32_0 = arith.constant 0 : i32
    %c0_i32_1 = arith.constant 0 : i32
    %c0_i32_2 = arith.constant 0 : i32
    return %c0_i32, %c0_i32_0, %c0_i32_1 : i32, i32, i32
  }
  func.func @transform_4(%arg0: i32) -> (i32, i32) {
    %c0_i32 = arith.constant 0 : i32
    %c0_i32_0 = arith.constant 0 : i32
    %c0_i32_1 = arith.constant 0 : i32
    return %c0_i32, %c0_i32_0 : i32, i32
  }
  func.func @transform_5(%arg0: i32) -> (i32, i32) {
    %c0_i32 = arith.constant 0 : i32
    %c0_i32_0 = arith.constant 0 : i32
    %c0_i32_1 = arith.constant 0 : i32
    return %c0_i32, %c0_i32_0 : i32, i32
  }
  func.func @transform_6(%arg0: i32) -> (i32, i32) {
    %c0_i32 = arith.constant 0 : i32
    %c0_i32_0 = arith.constant 0 : i32
    %c0_i32_1 = arith.constant 0 : i32
    return %c0_i32, %c0_i32_0 : i32, i32
  }
  func.func @transform_7(%arg0: i32) -> (i32, i32, i32) {
    %c0_i32 = arith.constant 0 : i32
    %c0_i32_0 = arith.constant 0 : i32
    %c0_i32_1 = arith.constant 0 : i32
    %c0_i32_2 = arith.constant 0 : i32
    return %c0_i32, %c0_i32_0, %c0_i32_1 : i32, i32, i32
  }
  func.func @transform_8(%arg0: i32) -> (i32, i32) {
    %c0_i32 = arith.constant 0 : i32
    %c0_i32_0 = arith.constant 0 : i32
    %c0_i32_1 = arith.constant 0 : i32
    return %c0_i32, %c0_i32_0 : i32, i32
  }
  func.func @transform_9(%arg0: i32) -> (i32, i32) {
    %c0_i32 = arith.constant 0 : i32
    %c0_i32_0 = arith.constant 0 : i32
    %c0_i32_1 = arith.constant 0 : i32
    return %c0_i32, %c0_i32_0 : i32, i32
  }
  func.func @transform_10(%arg0: i32) -> (i32, i32) {
    %c0_i32 = arith.constant 0 : i32
    %c0_i32_0 = arith.constant 0 : i32
    %c0_i32_1 = arith.constant 0 : i32
    return %c0_i32, %c0_i32_0 : i32, i32
  }
  func.func @transform_11(%arg0: i32) -> (i32, i32) {
    %c0_i32 = arith.constant 0 : i32
    %c0_i32_0 = arith.constant 0 : i32
    %c0_i32_1 = arith.constant 0 : i32
    return %c0_i32, %c0_i32_0 : i32, i32
  }
  func.func @transform_12(%arg0: i32) -> (i32, i32) {
    %c0_i32 = arith.constant 0 : i32
    %c0_i32_0 = arith.constant 0 : i32
    %c0_i32_1 = arith.constant 0 : i32
    return %c0_i32, %c0_i32_0 : i32, i32
  }
  func.func @transform_13(%arg0: i32) -> (i32, i32, i32) {
    %c0_i32 = arith.constant 0 : i32
    %c0_i32_0 = arith.constant 0 : i32
    %c0_i32_1 = arith.constant 0 : i32
    return %arg0, %c0_i32, %c0_i32_0 : i32, i32, i32
  }
}

</mosaic_0001>

<bundles_post_ra>
// kernel: down_forward.1
= control target key start
LH: loop header
LB: loop body
LE: loop exit
PB: predicated region body
PF: predicated region fallthrough
CT: control target
= control target key end

     0   :  { %s4065_s25 = smov 0   ;;  %s5054_s0 = inlined_call_operand.vmem [shape: f32[2,16,8,8], index: 0, kind: input, shape index: {}]   ;;  %s5055_s1 = inlined_call_operand.vmem [shape: f32[2,1,128], index: 1, kind: input, shape index: {}]   ;;  %s5056_s2 = inlined_call_operand.vmem [shape: f32[80,1], index: 2, kind: input, shape index: {}]   ;;  %s5057_s3 = inlined_call_operand.vmem [shape: bf16[9,4,8], index: 3, kind: input, shape index: {}]   ;;  %s5058_s4 = inlined_call_operand.vmem [shape: f32[1,8], index: 4, kind: input, shape index: {}]   ;;  %s5059_s5 = inlined_call_operand.vmem [shape: f32[1,8], index: 5, kind: input, shape index: {}]   ;;  %s5060_s6 = inlined_call_operand.vmem [shape: f32[1,8], index: 6, kind: input, shape index: {}]   ;;  %s5061_s7 = inlined_call_operand.vmem [shape: bf16[9,8,8], index: 7, kind: input, shape index: {}]   ;;  %s5062_s8 = inlined_call_operand.vmem [shape: f32[1,8], index: 8, kind: input, shape index: {}]   ;;  %s5063_s9 = inlined_call_operand.vmem [shape: f32[1,8], index: 9, kind: input, shape index: {}]   ;;  %s5064_s10 = inlined_call_operand.vmem [shape: f32[1,8], index: 10, kind: input, shape index: {}]   ;;  %s5065_s11 = inlined_call_operand.vmem [shape: f32[128,8], index: 11, kind: input, shape index: {}]   ;;  %s5066_s12 = inlined_call_operand.vmem [shape: f32[1,8], index: 12, kind: input, shape index: {}]   ;;  %s5067_s13 = inlined_call_operand.vmem [shape: f32[2,80,8], index: 13, kind: output, shape index: {}]  }
   0x1 LB: > { %s3258_s26 = sadd.s32 4294967295, %s3989_s25   ;;  %p3262_p0 = scmp.ge.s32.totalorder %s3989_s25, 1  ;;  %s3989_s25 = sphi %s4065_s25, %s23_s25  }
   0x2   : > { %p395_p1 = scmp.lt.s32.totalorder %s3989_s25, 3 }
   0x4   : > { %p396_p2 = pnand %p3262_p0, %p395_p1 }
   0x5   : > { %p4073_p3 = scmp.lt.s32.totalorder (!%p396_p2), %s3258_s26, 1  ;;  %s3993_s19 = smov (!%p396_p2), 124  }
   0x6   : > { %399 = sbr.rel (%p396_p2) target bundleno = 1532 (0x5fc), region = 72 }
   0xb   : > { %vm456_vm0 = vcmask 31744   ;;  %v3991_v0 = vmov 0.0   ;;  %s5070_s26 = smov (!%p4073_p3, %s3258_s26), 1  ;;  %v3281_v1 = vld [vmem:[%s5057_s3 + $0x2] sm:$0x3]  ;;  %vm631_vm1 = vcmask 1041408  }
   0xc   : > { %458 = vst.msk [vmem:[#allocation2 + $0x8] sm:$0xff] %vm456_vm0, %v3991_v0  ;;  %459 = vst.msk [vmem:[#allocation2 + $0x10] sm:$0xff] %vm456_vm0, %v3991_v0  ;;  %3521 = vmatprep.subr.bf16.mxu0 %v3991_v0  ;;  %3543 = vmatprep.subr.bf16.mxu1 %v3991_v0  ;;  %v598_v2 = vld [vmem:[%s5057_s3] sm:$0x3]  ;;  %s3395_s15 = sshll.u32 %s5070_s26, 7  ;;  %v633_v3 = vsel %vm631_vm1, %v3281_v1, 0  ;;  %s449_s24 = scalar_lea.vmem %s5055_s1, %s5070_s26 }
   0xd   : > { %457 = vst.msk [vmem:[#allocation2] sm:$0xff] %vm456_vm0, %v3991_v0  ;;  %460 = vst.msk [vmem:[#allocation2 + $0x18] sm:$0xff] %vm456_vm0, %v3991_v0  ;;  %v724_v4 = vsel %vm631_vm1, %v598_v2, 0  ;;  %s4119_s18 = scalar_lea.vmem %s5054_s0, %s3395_s15  ;;  %3522 = vmatpush3.bf16.msra.mxu0 %v633_v3  ;;  %vm3992_vm2 = vmmov 0   ;;  %vm469_vm3 = vcmask 29696   ;;  %vm471_vm4 = vcmask 64512  }
   0xe   : > { %461 = vst.msk [vmem:[#allocation2 + $0x20] sm:$0xff] %vm456_vm0, %v3991_v0  ;;  %462 = vst.msk [vmem:[#allocation2 + $0x28] sm:$0xff] %vm456_vm0, %v3991_v0  ;;  %3544 = vmatpush3.bf16.msra.mxu1 %v724_v4  ;;  %v496_v5 = vld [vmem:[%s4119_s18] sm:$0xff]  ;;  %v3266_v6 = vld [vmem:[%s4119_s18 + $0x8] sm:$0xff]  ;;  %3565 = vmatprep.subr.bf16.mxu0 %v3991_v0  ;;  %vm1910_vm5 = vcmask 1043456   ;;  %vm484_vm6 = vcmask 62464  }
   0xf   : > { %463 = vst.msk [vmem:[#allocation2 + $0x30] sm:$0xff] %vm456_vm0, %v3991_v0  ;;  %464 = vst.msk [vmem:[#allocation2 + $0x38] sm:$0xff] %vm456_vm0, %v3991_v0  ;;  %v3269_v7 = vld [vmem:[%s4119_s18 + $0x20] sm:$0xff]  ;;  %3587 = vmatprep.subr.bf16.mxu1 %v3991_v0  ;;  %v499_v8 = vmax.f32 %v496_v5, %v3266_v6  ;;  %v3270_v9 = vld [vmem:[%s4119_s18 + $0x28] sm:$0xff]  ;;  %3523 = vmatprep.mubr.msk.bf16.mxu0 %vm3992_vm2, %v3991_v0 }
  0x10   : > { %465 = vst.msk [vmem:[#allocation2 + $0x40] sm:$0xff] %vm456_vm0, %v3991_v0  ;;  %466 = vst.msk [vmem:[#allocation2 + $0x48] sm:$0xff] %vm456_vm0, %v3991_v0  ;;  %v3267_v10 = vld [vmem:[%s4119_s18 + $0x10] sm:$0xff]  ;;  %v3268_v11 = vld [vmem:[%s4119_s18 + $0x18] sm:$0xff]  ;;  %3545 = vmatprep.mubr.msk.bf16.mxu1 %vm3992_vm2, %v3991_v0  ;;  %v521_v12 = vmax.f32 %v3269_v7, %v3270_v9 }
  0x11   : > { %467 = vst.msk [vmem:[#allocation2 + $0x50] sm:$0xff] %vm456_vm0, %v3991_v0  ;;  %468 = vst.msk [vmem:[#allocation2 + $0x58] sm:$0xff] %vm456_vm0, %v3991_v0  ;;  %v3271_v13 = vld [vmem:[%s4119_s18 + $0x30] sm:$0xff]  ;;  %v3272_v14 = vld [vmem:[%s4119_s18 + $0x38] sm:$0xff]  ;;  %501 = vrot.lane.b32.xlu0 %v499_v8, %s3993_s19  ;;  %v510_v15 = vmax.f32 %v3267_v10, %v3268_v11 }
  0x12   : > { %523 = vrot.lane.b32.xlu1 %v521_v12, %s3993_s19  ;;  %v532_v16 = vmax.f32 %v3271_v13, %v3272_v14  ;;  %v3273_v17 = vld [vmem:[%s4119_s18 + $0x40] sm:$0xff]  ;;  %v3274_v18 = vld [vmem:[%s4119_s18 + $0x48] sm:$0xff]  ;;  %v3275_v19 = vld [vmem:[%s4119_s18 + $0x50] sm:$0xff]  ;;  %470 = vst.msk [vmem:[#allocation2 + $0x60] sm:$0x3f] %vm469_vm3, %v3991_v0 }
  0x13   : > { %v3276_v20 = vld [vmem:[%s4119_s18 + $0x58] sm:$0xff]  ;;  %v543_v21 = vmax.f32 %v3273_v17, %v3274_v18  ;;  %v3277_v23 = vld [vmem:[%s4119_s18 + $0x60] sm:$0xff]  ;;  %v3278_v24 = vld [vmem:[%s4119_s18 + $0x68] sm:$0xff]  ;;  %472 = vst.msk [vmem:[#allocation3] sm:$0xff] %vm471_vm4, %v3991_v0 }
  0x14   : > { %v554_v22 = vmax.f32 %v3275_v19, %v3276_v20  ;;  %v3279_v25 = vld [vmem:[%s4119_s18 + $0x70] sm:$0xff]  ;;  %v3280_v26 = vld [vmem:[%s4119_s18 + $0x78] sm:$0xff]  ;;  %v565_v27 = vmax.f32 %v3277_v23, %v3278_v24  ;;  %v599_v38 = vld [vmem:[#allocation2 + $0x1] sm:$0xff]  ;;  %473 = vst.msk [vmem:[#allocation3 + $0x8] sm:$0xff] %vm471_vm4, %v3991_v0 }
  0x15   : > { %512 = vrot.lane.b32.xlu0 %v510_v15, %s3993_s19  ;;  %v576_v28 = vmax.f32 %v3279_v25, %v3280_v26  ;;  %v583_v39 = vld [vmem:[#allocation2] sm:$0xff]  ;;  %v3304_v19 = vld [vmem:[%s5057_s3 + $0x8] sm:$0x3]  ;;  %v3310_v20 = vld [vmem:[%s5057_s3 + $0xa] sm:$0x3]  ;;  %474 = vst.msk [vmem:[#allocation3 + $0x10] sm:$0xff] %vm471_vm4, %v3991_v0 }
  0x16   : > { %534 = vrot.lane.b32.xlu1 %v532_v16, %s3993_s19  ;;  %v3292_v40 = vld [vmem:[%s5057_s3 + $0x4] sm:$0x3]  ;;  %v3298_v43 = vld [vmem:[%s5057_s3 + $0x6] sm:$0x3]  ;;  %v1068_v23 = vsel %vm631_vm1, %v3304_v19, 0  ;;  %v1186_v24 = vsel %vm631_vm1, %v3310_v20, 0 }
  0x17   : > { %v832_v49 = vsel %vm631_vm1, %v3292_v40, 0  ;;  %v950_v51 = vsel %vm631_vm1, %v3298_v43, 0  ;;  %v3316_v43 = vld [vmem:[%s5057_s3 + $0xc] sm:$0x3]  ;;  %v489_v19 = vld [vmem:[%s5056_s2 + $0x18] sm:$0xff]  ;;  %v490_v20 = vld [vmem:[%s5056_s2 + $0x20] sm:$0xff] }
  0x18   : > { %475 = vst.msk [vmem:[#allocation3 + $0x18] sm:$0xff] %vm471_vm4, %v3991_v0  ;;  %476 = vst.msk [vmem:[#allocation3 + $0x20] sm:$0xff] %vm471_vm4, %v3991_v0 }
  0x19   : > { %545 = vrot.lane.b32.xlu0 %v543_v21, %s3993_s19  ;;  %477 = vst.msk [vmem:[#allocation3 + $0x28] sm:$0xff] %vm471_vm4, %v3991_v0  ;;  %478 = vst.msk [vmem:[#allocation3 + $0x30] sm:$0xff] %vm471_vm4, %v3991_v0 }
  0x1a   : > { %556 = vrot.lane.b32.xlu1 %v554_v22, %s3993_s19  ;;  %479 = vst.msk [vmem:[#allocation3 + $0x38] sm:$0xff] %vm471_vm4, %v3991_v0  ;;  %480 = vst.msk [vmem:[#allocation3 + $0x40] sm:$0xff] %vm471_vm4, %v3991_v0 }
  0x1b   : > { %481 = vst.msk [vmem:[#allocation3 + $0x48] sm:$0xff] %vm471_vm4, %v3991_v0  ;;  %482 = vst.msk [vmem:[#allocation3 + $0x50] sm:$0xff] %vm471_vm4, %v3991_v0 }
  0x1c   : > { %483 = vst.msk [vmem:[#allocation3 + $0x58] sm:$0xff] %vm471_vm4, %v3991_v0 }
  0x1d   : > { %567 = vrot.lane.b32.xlu0 %v565_v27, %s3993_s19  ;;  %485 = vst.msk [vmem:[#allocation3 + $0x60] sm:$0x3f] %vm484_vm6, %v3991_v0 }
  0x1e   : > { %578 = vrot.lane.b32.xlu1 %v576_v28, %s3993_s19 }
  0x83   : > { %v502_v29 = vpop.permute.xlu0 %501 }
  0x84   : > { %v504_v30 = vmax.f32 %v499_v8, %v502_v29  ;;  %v524_v31 = vpop.permute.xlu1 %523 }
  0x85   : > { %v526_v32 = vmax.f32 %v521_v12, %v524_v31 }
  0x86   : > { %505 = vst.msk [vmem:[#allocation2 + $0xb] sm:$0xff] %vm456_vm0, %v504_v30 }
  0x87   : > { %527 = vst.msk [vmem:[#allocation2 + $0x1f] sm:$0xff] %vm456_vm0, %v526_v32  ;;  %v513_v33 = vpop.permute.xlu0 %512 }
  0x88   : > { %v515_v34 = vmax.f32 %v510_v15, %v513_v33  ;;  %v535_v35 = vpop.permute.xlu1 %534 }
  0x89   : > { %v537_v36 = vmax.f32 %v532_v16, %v535_v35  ;;  %v799_v16 = vld [vmem:[#allocation2 + $0x2] sm:$0xff] }
  0x8a   : > { %516 = vst.msk [vmem:[#allocation2 + $0x15] sm:$0xff] %vm456_vm0, %v515_v34 }
  0x8b   : > { %538 = vst.msk [vmem:[#allocation2 + $0x29] sm:$0xff] %vm456_vm0, %v537_v36  ;;  %v546_v37 = vpop.permute.xlu0 %545 }
  0x8c   : > { %v548_v41 = vmax.f32 %v543_v21, %v546_v37  ;;  %v557_v42 = vpop.permute.xlu1 %556 }
  0x8d   : > { %v600_v44 = vld [vmem:[#allocation2 + $0x9] sm:$0xff]  ;;  %v559_v46 = vmax.f32 %v554_v22, %v557_v42 }
  0x8e   : > { %v584_v45 = vld [vmem:[#allocation2 + $0x8] sm:$0xff]  ;;  %549 = vst.msk [vmem:[#allocation2 + $0x33] sm:$0xff] %vm456_vm0, %v548_v41  ;;  %v609_v47 = vpack.c.bf16 %v600_v44, %v599_v38  ;;  %v587_v63 = vld [vmem:[#allocation2 + $0x20] sm:$0xff] }
  0x8f   : > { %v593_v48 = vpack.c.bf16 %v584_v45, %v583_v39  ;;  %560 = vst.msk [vmem:[#allocation2 + $0x3d] sm:$0xff] %vm456_vm0, %v559_v46  ;;  %v568_v50 = vpop.permute.xlu0 %567  ;;  %v603_v61 = vld [vmem:[#allocation2 + $0x21] sm:$0xff]  ;;  %v800_v17 = vld [vmem:[#allocation2 + $0xa] sm:$0xff] }
  0x90   : > { %3524 = vmatmul.mubr.msk.bf16.vlgmr.msra.gmra.mxu0 %vm456_vm0, %v609_v47  ;;  %v579_v52 = vpop.permute.xlu1 %578  ;;  %v570_v53 = vmax.f32 %v565_v27, %v568_v50  ;;  %v809_v21 = vpack.c.bf16 %v800_v17, %v799_v16  ;;  %v3322_v44 = vld [vmem:[%s5057_s3 + $0xe] sm:$0x3]  ;;  %v1390_v16 = vld [vmem:[#allocation2 + $0x1d] sm:$0xff] }
  0x91   : > { %3546 = vmatmul.mubr.msk.bf16.vlgmr.msra.gmra.mxu1 %vm456_vm0, %v593_v48  ;;  %3566 = vmatpush3.bf16.msra.mxu0 %v832_v49  ;;  %v581_v54 = vmax.f32 %v576_v28, %v579_v52  ;;  %v601_v55 = vld [vmem:[#allocation2 + $0x11] sm:$0xff]  ;;  %v602_v56 = vld [vmem:[#allocation2 + $0x19] sm:$0xff]  ;;  %v1304_v49 = vsel %vm631_vm1, %v3316_v43, 0  ;;  %v1422_v50 = vsel %vm631_vm1, %v3322_v44, 0 }
  0x92   : > { %3527 = vmatprep.mubr.msk.bf16.mxu0 %vm3992_vm2, %v3991_v0  ;;  %3549 = vmatprep.mubr.msk.bf16.mxu1 %vm3992_vm2, %v3991_v0  ;;  %571 = vst.msk [vmem:[#allocation2 + $0x47] sm:$0xff] %vm456_vm0, %v570_v53  ;;  %v585_v57 = vld [vmem:[#allocation2 + $0x10] sm:$0xff]  ;;  %v586_v58 = vld [vmem:[#allocation2 + $0x18] sm:$0xff]  ;;  %v610_v59 = vpack.c.bf16 %v602_v56, %v601_v55  ;;  %v588_v1 = vld [vmem:[#allocation2 + $0x28] sm:$0xff] }
  0x93   : > { %3588 = vmatpush3.bf16.msra.mxu1 %v950_v51  ;;  %582 = vst.msk [vmem:[#allocation2 + $0x51] sm:$0xff] %vm456_vm0, %v581_v54  ;;  %3609 = vmatprep.subr.bf16.mxu0 %v3991_v0  ;;  %v594_v60 = vpack.c.bf16 %v586_v58, %v585_v57  ;;  %v604_v62 = vld [vmem:[#allocation2 + $0x29] sm:$0xff]  ;;  %v595_v3 = vpack.c.bf16 %v588_v1, %v587_v63  ;;  %v918_v18 = vld [vmem:[#allocation2 + $0x12] sm:$0xff]  ;;  %v802_v25 = vld [vmem:[#allocation2 + $0x1a] sm:$0xff] }
  0x94   : > { %3631 = vmatprep.subr.bf16.mxu1 %v3991_v0  ;;  %v611_v2 = vpack.c.bf16 %v604_v62, %v603_v61  ;;  %v927_v22 = vpack.c.bf16 %v918_v18, %v800_v17  ;;  %v920_v26 = vld [vmem:[#allocation2 + $0x22] sm:$0xff]  ;;  %v810_v27 = vpack.c.bf16 %v802_v25, %v918_v18  ;;  %v804_v29 = vld [vmem:[#allocation2 + $0x2a] sm:$0xff]  ;;  %v1036_v41 = vld [vmem:[#allocation2 + $0x13] sm:$0xff] }
  0x95   : > { %v605_v4 = vld [vmem:[#allocation2 + $0x31] sm:$0xff]  ;;  %v928_v28 = vpack.c.bf16 %v920_v26, %v802_v25  ;;  %v811_v31 = vpack.c.bf16 %v804_v29, %v920_v26  ;;  %v1037_v51 = vld [vmem:[#allocation2 + $0x1b] sm:$0xff]  ;;  %v1038_v52 = vld [vmem:[#allocation2 + $0x23] sm:$0xff] }
  0x96   : > { %v606_v5 = vld [vmem:[#allocation2 + $0x39] sm:$0xff]  ;;  %v589_v6 = vld [vmem:[#allocation2 + $0x30] sm:$0xff]  ;;  %v4249_v54 = vld [vmem:[#allocation2 + $0x24] sm:$0xff]  ;;  %v1046_v55 = vpack.c.bf16 %v1038_v52, %v1037_v51 }
  0x97   : > { %v590_v7 = vld [vmem:[#allocation2 + $0x38] sm:$0xff]  ;;  %v612_v8 = vpack.c.bf16 %v606_v5, %v605_v4  ;;  %v1035_v45 = vld [vmem:[#allocation2 + $0xb] sm:$0xff] }
  0x98   : > { %3528 = vmatmul.mubr.msk.bf16.gmra.mxu0 %vm456_vm0, %v610_v59  ;;  %v596_v9 = vpack.c.bf16 %v590_v7, %v589_v6  ;;  %v922_v30 = vld [vmem:[#allocation2 + $0x32] sm:$0xff]  ;;  %v806_v33 = vld [vmem:[#allocation2 + $0x3a] sm:$0xff]  ;;  %v1045_v47 = vpack.c.bf16 %v1036_v41, %v1035_v45  ;;  %v3994_v6 = vmov 0   ;;  %v3328_v17 = vld [vmem:[%s5057_s3 + $0x10] sm:$0x3] }
  0x99   : > { %3550 = vmatmul.mubr.msk.bf16.gmra.mxu1 %vm456_vm0, %v594_v60  ;;  %3531 = vmatprep.mubr.msk.bf16.mxu0 %vm3992_vm2, %v3991_v0  ;;  %v607_v10 = vld [vmem:[#allocation2 + $0x41] sm:$0xff]  ;;  %v608_v11 = vld [vmem:[#allocation2 + $0x49] sm:$0xff]  ;;  %v929_v32 = vpack.c.bf16 %v922_v30, %v804_v29  ;;  %v812_v35 = vpack.c.bf16 %v806_v33, %v922_v30  ;;  %v4232_v42 = vld [vmem:[#allocation2 + $0x14] sm:$0xff] }
  0x9a   : > { %3553 = vmatprep.mubr.msk.bf16.mxu1 %vm3992_vm2, %v3991_v0  ;;  %v591_v12 = vld [vmem:[#allocation2 + $0x40] sm:$0xff]  ;;  %v592_v13 = vld [vmem:[#allocation2 + $0x48] sm:$0xff]  ;;  %v613_v14 = vpack.c.bf16 %v608_v11, %v607_v10  ;;  %v926_v38 = vld [vmem:[#allocation2 + $0x52] sm:$0xff]  ;;  %3977 = vset.pattern.permute.xlu0 %v3994_v6 }
  0x9b   : > { %v597_v15 = vpack.c.bf16 %v592_v13, %v591_v12  ;;  %v924_v34 = vld [vmem:[#allocation2 + $0x42] sm:$0xff]  ;;  %v808_v37 = vld [vmem:[#allocation2 + $0x4a] sm:$0xff]  ;;  %v1040_v58 = vld [vmem:[#allocation2 + $0x33] sm:$0xff]  ;;  %3978 = vset.pattern.permute.xlu1 %v3994_v6 }
  0x9c   : > { %v930_v36 = vpack.c.bf16 %v924_v34, %v806_v33  ;;  %v813_v39 = vpack.c.bf16 %v808_v37, %v924_v34  ;;  %v931_v40 = vpack.c.bf16 %v926_v38, %v808_v37  ;;  %v1153_v46 = vld [vmem:[#allocation2 + $0xc] sm:$0xff]  ;;  %v1155_v53 = vld [vmem:[#allocation2 + $0x1c] sm:$0xff]  ;;  %v4260_v59 = vld [vmem:[#allocation2 + $0x34] sm:$0xff] }
  0x9d   : > { %v1163_v48 = vpack.c.bf16 %v4232_v42, %v1153_v46  ;;  %v1164_v56 = vpack.c.bf16 %v4249_v54, %v1155_v53  ;;  %v1039_v57 = vld [vmem:[#allocation2 + $0x2b] sm:$0xff]  ;;  %v1041_v63 = vld [vmem:[#allocation2 + $0x3b] sm:$0xff]  ;;  %v1042_v1 = vld [vmem:[#allocation2 + $0x43] sm:$0xff] }
  0x9e   : > { %v4262_v60 = vld [vmem:[#allocation2 + $0x2c] sm:$0xff]  ;;  %v1047_v61 = vpack.c.bf16 %v1040_v58, %v1039_v57  ;;  %v1048_v4 = vpack.c.bf16 %v1042_v1, %v1041_v63  ;;  %v486_v10 = vld [vmem:[%s5056_s2] sm:$0xff]  ;;  %v1389_v18 = vld [vmem:[#allocation2 + $0x15] sm:$0xff] }
  0x9f   : > { %v1165_v62 = vpack.c.bf16 %v4260_v59, %v4262_v60  ;;  %v1043_v7 = vld [vmem:[#allocation2 + $0x4b] sm:$0xff]  ;;  %1644 = vperm.xlu0 %3977, %v486_v10   ;;  %v494_v29 = vld [vmem:[%s5056_s2 + $0x40] sm:$0xff]  ;;  %v1282_v30 = vpack.c.bf16 %v4262_v60, %v4249_v54  ;;  %v1393_v33 = vld [vmem:[#allocation2 + $0x35] sm:$0xff] }
  0xa0   : > { %3532 = vmatmul.mubr.msk.bf16.gmra.mxu0 %vm456_vm0, %v611_v2  ;;  %v4272_v2 = vld [vmem:[#allocation2 + $0x3c] sm:$0xff]  ;;  %v487_v11 = vld [vmem:[%s5056_s2 + $0x8] sm:$0xff]  ;;  %v492_v25 = vld [vmem:[%s5056_s2 + $0x30] sm:$0xff] }
  0xa1   : > { %3554 = vmatmul.mubr.msk.bf16.gmra.mxu1 %vm456_vm0, %v595_v3  ;;  %3535 = vmatprep.mubr.msk.bf16.mxu0 %vm3992_vm2, %v3991_v0  ;;  %v4274_v3 = vld [vmem:[#allocation2 + $0x44] sm:$0xff]  ;;  %v1161_v12 = vld [vmem:[#allocation2 + $0x4c] sm:$0xff]  ;;  %v1280_v41 = vld [vmem:[#allocation2 + $0x5c] sm:$0xff] }
  0xa2   : > { %3557 = vmatprep.mubr.msk.bf16.mxu1 %vm3992_vm2, %v3991_v0  ;;  %v1166_v5 = vpack.c.bf16 %v4274_v3, %v4272_v2  ;;  %1649 = vperm.xlu1 %3978, %v487_v11   ;;  %v1391_v26 = vld [vmem:[#allocation2 + $0x25] sm:$0xff]  ;;  %v1394_v34 = vld [vmem:[#allocation2 + $0x3d] sm:$0xff]  ;;  %v1396_v38 = vld [vmem:[#allocation2 + $0x4d] sm:$0xff] }
  0xa3   : > { %1659 = vperm.xlu0 %3977, %v489_v19   ;;  %v1395_v37 = vld [vmem:[#allocation2 + $0x45] sm:$0xff]  ;;  %v1398_v43 = vld [vmem:[#allocation2 + $0x5d] sm:$0xff] }
  0xa4   : > { %v1507_v46 = vld [vmem:[#allocation2 + $0x16] sm:$0xff] }
  0xa5   : > { %v1511_v52 = vld [vmem:[#allocation2 + $0x36] sm:$0xff] }
  0xa6   : > { %v1515_v58 = vld [vmem:[#allocation2 + $0x56] sm:$0xff] }
  0xa8   : > { %3536 = vmatmul.mubr.msk.bf16.gmra.mxu0 %vm456_vm0, %v612_v8  ;;  %v1044_v8 = vld [vmem:[#allocation2 + $0x53] sm:$0xff] }
  0xa9   : > { %3558 = vmatmul.mubr.msk.bf16.gmra.mxu1 %vm456_vm0, %v596_v9  ;;  %3539 = vmatprep.mubr.msk.bf16.mxu0 %vm3992_vm2, %v3991_v0  ;;  %v4284_v9 = vld [vmem:[#allocation2 + $0x54] sm:$0xff]  ;;  %v1049_v13 = vpack.c.bf16 %v1044_v8, %v1043_v7 }
  0xaa   : > { %3561 = vmatprep.mubr.msk.bf16.mxu1 %vm3992_vm2, %v3991_v0  ;;  %v1285_v44 = vpack.c.bf16 %v1280_v41, %v4284_v9 }
  0xb0   : > { %3540 = vmatmul.mubr.msk.bf16.gmra.mxu0 %vm456_vm0, %v613_v14  ;;  %v1167_v14 = vpack.c.bf16 %v4284_v9, %v1161_v12 }
  0xb1   : > { %3562 = vmatmul.mubr.msk.bf16.gmra.mxu1 %vm456_vm0, %v597_v15  ;;  %3567 = vmatprep.mubr.msk.bf16.mxu0 %vm3992_vm2, %v3991_v0  ;;  %v488_v15 = vld [vmem:[%s5056_s2 + $0x10] sm:$0xff] }
  0xb2   : > { %3589 = vmatprep.mubr.msk.bf16.mxu1 %vm3992_vm2, %v3991_v0  ;;  %1654 = vperm.xlu1 %3978, %v488_v15  }
  0xb6   : > { %1664 = vperm.xlu1 %3978, %v490_v20  }
  0xb8   : > { %3568 = vmatmul.mubr.msk.bf16.vlgmr.msra.gmra.mxu0 %vm456_vm0, %v809_v21  ;;  %v1281_v21 = vpack.c.bf16 %v1155_v53, %v4232_v42  ;;  %v1397_v42 = vld [vmem:[#allocation2 + $0x55] sm:$0xff]  ;;  %v1512_v53 = vld [vmem:[#allocation2 + $0x3e] sm:$0xff] }
  0xb9   : > { %3590 = vmatmul.mubr.msk.bf16.vlgmr.msra.gmra.mxu1 %vm456_vm0, %v927_v22  ;;  %3610 = vmatpush3.bf16.msra.mxu0 %v1068_v23  ;;  %v1399_v22 = vpack.c.bf16 %v1390_v16, %v1389_v18  ;;  %v1540_v23 = vsel %vm631_vm1, %v3328_v17, 0  ;;  %v1403_v45 = vpack.c.bf16 %v1398_v43, %v1397_v42  ;;  %v1519_v54 = vpack.c.bf16 %v1512_v53, %v1511_v52 }
  0xba   : > { %3571 = vmatprep.mubr.msk.bf16.mxu0 %vm3992_vm2, %v3991_v0  ;;  %3593 = vmatprep.mubr.msk.bf16.mxu1 %vm3992_vm2, %v3991_v0 }
  0xbb   : > { %3632 = vmatpush3.bf16.msra.mxu1 %v1186_v24  ;;  %3653 = vmatprep.subr.bf16.mxu0 %v3991_v0  ;;  %v491_v24 = vld [vmem:[%s5056_s2 + $0x28] sm:$0xff] }
  0xbc   : > { %3675 = vmatprep.subr.bf16.mxu1 %v3991_v0  ;;  %1669 = vperm.xlu0 %3977, %v491_v24  }
  0xbd   : > { %1674 = vperm.xlu1 %3978, %v492_v25  }
  0xc0   : > { %3572 = vmatmul.mubr.msk.bf16.gmra.mxu0 %vm456_vm0, %v810_v27  ;;  %v1392_v27 = vld [vmem:[#allocation2 + $0x2d] sm:$0xff] }
  0xc1   : > { %3594 = vmatmul.mubr.msk.bf16.gmra.mxu1 %vm456_vm0, %v928_v28  ;;  %3575 = vmatprep.mubr.msk.bf16.mxu0 %vm3992_vm2, %v3991_v0  ;;  %v493_v28 = vld [vmem:[%s5056_s2 + $0x38] sm:$0xff] }
  0xc2   : > { %3597 = vmatprep.mubr.msk.bf16.mxu1 %vm3992_vm2, %v3991_v0  ;;  %1679 = vperm.xlu0 %3977, %v493_v28  }
  0xc3   : > { %1684 = vperm.xlu1 %3978, %v494_v29  }
  0xc8   : > { %3576 = vmatmul.mubr.msk.bf16.gmra.mxu0 %vm456_vm0, %v811_v31  ;;  %v1400_v31 = vpack.c.bf16 %v1392_v27, %v1391_v26 }
  0xc9   : > { %3598 = vmatmul.mubr.msk.bf16.gmra.mxu1 %vm456_vm0, %v929_v32  ;;  %3579 = vmatprep.mubr.msk.bf16.mxu0 %vm3992_vm2, %v3991_v0  ;;  %v495_v32 = vld [vmem:[%s5056_s2 + $0x48] sm:$0xff] }
  0xca   : > { %3601 = vmatprep.mubr.msk.bf16.mxu1 %vm3992_vm2, %v3991_v0  ;;  %1689 = vperm.xlu0 %3977, %v495_v32  }
  0xd0   : > { %3580 = vmatmul.mubr.msk.bf16.gmra.mxu0 %vm456_vm0, %v812_v35  ;;  %v1283_v35 = vpack.c.bf16 %v4272_v2, %v4260_v59  ;;  %v1516_v59 = vld [vmem:[#allocation2 + $0x5e] sm:$0xff] }
  0xd1   : > { %3602 = vmatmul.mubr.msk.bf16.gmra.mxu1 %vm456_vm0, %v930_v36  ;;  %3583 = vmatprep.mubr.msk.bf16.mxu0 %vm3992_vm2, %v3991_v0  ;;  %v1401_v36 = vpack.c.bf16 %v1394_v34, %v1393_v33  ;;  %v1521_v60 = vpack.c.bf16 %v1516_v59, %v1515_v58 }
  0xd2   : > { %3605 = vmatprep.mubr.msk.bf16.mxu1 %vm3992_vm2, %v3991_v0 }
  0xd8   : > { %3584 = vmatmul.mubr.msk.bf16.gmra.mxu0 %vm456_vm0, %v813_v39  ;;  %v1284_v39 = vpack.c.bf16 %v1161_v12, %v4274_v3 }
  0xd9   : > { %3606 = vmatmul.mubr.msk.bf16.gmra.mxu1 %vm456_vm0, %v931_v40  ;;  %3611 = vmatprep.mubr.msk.bf16.mxu0 %vm3992_vm2, %v3991_v0  ;;  %v1402_v40 = vpack.c.bf16 %v1396_v38, %v1395_v37 }
  0xda   : > { %3633 = vmatprep.mubr.msk.bf16.mxu1 %vm3992_vm2, %v3991_v0 }
  0xe0   : > { %3612 = vmatmul.mubr.msk.bf16.vlgmr.msra.gmra.mxu0 %vm456_vm0, %v1045_v47  ;;  %v1508_v47 = vld [vmem:[#allocation2 + $0x1e] sm:$0xff] }
  0xe1   : > { %3634 = vmatmul.mubr.msk.bf16.vlgmr.msra.gmra.mxu1 %vm456_vm0, %v1163_v48  ;;  %3654 = vmatpush3.bf16.msra.mxu0 %v1304_v49  ;;  %v1517_v48 = vpack.c.bf16 %v1508_v47, %v1507_v46  ;;  %v1509_v49 = vld [vmem:[#allocation2 + $0x26] sm:$0xff] }
  0xe2   : > { %3615 = vmatprep.mubr.msk.bf16.mxu0 %vm3992_vm2, %v3991_v0  ;;  %3637 = vmatprep.mubr.msk.bf16.mxu1 %vm3992_vm2, %v3991_v0 }
  0xe3   : > { %3676 = vmatpush3.bf16.msra.mxu1 %v1422_v50  ;;  %3697 = vmatprep.subr.bf16.mxu0 %v3991_v0  ;;  %v1510_v50 = vld [vmem:[#allocation2 + $0x2e] sm:$0xff] }
  0xe4   : > { %3719 = vmatprep.subr.bf16.mxu1 %v3991_v0  ;;  %v1518_v51 = vpack.c.bf16 %v1510_v50, %v1509_v49 }
  0xe8   : > { %3616 = vmatmul.mubr.msk.bf16.gmra.mxu0 %vm456_vm0, %v1046_v55  ;;  %v1513_v55 = vld [vmem:[#allocation2 + $0x46] sm:$0xff] }
  0xe9   : > { %3638 = vmatmul.mubr.msk.bf16.gmra.mxu1 %vm456_vm0, %v1164_v56  ;;  %3619 = vmatprep.mubr.msk.bf16.mxu0 %vm3992_vm2, %v3991_v0  ;;  %v1514_v56 = vld [vmem:[#allocation2 + $0x4e] sm:$0xff] }
  0xea   : > { %3641 = vmatprep.mubr.msk.bf16.mxu1 %vm3992_vm2, %v3991_v0  ;;  %v1520_v57 = vpack.c.bf16 %v1514_v56, %v1513_v55 }
  0xf0   : > { %3620 = vmatmul.mubr.msk.bf16.gmra.mxu0 %vm456_vm0, %v1047_v61 }
  0xf1   : > { %3642 = vmatmul.mubr.msk.bf16.gmra.mxu1 %vm456_vm0, %v1165_v62  ;;  %3623 = vmatprep.mubr.msk.bf16.mxu0 %vm3992_vm2, %v3991_v0 }
  0xf2   : > { %3645 = vmatprep.mubr.msk.bf16.mxu1 %vm3992_vm2, %v3991_v0 }
  0xf8   : > { %3624 = vmatmul.mubr.msk.bf16.gmra.mxu0 %vm456_vm0, %v1048_v4 }
  0xf9   : > { %3646 = vmatmul.mubr.msk.bf16.gmra.mxu1 %vm456_vm0, %v1166_v5  ;;  %3627 = vmatprep.mubr.msk.bf16.mxu0 %vm3992_vm2, %v3991_v0 }
  0xfa   : > { %3649 = vmatprep.mubr.msk.bf16.mxu1 %vm3992_vm2, %v3991_v0 }
 0x100   : > { %3628 = vmatmul.mubr.msk.bf16.gmra.mxu0 %vm456_vm0, %v1049_v13 }
 0x101   : > { %3650 = vmatmul.mubr.msk.bf16.gmra.mxu1 %vm456_vm0, %v1167_v14  ;;  %3655 = vmatprep.mubr.msk.bf16.mxu0 %vm3992_vm2, %v3991_v0 }
 0x102   : > { %3677 = vmatprep.mubr.msk.bf16.mxu1 %vm3992_vm2, %v3991_v0 }
 0x108   : > { %3656 = vmatmul.mubr.msk.bf16.vlgmr.msra.gmra.mxu0 %vm456_vm0, %v1281_v21 }
 0x109   : > { %3678 = vmatmul.mubr.msk.bf16.vlgmr.msra.gmra.mxu1 %vm456_vm0, %v1399_v22  ;;  %3698 = vmatpush3.bf16.msra.mxu0 %v1540_v23 }
 0x10a   : > { %3659 = vmatprep.mubr.msk.bf16.mxu0 %vm3992_vm2, %v3991_v0  ;;  %3681 = vmatprep.mubr.msk.bf16.mxu1 %vm3992_vm2, %v3991_v0 }
 0x10b   : > { %3741 = vmatprep.subr.bf16.mxu0 %v3991_v0 }
 0x110   : > { %3660 = vmatmul.mubr.msk.bf16.gmra.mxu0 %vm456_vm0, %v1282_v30 }
 0x111   : > { %3682 = vmatmul.mubr.msk.bf16.gmra.mxu1 %vm456_vm0, %v1400_v31  ;;  %3663 = vmatprep.mubr.msk.bf16.mxu0 %vm3992_vm2, %v3991_v0 }
 0x112   : > { %3685 = vmatprep.mubr.msk.bf16.mxu1 %vm3992_vm2, %v3991_v0 }
 0x118   : > { %3664 = vmatmul.mubr.msk.bf16.gmra.mxu0 %vm456_vm0, %v1283_v35 }
 0x119   : > { %3686 = vmatmul.mubr.msk.bf16.gmra.mxu1 %vm456_vm0, %v1401_v36  ;;  %3667 = vmatprep.mubr.msk.bf16.mxu0 %vm3992_vm2, %v3991_v0 }
 0x11a   : > { %3689 = vmatprep.mubr.msk.bf16.mxu1 %vm3992_vm2, %v3991_v0 }
 0x120   : > { %3668 = vmatmul.mubr.msk.bf16.gmra.mxu0 %vm456_vm0, %v1284_v39 }
 0x121   : > { %3690 = vmatmul.mubr.msk.bf16.gmra.mxu1 %vm456_vm0, %v1402_v40  ;;  %3671 = vmatprep.mubr.msk.bf16.mxu0 %vm3992_vm2, %v3991_v0 }
 0x122   : > { %3693 = vmatprep.mubr.msk.bf16.mxu1 %vm3992_vm2, %v3991_v0 }
 0x128   : > { %3672 = vmatmul.mubr.msk.bf16.gmra.mxu0 %vm456_vm0, %v1285_v44 }
 0x129   : > { %3694 = vmatmul.mubr.msk.bf16.gmra.mxu1 %vm456_vm0, %v1403_v45  ;;  %3699 = vmatprep.mubr.msk.bf16.mxu0 %vm3992_vm2, %v3991_v0 }
 0x12a   : > { %3721 = vmatprep.mubr.msk.bf16.mxu1 %vm3992_vm2, %v3991_v0 }
 0x130   : > { %3700 = vmatmul.mubr.msk.bf16.vlgmr.msra.gmra.mxu0 %vm456_vm0, %v1517_v48 }
 0x131   : > { %3703 = vmatprep.mubr.msk.bf16.mxu0 %vm3992_vm2, %v3991_v0 }
 0x138   : > { %3704 = vmatmul.mubr.msk.bf16.gmra.mxu0 %vm456_vm0, %v1518_v51 }
 0x139   : > { %3707 = vmatprep.mubr.msk.bf16.mxu0 %vm3992_vm2, %v3991_v0 }
 0x140   : > { %3708 = vmatmul.mubr.msk.bf16.gmra.mxu0 %vm456_vm0, %v1519_v54 }
 0x141   : > { %3711 = vmatprep.mubr.msk.bf16.mxu0 %vm3992_vm2, %v3991_v0 }
 0x148   : > { %3712 = vmatmul.mubr.msk.bf16.gmra.mxu0 %vm456_vm0, %v1520_v57 }
 0x149   : > { %3715 = vmatprep.mubr.msk.bf16.mxu0 %vm3992_vm2, %v3991_v0 }
 0x150   : > { %v669_v61 = vpop.f32.mrf.mxu0  ;;  %3716 = vmatmul.mubr.msk.bf16.gmra.mxu0 %vm456_vm0, %v1521_v60 }
 0x151   : > { %v760_v62 = vpop.f32.mrf.mxu1  ;;  %3743 = vmatprep.mubr.msk.bf16.mxu0 %vm3992_vm2, %v3991_v0 }
 0x152   : > { %v4378_v63 = vadd.f32 %v760_v62, %v669_v61  ;;  %v3525_v1 = vpop.f32.mrf.mxu0 }
 0x153   : > { %v3547_v2 = vpop.f32.mrf.mxu1 }
 0x154   : > { %v672_v3 = vpop.f32.mrf.mxu0 }
 0x155   : > { %v763_v4 = vpop.f32.mrf.mxu1 }
 0x156   : > { %v4382_v5 = vadd.f32 %v763_v4, %v672_v3  ;;  %v3526_v6 = vpop.f32.mrf.mxu0 }
 0x157   : > { %v3548_v7 = vpop.f32.mrf.mxu1 }
 0x158   : > { %v677_v8 = vpop.f32.mrf.mxu0 }
 0x159   : > { %v768_v9 = vpop.f32.mrf.mxu1 }
 0x15a   : > { %v4384_v10 = vadd.f32 %v768_v9, %v677_v8  ;;  %v3529_v11 = vpop.f32.mrf.mxu0 }
 0x15b   : > { %v3551_v12 = vpop.f32.mrf.mxu1 }
 0x15c   : > { %v680_v13 = vpop.f32.mrf.mxu0 }
 0x15d   : > { %v771_v14 = vpop.f32.mrf.mxu1 }
 0x15e   : > { %v4386_v15 = vadd.f32 %v771_v14, %v680_v13  ;;  %v3530_v16 = vpop.f32.mrf.mxu0 }
 0x15f   : > { %v3552_v17 = vpop.f32.mrf.mxu1 }
 0x160   : > { %v685_v18 = vpop.f32.mrf.mxu0 }
 0x161   : > { %v776_v19 = vpop.f32.mrf.mxu1 }
 0x162   : > { %v4388_v20 = vadd.f32 %v776_v19, %v685_v18  ;;  %v3533_v21 = vpop.f32.mrf.mxu0 }
 0x163   : > { %v3555_v22 = vpop.f32.mrf.mxu1 }
 0x164   : > { %v688_v23 = vpop.f32.mrf.mxu0 }
 0x165   : > { %v779_v24 = vpop.f32.mrf.mxu1 }
 0x166   : > { %v4390_v25 = vadd.f32 %v779_v24, %v688_v23  ;;  %v3534_v26 = vpop.f32.mrf.mxu0 }
 0x167   : > { %v3556_v27 = vpop.f32.mrf.mxu1 }
 0x168   : > { %v693_v28 = vpop.f32.mrf.mxu0 }
 0x169   : > { %v784_v29 = vpop.f32.mrf.mxu1 }
 0x16a   : > { %v4392_v30 = vadd.f32 %v784_v29, %v693_v28  ;;  %v3537_v31 = vpop.f32.mrf.mxu0 }
 0x16b   : > { %v3559_v32 = vpop.f32.mrf.mxu1 }
 0x16c   : > { %v696_v33 = vpop.f32.mrf.mxu0 }
 0x16d   : > { %v787_v34 = vpop.f32.mrf.mxu1 }
 0x16e   : > { %v4394_v35 = vadd.f32 %v787_v34, %v696_v33  ;;  %v3538_v36 = vpop.f32.mrf.mxu0 }
 0x16f   : > { %v3560_v37 = vpop.f32.mrf.mxu1 }
 0x170   : > { %v701_v38 = vpop.f32.mrf.mxu0 }
 0x171   : > { %v792_v39 = vpop.f32.mrf.mxu1 }
 0x172   : > { %v4396_v40 = vadd.f32 %v792_v39, %v701_v38  ;;  %v3541_v41 = vpop.f32.mrf.mxu0 }
 0x173   : > { %v3563_v42 = vpop.f32.mrf.mxu1 }
 0x174   : > { %v704_v43 = vpop.f32.mrf.mxu0 }
 0x175   : > { %v795_v44 = vpop.f32.mrf.mxu1 }
 0x176   : > { %v4398_v45 = vadd.f32 %v795_v44, %v704_v43  ;;  %v3542_v46 = vpop.f32.mrf.mxu0 }
 0x177   : > { %v3564_v47 = vpop.f32.mrf.mxu1 }
 0x178   : > { %v868_v48 = vpop.f32.mrf.mxu0 }
 0x179   : > { %v986_v49 = vpop.f32.mrf.mxu1  ;;  %v907_v50 = vadd.f32 %v868_v48, %v4378_v63 }
 0x17a   : > { %v3569_v51 = vpop.f32.mrf.mxu0 }
 0x17b   : > { %v3591_v52 = vpop.f32.mrf.mxu1  ;;  %v1025_v53 = vadd.f32 %v986_v49, %v907_v50 }
 0x17c   : > { %v871_v54 = vpop.f32.mrf.mxu0 }
 0x17d   : > { %v989_v55 = vpop.f32.mrf.mxu1  ;;  %v908_v56 = vadd.f32 %v871_v54, %v4382_v5 }
 0x17e   : > { %v3570_v57 = vpop.f32.mrf.mxu0 }
 0x17f   : > { %v3592_v58 = vpop.f32.mrf.mxu1  ;;  %v1026_v59 = vadd.f32 %v989_v55, %v908_v56 }
 0x180   : > { %v876_v60 = vpop.f32.mrf.mxu0 }
 0x181   : > { %v994_v61 = vpop.f32.mrf.mxu1  ;;  %v909_v62 = vadd.f32 %v876_v60, %v4384_v10 }
 0x182   : > { %v3573_v1 = vpop.f32.mrf.mxu0 }
 0x183   : > { %v3595_v2 = vpop.f32.mrf.mxu1  ;;  %v1027_v3 = vadd.f32 %v994_v61, %v909_v62 }
 0x184   : > { %v879_v4 = vpop.f32.mrf.mxu0 }
 0x185   : > { %v997_v6 = vpop.f32.mrf.mxu1  ;;  %v910_v63 = vadd.f32 %v879_v4, %v4386_v15 }
 0x186   : > { %v3574_v7 = vpop.f32.mrf.mxu0 }
 0x187   : > { %v3596_v8 = vpop.f32.mrf.mxu1  ;;  %v1028_v9 = vadd.f32 %v997_v6, %v910_v63 }
 0x188   : > { %v884_v11 = vpop.f32.mrf.mxu0 }
 0x189   : > { %v1002_v12 = vpop.f32.mrf.mxu1  ;;  %v911_v5 = vadd.f32 %v884_v11, %v4388_v20 }
 0x18a   : > { %v3577_v13 = vpop.f32.mrf.mxu0 }
 0x18b   : > { %v3599_v14 = vpop.f32.mrf.mxu1  ;;  %v1029_v16 = vadd.f32 %v1002_v12, %v911_v5 }
 0x18c   : > { %v887_v17 = vpop.f32.mrf.mxu0 }
 0x18d   : > { %v1005_v18 = vpop.f32.mrf.mxu1  ;;  %v912_v10 = vadd.f32 %v887_v17, %v4390_v25 }
 0x18e   : > { %v3578_v19 = vpop.f32.mrf.mxu0 }
 0x18f   : > { %v3600_v21 = vpop.f32.mrf.mxu1  ;;  %v1030_v22 = vadd.f32 %v1005_v18, %v912_v10 }
 0x190   : > { %v892_v23 = vpop.f32.mrf.mxu0 }
 0x191   : > { %v1010_v24 = vpop.f32.mrf.mxu1  ;;  %v913_v15 = vadd.f32 %v892_v23, %v4392_v30 }
 0x192   : > { %v3581_v26 = vpop.f32.mrf.mxu0 }
 0x193   : > { %v3603_v27 = vpop.f32.mrf.mxu1  ;;  %v1031_v28 = vadd.f32 %v1010_v24, %v913_v15 }
 0x194   : > { %v895_v29 = vpop.f32.mrf.mxu0 }
 0x195   : > { %v1013_v31 = vpop.f32.mrf.mxu1  ;;  %v914_v20 = vadd.f32 %v895_v29, %v4394_v35 }
 0x196   : > { %v3582_v32 = vpop.f32.mrf.mxu0 }
 0x197   : > { %v3604_v33 = vpop.f32.mrf.mxu1  ;;  %v1032_v34 = vadd.f32 %v1013_v31, %v914_v20 }
 0x198   : > { %v900_v36 = vpop.f32.mrf.mxu0 }
 0x199   : > { %v1018_v37 = vpop.f32.mrf.mxu1  ;;  %v915_v25 = vadd.f32 %v900_v36, %v4396_v40 }
 0x19a   : > { %v3585_v38 = vpop.f32.mrf.mxu0 }
 0x19b   : > { %v3607_v39 = vpop.f32.mrf.mxu1  ;;  %v1033_v41 = vadd.f32 %v1018_v37, %v915_v25 }
 0x19c   : > { %v903_v42 = vpop.f32.mrf.mxu0 }
 0x19d   : > { %v1021_v43 = vpop.f32.mrf.mxu1  ;;  %v916_v30 = vadd.f32 %v903_v42, %v4398_v45 }
 0x19e   : > { %v3586_v44 = vpop.f32.mrf.mxu0 }
 0x19f   : > { %v3608_v46 = vpop.f32.mrf.mxu1  ;;  %v1034_v47 = vadd.f32 %v1021_v43, %v916_v30 }
 0x1a0   : > { %v1104_v48 = vpop.f32.mrf.mxu0 }
 0x1a1   : > { %v1222_v49 = vpop.f32.mrf.mxu1  ;;  %v1143_v35 = vadd.f32 %v1104_v48, %v1025_v53 }
 0x1a2   : > { %v3613_v50 = vpop.f32.mrf.mxu0 }
 0x1a3   : > { %v3635_v51 = vpop.f32.mrf.mxu1  ;;  %v4434_v52 = vadd.f32 %v1222_v49, %v1143_v35 }
 0x1a4   : > { %v1107_v54 = vpop.f32.mrf.mxu0 }
 0x1a5   : > { %v1225_v55 = vpop.f32.mrf.mxu1  ;;  %v1144_v40 = vadd.f32 %v1107_v54, %v1026_v59 }
 0x1a6   : > { %v3614_v56 = vpop.f32.mrf.mxu0 }
 0x1a7   : > { %v3636_v57 = vpop.f32.mrf.mxu1  ;;  %v4436_v58 = vadd.f32 %v1225_v55, %v1144_v40 }
 0x1a8   : > { %v1112_v60 = vpop.f32.mrf.mxu0 }
 0x1a9   : > { %v1230_v61 = vpop.f32.mrf.mxu1  ;;  %v1145_v45 = vadd.f32 %v1112_v60, %v1027_v3 }
 0x1aa   : > { %v3617_v62 = vpop.f32.mrf.mxu0 }
 0x1ab   : > { %v3639_v1 = vpop.f32.mrf.mxu1  ;;  %v4438_v2 = vadd.f32 %v1230_v61, %v1145_v45 }
 0x1ac   : > { %v1115_v4 = vpop.f32.mrf.mxu0 }
 0x1ad   : > { %v1233_v53 = vpop.f32.mrf.mxu1  ;;  %v1146_v6 = vadd.f32 %v1115_v4, %v1028_v9 }
 0x1ae   : > { %v3618_v63 = vpop.f32.mrf.mxu0 }
 0x1af   : > { %v3640_v7 = vpop.f32.mrf.mxu1  ;;  %v4440_v8 = vadd.f32 %v1233_v53, %v1146_v6 }
 0x1b0   : > { %v1120_v11 = vpop.f32.mrf.mxu0 }
 0x1b1   : > { %v1238_v59 = vpop.f32.mrf.mxu1  ;;  %v1147_v12 = vadd.f32 %v1120_v11, %v1029_v16 }
 0x1b2   : > { %v3621_v5 = vpop.f32.mrf.mxu0 }
 0x1b3   : > { %v3643_v13 = vpop.f32.mrf.mxu1  ;;  %v4442_v14 = vadd.f32 %v1238_v59, %v1147_v12 }
 0x1b4   : > { %v1123_v17 = vpop.f32.mrf.mxu0 }
 0x1b5   : > { %v1241_v3 = vpop.f32.mrf.mxu1  ;;  %v1148_v18 = vadd.f32 %v1123_v17, %v1030_v22 }
 0x1b6   : > { %v3622_v10 = vpop.f32.mrf.mxu0 }
 0x1b7   : > { %v3644_v19 = vpop.f32.mrf.mxu1  ;;  %v4444_v21 = vadd.f32 %v1241_v3, %v1148_v18 }
 0x1b8   : > { %v1128_v23 = vpop.f32.mrf.mxu0 }
 0x1b9   : > { %v1246_v9 = vpop.f32.mrf.mxu1  ;;  %v1149_v24 = vadd.f32 %v1128_v23, %v1031_v28 }
 0x1ba   : > { %v3625_v15 = vpop.f32.mrf.mxu0 }
 0x1bb   : > { %v3647_v26 = vpop.f32.mrf.mxu1  ;;  %v4446_v27 = vadd.f32 %v1246_v9, %v1149_v24 }
 0x1bc   : > { %v1131_v29 = vpop.f32.mrf.mxu0 }
 0x1bd   : > { %v1249_v16 = vpop.f32.mrf.mxu1  ;;  %v1150_v31 = vadd.f32 %v1131_v29, %v1032_v34 }
 0x1be   : > { %v3626_v20 = vpop.f32.mrf.mxu0 }
 0x1bf   : > { %v3648_v32 = vpop.f32.mrf.mxu1  ;;  %v4448_v33 = vadd.f32 %v1249_v16, %v1150_v31 }
 0x1c0   : > { %v1136_v36 = vpop.f32.mrf.mxu0 }
 0x1c1   : > { %v1254_v22 = vpop.f32.mrf.mxu1  ;;  %v1151_v37 = vadd.f32 %v1136_v36, %v1033_v41 }
 0x1c2   : > { %v3629_v25 = vpop.f32.mrf.mxu0 }
 0x1c3   : > { %v3651_v38 = vpop.f32.mrf.mxu1  ;;  %v4450_v39 = vadd.f32 %v1254_v22, %v1151_v37 }
 0x1c4   : > { %v1139_v42 = vpop.f32.mrf.mxu0 }
 0x1c5   : > { %v1257_v28 = vpop.f32.mrf.mxu1  ;;  %v1152_v43 = vadd.f32 %v1139_v42, %v1034_v47 }
 0x1c6   : > { %v3630_v30 = vpop.f32.mrf.mxu0 }
 0x1c7   : > { %v3652_v44 = vpop.f32.mrf.mxu1  ;;  %v4452_v46 = vadd.f32 %v1257_v28, %v1152_v43 }
 0x1c8   : > { %v1340_v48 = vpop.f32.mrf.mxu0  ;;  %v4468_v44 = vpop.permute.xlu1 %1649 }
 0x1c9   : > { %v1458_v34 = vpop.f32.mrf.mxu1  ;;  %v1379_v22 = vadd.f32 %v1340_v48, %v4434_v52  ;;  %v4474_v52 = vld [vmem:[%s5058_s4] ss:$0 sm:$0xff] }
 0x1ca   : > { %v3657_v49 = vpop.f32.mrf.mxu0 }
 0x1cb   : > { %v3679_v35 = vpop.f32.mrf.mxu1  ;;  %v1497_v43 = vadd.f32 %v1458_v34, %v1379_v22 }
 0x1cc   : > { %v1343_v50 = vpop.f32.mrf.mxu0 }
 0x1cd   : > { %v1461_v51 = vpop.f32.mrf.mxu1  ;;  %v1380_v32 = vadd.f32 %v1343_v50, %v4436_v58 }
 0x1ce   : > { %v3658_v54 = vpop.f32.mrf.mxu0 }
 0x1cf   : > { %v3680_v55 = vpop.f32.mrf.mxu1  ;;  %v1498_v38 = vadd.f32 %v1461_v51, %v1380_v32 }
 0x1d0   : > { %v1348_v41 = vpop.f32.mrf.mxu0 }
 0x1d1   : > { %v1466_v40 = vpop.f32.mrf.mxu1  ;;  %v1381_v25 = vadd.f32 %v1348_v41, %v4438_v2  ;;  %v4480_v41 = vpop.permute.xlu0 %1644 }
 0x1d2   : > { %v3661_v56 = vpop.f32.mrf.mxu0 }
 0x1d3   : > { %v3683_v57 = vpop.f32.mrf.mxu1  ;;  %v1499_v35 = vadd.f32 %v1466_v40, %v1381_v25  ;;  %v4485_v56 = vpop.permute.xlu1 %1654 }
 0x1d4   : > { %v1351_v60 = vpop.f32.mrf.mxu0 }
 0x1d5   : > { %v1469_v61 = vpop.f32.mrf.mxu1  ;;  %v1382_v28 = vadd.f32 %v1351_v60, %v4440_v8 }
 0x1d6   : > { %v3662_v45 = vpop.f32.mrf.mxu0 }
 0x1d7   : > { %v3684_v47 = vpop.f32.mrf.mxu1  ;;  %v1500_v50 = vadd.f32 %v1469_v61, %v1382_v28 }
 0x1d8   : > { %v1356_v62 = vpop.f32.mrf.mxu0 }
 0x1d9   : > { %v1474_v1 = vpop.f32.mrf.mxu1  ;;  %v1383_v54 = vadd.f32 %v1356_v62, %v4442_v14 }
 0x1da   : > { %v3665_v4 = vpop.f32.mrf.mxu0 }
 0x1db   : > { %v3687_v53 = vpop.f32.mrf.mxu1  ;;  %v1501_v34 = vadd.f32 %v1474_v1, %v1383_v54 }
 0x1dc   : > { %v1359_v6 = vpop.f32.mrf.mxu0  ;;  %v4498_v53 = vpop.permute.xlu0 %1659 }
 0x1dd   : > { %v1477_v63 = vpop.f32.mrf.mxu1  ;;  %v1384_v51 = vadd.f32 %v1359_v6, %v4444_v21 }
 0x1de   : > { %v3666_v7 = vpop.f32.mrf.mxu0 }
 0x1df   : > { %v3688_v11 = vpop.f32.mrf.mxu1  ;;  %v1502_v62 = vadd.f32 %v1477_v63, %v1384_v51 }
 0x1e0   : > { %v1364_v59 = vpop.f32.mrf.mxu0  ;;  %v4521_v22 = vpop.permute.xlu0 %1669 }
 0x1e1   : > { %v1482_v12 = vpop.f32.mrf.mxu1  ;;  %v1385_v21 = vadd.f32 %v1364_v59, %v4446_v27  ;;  %v4506_v27 = vpop.permute.xlu1 %1664 }
 0x1e2   : > { %v3669_v5 = vpop.f32.mrf.mxu0 }
 0x1e3   : > { %v3691_v13 = vpop.f32.mrf.mxu1 }
 0x1e4   : > { %v1367_v17 = vpop.f32.mrf.mxu0 }
 0x1e5   : > { %v4454_v3 = vpop.f32.mrf.mxu1  ;;  %v1386_v63 = vadd.f32 %v1367_v17, %v4448_v33 }
 0x1e6   : > { %v3670_v18 = vpop.f32.mrf.mxu0 }
 0x1e7   : > { %v3692_v10 = vpop.f32.mrf.mxu1  ;;  %v1503_v18 = vadd.f32 %v1482_v12, %v1385_v21  ;;  %v1504_v17 = vadd.f32 %v4454_v3, %v1386_v63  ;;  %v4545_v21 = vpop.permute.xlu0 %1679 }
 0x1e8   : > { %v4456_v19 = vpop.f32.mrf.mxu0 }
 0x1e9   : > { %v4458_v23 = vpop.f32.mrf.mxu1  ;;  %v1387_v12 = vadd.f32 %v4456_v19, %v4450_v39  ;;  %v4530_v19 = vpop.permute.xlu1 %1674 }
 0x1ea   : > { %v3673_v9 = vpop.f32.mrf.mxu0 }
 0x1eb   : > { %v3695_v24 = vpop.f32.mrf.mxu1 }
 0x1ec   : > { %v4460_v15 = vpop.f32.mrf.mxu0 }
 0x1ed   : > { %v4462_v26 = vpop.f32.mrf.mxu1 }
 0x1ee   : > { %v3674_v29 = vpop.f32.mrf.mxu0 }
 0x1ef   : > { %v3696_v16 = vpop.f32.mrf.mxu1 }
 0x1f0   : > { %v1576_v31 = vpop.f32.mrf.mxu0 }
 0x1f1   : > { %v1615_v55 = vadd.f32 %v1576_v31, %v1497_v43 }
 0x1f2   : > { %v3701_v20 = vpop.f32.mrf.mxu0 }
 0x1f3   : > { %v4483_v14 = vadd.f32 %v4474_v52, %v1615_v55 }
 0x1f4   : > { %v1579_v36 = vpop.f32.mrf.mxu0 }
 0x1f5   : > { %v1616_v30 = vadd.f32 %v1579_v36, %v1498_v38  ;;  %v1692_v4 = vmul.f32 %v4480_v41, %v4483_v14 }
 0x1f6   : > { %v3702_v37 = vpop.f32.mrf.mxu0 }
 0x1f7   : > { %v4477_v48 = vadd.f32 %v4474_v52, %v1616_v30  ;;  %v1730_v24 = vmul.f32 %v1692_v4, %v1692_v4  ;;  %v1702_v32 = vsel %vm471_vm4, %v1692_v4, 0.0 }
 0x1f8   : > { %v1584_v42 = vpop.f32.mrf.mxu0 }
 0x1f9   : > { %v1617_v2 = vadd.f32 %v1584_v42, %v1499_v35  ;;  %v1693_v45 = vmul.f32 %v4468_v44, %v4477_v48  ;;  %v1740_v3 = vsel %vm471_vm4, %v1730_v24, 0.0 }
 0x1fa   : > { %v3705_v49 = vpop.f32.mrf.mxu0 }
 0x1fb   : > { %v4488_v60 = vadd.f32 %v4474_v52, %v1617_v2  ;;  %v1731_v13 = vmul.f32 %v1693_v45, %v1693_v45  ;;  %v1703_v31 = vsel %vm471_vm4, %v1693_v45, 0.0 }
 0x1fc   : > { %v1587_v58 = vpop.f32.mrf.mxu0  ;;  %v1704_v43 = vadd.f32 %v1703_v31, %v1702_v32  ;;  %v4556_v31 = vpop.permute.xlu1 %1684 }
 0x1fd   : > { %v1618_v40 = vadd.f32 %v1587_v58, %v1500_v50  ;;  %v1694_v11 = vmul.f32 %v4485_v56, %v4488_v60  ;;  %v1741_v36 = vsel %vm471_vm4, %v1731_v13, 0.0  ;;  %v1505_v58 = vadd.f32 %v4458_v23, %v1387_v12 }
 0x1fe   : > { %v3706_v8 = vpop.f32.mrf.mxu0  ;;  %v1388_v50 = vadd.f32 %v4460_v15, %v4452_v46  ;;  %v1742_v2 = vadd.f32 %v1741_v36, %v1740_v3 }
 0x1ff   : > { %v4494_v1 = vadd.f32 %v4474_v52, %v1618_v40  ;;  %v1732_v20 = vmul.f32 %v1694_v11, %v1694_v11  ;;  %v1705_v25 = vsel %vm471_vm4, %v1694_v11, 0.0 }
 0x200   : > { %v1592_v57 = vpop.f32.mrf.mxu0  ;;  %v1706_v8 = vadd.f32 %v1705_v25, %v1704_v43  ;;  %v1506_v11 = vadd.f32 %v4462_v26, %v1388_v50  ;;  %v4567_v43 = vpop.permute.xlu0 %1689 }
 0x201   : > { %v1619_v61 = vadd.f32 %v1592_v57, %v1501_v34  ;;  %v1695_v10 = vmul.f32 %v4498_v53, %v4494_v1  ;;  %v1743_v49 = vsel %vm471_vm4, %v1732_v20, 0.0 }
 0x202   : > { %v3709_v47 = vpop.f32.mrf.mxu0  ;;  %v1744_v45 = vadd.f32 %v1743_v49, %v1742_v2 }
 0x203   : > { %v4501_v6 = vadd.f32 %v4474_v52, %v1619_v61  ;;  %v1733_v38 = vmul.f32 %v1695_v10, %v1695_v10  ;;  %v1707_v35 = vsel %vm471_vm4, %v1695_v10, 0.0 }
 0x204   : > { %v1595_v7 = vpop.f32.mrf.mxu0  ;;  %v1708_v47 = vadd.f32 %v1707_v35, %v1706_v8 }
 0x205   : > { %v1620_v5 = vadd.f32 %v1595_v7, %v1502_v62  ;;  %v1696_v29 = vmul.f32 %v4506_v27, %v4501_v6  ;;  %v1745_v51 = vsel %vm471_vm4, %v1733_v38, 0.0 }
 0x206   : > { %v3710_v59 = vpop.f32.mrf.mxu0 }
 0x207   : > { %v4511_v9 = vadd.f32 %v4474_v52, %v1620_v5  ;;  %v1734_v39 = vmul.f32 %v1696_v29, %v1696_v29  ;;  %v1709_v40 = vsel %vm471_vm4, %v1696_v29, 0.0  ;;  %v1746_v5 = vadd.f32 %v1745_v51, %v1744_v45  ;;  %v3337_v51 = vld [vmem:[%s5061_s7 + $0x4] sm:$0xf] }
 0x208   : > { %v1600_v16 = vpop.f32.mrf.mxu0  ;;  %v1710_v63 = vadd.f32 %v1709_v40, %v1708_v47  ;;  %v1912_v40 = vsel %vm1910_vm5, %v3337_v51, 0 }
 0x209   : > { %v1621_v33 = vadd.f32 %v1600_v16, %v1503_v18  ;;  %v1697_v42 = vmul.f32 %v4521_v22, %v4511_v9  ;;  %v1747_v62 = vsel %vm471_vm4, %v1734_v39, 0.0  ;;  %3720 = vmatpush3.bf16.msra.mxu1 %v1912_v40 }
 0x20a   : > { %v3713_v37 = vpop.f32.mrf.mxu0  ;;  %v1748_v29 = vadd.f32 %v1747_v62, %v1746_v5  ;;  %3763 = vmatprep.subr.bf16.mxu1 %v3991_v0 }
 0x20b   : > { %v4527_v28 = vadd.f32 %v4474_v52, %v1621_v33  ;;  %v1735_v57 = vmul.f32 %v1697_v42, %v1697_v42  ;;  %v1711_v46 = vsel %vm471_vm4, %v1697_v42, 0.0 }
 0x20c   : > { %v1603_v30 = vpop.f32.mrf.mxu0  ;;  %v1712_v16 = vadd.f32 %v1711_v46, %v1710_v63 }
 0x20d   : > { %v1698_v54 = vmul.f32 %v4530_v19, %v4527_v28  ;;  %v1622_v55 = vadd.f32 %v1603_v30, %v1504_v17  ;;  %v1749_v59 = vsel %vm471_vm4, %v1735_v57, 0.0 }
 0x20e   : > { %v3714_v34 = vpop.f32.mrf.mxu0  ;;  %v1750_v37 = vadd.f32 %v1749_v59, %v1748_v29 }
 0x20f   : > { %v4542_v61 = vadd.f32 %v4474_v52, %v1622_v55  ;;  %v1736_v15 = vmul.f32 %v1698_v54, %v1698_v54  ;;  %v1713_v18 = vsel %vm471_vm4, %v1698_v54, 0.0 }
 0x210   : > { %v1608_v23 = vpop.f32.mrf.mxu0  ;;  %v1714_v36 = vadd.f32 %v1713_v18, %v1712_v16  ;;  %v1877_v18 = vld [vmem:[%s5061_s7] sm:$0xf] }
 0x211   : > { %v1699_v4 = vmul.f32 %v4545_v21, %v4542_v61  ;;  %v1623_v7 = vadd.f32 %v1608_v23, %v1505_v58  ;;  %v1751_v12 = vsel %vm471_vm4, %v1736_v15, 0.0 }
 0x212   : > { %v3717_v13 = vpop.f32.mrf.mxu0  ;;  %v1752_v30 = vadd.f32 %v1751_v12, %v1750_v37 }
 0x213   : > { %v1737_v10 = vmul.f32 %v1699_v4, %v1699_v4  ;;  %v4554_v24 = vadd.f32 %v4474_v52, %v1623_v7  ;;  %v1715_v17 = vsel %vm471_vm4, %v1699_v4, 0.0 }
 0x214   : > { %v1611_v20 = vpop.f32.mrf.mxu0  ;;  %v1716_v39 = vadd.f32 %v1715_v17, %v1714_v36 }
 0x215   : > { %v1700_v33 = vmul.f32 %v4556_v31, %v4554_v24  ;;  %v1624_v26 = vadd.f32 %v1611_v20, %v1506_v11  ;;  %v1753_v3 = vsel %vm471_vm4, %v1737_v10, 0.0  ;;  %v2003_v10 = vsel %vm1910_vm5, %v1877_v18, 0 }
 0x216   : > { %v3718_v32 = vpop.f32.mrf.mxu0  ;;  %v1754_v55 = vadd.f32 %v1753_v3, %v1752_v30  ;;  %3742 = vmatpush3.bf16.msra.mxu0 %v2003_v10 }
 0x217   : > { %v4563_v25 = vadd.f32 %v4474_v52, %v1624_v26  ;;  %v1717_v38 = vsel %vm471_vm4, %v1700_v33, 0.0  ;;  %v1738_v42 = vmul.f32 %v1700_v33, %v1700_v33  ;;  %3785 = vmatprep.subr.bf16.mxu0 %v3991_v0 }
 0x218   : > { %v1718_v54 = vadd.f32 %v1717_v38, %v1716_v39 }
 0x219   : > { %v1701_v49 = vmul.f32 %v4567_v43, %v4563_v25  ;;  %v1755_v35 = vsel %vm471_vm4, %v1738_v42, 0.0 }
 0x21a   : > { %v1756_v2 = vadd.f32 %v1755_v35, %v1754_v55 }
 0x21b   : > { %v1719_v58 = vsel %vm471_vm4, %v1701_v49, 0.0  ;;  %v1739_v52 = vmul.f32 %v1701_v49, %v1701_v49 }
 0x21c   : > { %v1720_v50 = vadd.f32 %v1719_v58, %v1718_v54 }
 0x21d   : > { %v1757_v8 = vsel %vm471_vm4, %v1739_v52, 0.0 }
 0x21e   : > { %1721 = vadd.xlane.f32.xlu1 %v1720_v50  ;;  %v1758_v34 = vadd.f32 %v1757_v8, %v1756_v2 }
 0x220   : > { %1759 = vadd.xlane.f32.xlu0 %v1758_v34 }
 0x2a7   : > { %v1722_v57 = vpop.xlane.xlu1 %1721 }
 0x2a8   : > { %v1723_v45 = vrot.slane %v1722_v57, 4 }
 0x2a9   : > { %v1760_v47 = vpop.xlane.xlu0 %1759 }
 0x2aa   : > { %v1724_v62 = vadd.f32 %v1723_v45, %v1722_v57  ;;  %v1761_v23 = vrot.slane %v1760_v47, 4 }
 0x2ac   : > { %v1725_v46 = vrot.slane %v1724_v62, 2  ;;  %v1762_v15 = vadd.f32 %v1761_v23, %v1760_v47 }
 0x2ae   : > { %v1763_v4 = vrot.slane %v1762_v15, 2  ;;  %v1726_v7 = vadd.f32 %v1725_v46, %v1724_v62 }
 0x2b0   : > { %v1727_v11 = vrot.slane %v1726_v7, 1  ;;  %v1764_v5 = vadd.f32 %v1763_v4, %v1762_v15 }
 0x2b2   : > { %v1728_v63 = vadd.f32 %v1727_v11, %v1726_v7  ;;  %v1765_v13 = vrot.slane %v1764_v5, 1 }
 0x2b4   : > { %3953 = vpush %v1728_v63  ;;  %v1766_v59 = vadd.f32 %v1765_v13, %v1764_v5 }
 0x2b6   : > { %3955 = vpush %v1766_v59 }
 0x2e5   : > { %s3954_s15 = spop %3953 }
 0x2e6   : > { %s1768_s16 = smul.f32 0.001953125, %s3954_s15 }
 0x2e7   : > { %s3956_s17 = spop %3955 }
 0x2e8   : > { %s1770_s18 = smul.f32 %s1768_s16, %s1768_s16  ;;  %v1772_v20 = vstv %s1768_s16 }
 0x2e9   : > { %s1769_s19 = smul.f32 0.001953125, %s3956_s17  ;;  %v1773_v33 = vsub.f32 %v4483_v14, %v1772_v20  ;;  %v1774_v26 = vsub.f32 %v4477_v48, %v1772_v20  ;;  %v1775_v17 = vsub.f32 %v4488_v60, %v1772_v20  ;;  %v1776_v12 = vsub.f32 %v4494_v1, %v1772_v20  ;;  %v3335_v48 = vld [vmem:[%s5059_s5] ss:$0 sm:$0xff] }
 0x2ea   : > { %v1777_v32 = vsub.f32 %v4501_v6, %v1772_v20  ;;  %v1778_v36 = vsub.f32 %v4511_v9, %v1772_v20  ;;  %v1779_v37 = vsub.f32 %v4527_v28, %v1772_v20  ;;  %v1780_v38 = vsub.f32 %v4542_v61, %v1772_v20  ;;  %s3952_s17 = smul.u32 80, %s5070_s26 }
 0x2eb   : > { %s1771_s20 = ssub.f32 %s1769_s19, %s1770_s18  ;;  %v1781_v42 = vsub.f32 %v4554_v24, %v1772_v20  ;;  %v1782_v3 = vsub.f32 %v4563_v25, %v1772_v20  ;;  %v3336_v24 = vld [vmem:[%s5060_s6] ss:$0 sm:$0xff] }
 0x2ed   : > { %s1783_s21 = sadd.f32 1e-05, %s1771_s20 }
 0x2ef   : > { %v1784_v29 = vstv %s1783_s21 }
 0x2f0   : > { %3979 = vrsqrt.f32 %v1784_v29 }
 0x2fd   : > { %v3980_v16 = vpop.eup %3979 }
 0x2fe   : > { %3957 = vpush %v3980_v16 }
 0x32f   : > { %s3958_s22 = spop %3957 }
 0x330   : > { %v1787_v14 = vstv %s3958_s22 }
 0x331   : > { %v1788_v60 = vmul.f32 %v1787_v14, %v1773_v33  ;;  %v1789_v1 = vmul.f32 %v1787_v14, %v1774_v26  ;;  %v1790_v39 = vmul.f32 %v1787_v14, %v1775_v17  ;;  %v1791_v6 = vmul.f32 %v1787_v14, %v1776_v12 }
 0x332   : > { %v1792_v30 = vmul.f32 %v1787_v14, %v1777_v32  ;;  %v1793_v9 = vmul.f32 %v1787_v14, %v1778_v36  ;;  %v1794_v49 = vmul.f32 %v1787_v14, %v1779_v37  ;;  %v1795_v28 = vmul.f32 %v1787_v14, %v1780_v38 }
 0x333   : > { %v1796_v35 = vmul.f32 %v1787_v14, %v1781_v42  ;;  %v1797_v54 = vmul.f32 %v1787_v14, %v1782_v3  ;;  %v1805_v61 = vmul.f32 %v3335_v48, %v1788_v60  ;;  %v1806_v55 = vmul.f32 %v3335_v48, %v1789_v1  ;;  %v1878_v14 = vld [vmem:[#allocation3 + $0x1] sm:$0xff] }
 0x334   : > { %v1807_v25 = vmul.f32 %v3335_v48, %v1790_v39  ;;  %v1808_v58 = vmul.f32 %v3335_v48, %v1791_v6  ;;  %v1809_v52 = vmul.f32 %v3335_v48, %v1792_v30  ;;  %v1810_v50 = vmul.f32 %v3335_v48, %v1793_v9  ;;  %v3348_v60 = vld [vmem:[%s5061_s7 + $0x8] sm:$0xf]  ;;  %v3354_v1 = vld [vmem:[%s5061_s7 + $0xc] sm:$0xf] }
 0x335   : > { %v1811_v2 = vmul.f32 %v3335_v48, %v1794_v49  ;;  %v1812_v8 = vmul.f32 %v3335_v48, %v1795_v28  ;;  %v1813_v34 = vmul.f32 %v3335_v48, %v1796_v35  ;;  %v1814_v51 = vmul.f32 %v3335_v48, %v1797_v54  ;;  %v1862_v48 = vld [vmem:[#allocation3] sm:$0xff] }
 0x336   : > { %v1822_v40 = vadd.f32 %v3336_v24, %v1805_v61  ;;  %v1823_v57 = vadd.f32 %v3336_v24, %v1806_v55  ;;  %v1824_v45 = vadd.f32 %v3336_v24, %v1807_v25  ;;  %v1825_v47 = vadd.f32 %v3336_v24, %v1808_v58 }
 0x337   : > { %v1826_v62 = vadd.f32 %v3336_v24, %v1809_v52  ;;  %v1827_v23 = vadd.f32 %v3336_v24, %v1810_v50  ;;  %v1828_v46 = vadd.f32 %v3336_v24, %v1811_v2  ;;  %v1829_v15 = vadd.f32 %v3336_v24, %v1812_v8 }
 0x338   : > { %v1830_v4 = vadd.f32 %v3336_v24, %v1813_v34  ;;  %v1831_v7 = vadd.f32 %v3336_v24, %v1814_v51  ;;  %v1832_v11 = vmax.f32 %v1822_v40, 0.0  ;;  %v1833_v5 = vmax.f32 %v1823_v57, 0.0 }
 0x339   : > { %v1834_v63 = vmax.f32 %v1824_v45, 0.0  ;;  %v1835_v13 = vmax.f32 %v1825_v47, 0.0  ;;  %v1836_v59 = vmax.f32 %v1826_v62, 0.0  ;;  %v1837_v18 = vmax.f32 %v1827_v23, 0.0 }
 0x33a   : > { %v1838_v10 = vmax.f32 %v1828_v46, 0.0  ;;  %v1839_v29 = vmax.f32 %v1829_v15, 0.0  ;;  %v1840_v16 = vmax.f32 %v1830_v4, 0.0  ;;  %v1841_v20 = vmax.f32 %v1831_v7, 0.0 }
 0x33b   : > { %v1842_v33 = vmul.f32 %v1832_v11, %v4480_v41  ;;  %v1843_v26 = vmul.f32 %v1833_v5, %v4468_v44  ;;  %v1844_v17 = vmul.f32 %v1834_v63, %v4485_v56  ;;  %v1845_v12 = vmul.f32 %v1835_v13, %v4498_v53  ;;  %v2078_v5 = vld [vmem:[#allocation3 + $0x2] sm:$0xff] }
 0x33c   : > { %v1846_v32 = vmul.f32 %v1836_v59, %v4506_v27  ;;  %v1847_v36 = vmul.f32 %v1837_v18, %v4521_v22  ;;  %v1848_v37 = vmul.f32 %v1838_v10, %v4530_v19  ;;  %v1849_v38 = vmul.f32 %v1839_v29, %v4545_v21  ;;  %v3360_v59 = vld [vmem:[%s5061_s7 + $0x10] sm:$0xf]  ;;  %v3366_v18 = vld [vmem:[%s5061_s7 + $0x14] sm:$0xf] }
 0x33d   : > { %v1850_v42 = vmul.f32 %v1840_v16, %v4556_v31  ;;  %v1851_v3 = vmul.f32 %v1841_v20, %v4567_v43  ;;  %1852 = vst.msk [vmem:[#allocation3 + $0xb] sm:$0xff] %vm471_vm4, %v1842_v33  ;;  %1853 = vst.msk [vmem:[#allocation3 + $0x13] sm:$0xff] %vm471_vm4, %v1843_v26  ;;  %v2111_v49 = vsel %vm1910_vm5, %v3348_v60, 0  ;;  %v2229_v28 = vsel %vm1910_vm5, %v3354_v1, 0 }
 0x33e   : > { %1854 = vst.msk [vmem:[#allocation3 + $0x1b] sm:$0xff] %vm471_vm4, %v1844_v17  ;;  %1855 = vst.msk [vmem:[#allocation3 + $0x23] sm:$0xff] %vm471_vm4, %v1845_v12  ;;  %v2347_v16 = vsel %vm1910_vm5, %v3360_v59, 0  ;;  %v2465_v20 = vsel %vm1910_vm5, %v3366_v18, 0 }
 0x33f   : > { %1856 = vst.msk [vmem:[#allocation3 + $0x2b] sm:$0xff] %vm471_vm4, %v1846_v32  ;;  %1857 = vst.msk [vmem:[#allocation3 + $0x33] sm:$0xff] %vm471_vm4, %v1847_v36 }
 0x340   : > { %1858 = vst.msk [vmem:[#allocation3 + $0x3b] sm:$0xff] %vm471_vm4, %v1848_v37  ;;  %1859 = vst.msk [vmem:[#allocation3 + $0x43] sm:$0xff] %vm471_vm4, %v1849_v38 }
 0x341   : > { %1860 = vst.msk [vmem:[#allocation3 + $0x4b] sm:$0xff] %vm471_vm4, %v1850_v42  ;;  %1861 = vst.msk [vmem:[#allocation3 + $0x53] sm:$0xff] %vm471_vm4, %v1851_v3 }
 0x344   : > { %v1879_v39 = vld [vmem:[#allocation3 + $0x9] sm:$0xff]  ;;  %v1880_v35 = vld [vmem:[#allocation3 + $0x11] sm:$0xff] }
 0x345   : > { %v1863_v6 = vld [vmem:[#allocation3 + $0x8] sm:$0xff]  ;;  %v1888_v30 = vpack.c.bf16 %v1879_v39, %v1878_v14  ;;  %v1881_v54 = vld [vmem:[#allocation3 + $0x19] sm:$0xff]  ;;  %v1864_v61 = vld [vmem:[#allocation3 + $0x10] sm:$0xff] }
 0x346   : > { %v1872_v9 = vpack.c.bf16 %v1863_v6, %v1862_v48  ;;  %v1865_v55 = vld [vmem:[#allocation3 + $0x18] sm:$0xff]  ;;  %v1889_v24 = vpack.c.bf16 %v1881_v54, %v1880_v35  ;;  %v1882_v58 = vld [vmem:[#allocation3 + $0x21] sm:$0xff]  ;;  %v1883_v52 = vld [vmem:[#allocation3 + $0x29] sm:$0xff] }
 0x347   : > { %3722 = vmatmul.mubr.msk.bf16.vlgmr.msra.gmra.mxu1 %vm471_vm4, %v1888_v30  ;;  %v1873_v25 = vpack.c.bf16 %v1865_v55, %v1864_v61  ;;  %v1866_v50 = vld [vmem:[#allocation3 + $0x20] sm:$0xff]  ;;  %v1867_v2 = vld [vmem:[#allocation3 + $0x28] sm:$0xff]  ;;  %v1890_v8 = vpack.c.bf16 %v1883_v52, %v1882_v58  ;;  %v1884_v51 = vld [vmem:[#allocation3 + $0x31] sm:$0xff] }
 0x348   : > { %3744 = vmatmul.mubr.msk.bf16.vlgmr.msra.gmra.mxu0 %vm471_vm4, %v1872_v9  ;;  %3764 = vmatpush3.bf16.msra.mxu1 %v2111_v49  ;;  %v1874_v34 = vpack.c.bf16 %v1867_v2, %v1866_v50  ;;  %v1885_v40 = vld [vmem:[#allocation3 + $0x39] sm:$0xff]  ;;  %v1868_v57 = vld [vmem:[#allocation3 + $0x30] sm:$0xff]  ;;  %v1886_v23 = vld [vmem:[#allocation3 + $0x41] sm:$0xff] }
 0x349   : > { %3725 = vmatprep.mubr.msk.bf16.mxu1 %vm3992_vm2, %v3991_v0  ;;  %3747 = vmatprep.mubr.msk.bf16.mxu0 %vm3992_vm2, %v3991_v0  ;;  %v1869_v45 = vld [vmem:[#allocation3 + $0x38] sm:$0xff]  ;;  %v1891_v47 = vpack.c.bf16 %v1885_v40, %v1884_v51  ;;  %v1887_v46 = vld [vmem:[#allocation3 + $0x49] sm:$0xff]  ;;  %v1870_v15 = vld [vmem:[#allocation3 + $0x40] sm:$0xff] }
 0x34a   : > { %3786 = vmatpush3.bf16.msra.mxu0 %v2229_v28  ;;  %3807 = vmatprep.subr.bf16.mxu1 %v3991_v0  ;;  %v1875_v62 = vpack.c.bf16 %v1869_v45, %v1868_v57  ;;  %v1871_v4 = vld [vmem:[#allocation3 + $0x48] sm:$0xff]  ;;  %v1892_v7 = vpack.c.bf16 %v1887_v46, %v1886_v23  ;;  %v2197_v13 = vld [vmem:[#allocation3 + $0x12] sm:$0xff]  ;;  %v2081_v33 = vld [vmem:[#allocation3 + $0x1a] sm:$0xff] }
 0x34b   : > { %3829 = vmatprep.subr.bf16.mxu0 %v3991_v0  ;;  %v1876_v11 = vpack.c.bf16 %v1871_v4, %v1870_v15  ;;  %v2079_v63 = vld [vmem:[#allocation3 + $0xa] sm:$0xff]  ;;  %v2199_v26 = vld [vmem:[#allocation3 + $0x22] sm:$0xff]  ;;  %v2089_v17 = vpack.c.bf16 %v2081_v33, %v2197_v13  ;;  %v2201_v36 = vld [vmem:[#allocation3 + $0x32] sm:$0xff] }
 0x34c   : > { %v2088_v10 = vpack.c.bf16 %v2079_v63, %v2078_v5  ;;  %v2206_v29 = vpack.c.bf16 %v2197_v13, %v2079_v63  ;;  %v2207_v12 = vpack.c.bf16 %v2199_v26, %v2081_v33  ;;  %v2083_v32 = vld [vmem:[#allocation3 + $0x2a] sm:$0xff]  ;;  %v2085_v42 = vld [vmem:[#allocation3 + $0x3a] sm:$0xff]  ;;  %v2203_v3 = vld [vmem:[#allocation3 + $0x42] sm:$0xff] }
 0x34d   : > { %v2090_v37 = vpack.c.bf16 %v2083_v32, %v2199_v26  ;;  %v2208_v38 = vpack.c.bf16 %v2201_v36, %v2083_v32  ;;  %v2091_v14 = vpack.c.bf16 %v2085_v42, %v2201_v36  ;;  %v2209_v48 = vpack.c.bf16 %v2203_v3, %v2085_v42  ;;  %v2087_v60 = vld [vmem:[#allocation3 + $0x4a] sm:$0xff]  ;;  %v2205_v1 = vld [vmem:[#allocation3 + $0x52] sm:$0xff]  ;;  %v2316_v58 = vld [vmem:[#allocation3 + $0x1b] sm:$0xff] }
 0x34e   : > { %v2092_v39 = vpack.c.bf16 %v2087_v60, %v2203_v3  ;;  %v2210_v6 = vpack.c.bf16 %v2205_v1, %v2087_v60  ;;  %v2314_v30 = vld [vmem:[#allocation3 + $0xb] sm:$0xff]  ;;  %v2315_v49 = vld [vmem:[#allocation3 + $0x13] sm:$0xff]  ;;  %v2317_v52 = vld [vmem:[#allocation3 + $0x23] sm:$0xff] }
 0x34f   : > { %3726 = vmatmul.mubr.msk.bf16.gmra.mxu1 %vm471_vm4, %v1889_v24  ;;  %v3372_v9 = vld [vmem:[%s5061_s7 + $0x18] sm:$0xf]  ;;  %v2433_v35 = vld [vmem:[#allocation3 + $0x14] sm:$0xff]  ;;  %v2324_v61 = vpack.c.bf16 %v2315_v49, %v2314_v30  ;;  %v2434_v50 = vld [vmem:[#allocation3 + $0x1c] sm:$0xff] }
 0x350   : > { %3748 = vmatmul.mubr.msk.bf16.gmra.mxu0 %vm471_vm4, %v1873_v25  ;;  %3729 = vmatprep.mubr.msk.bf16.mxu1 %vm3992_vm2, %v3991_v0  ;;  %v2432_v28 = vld [vmem:[#allocation3 + $0xc] sm:$0xff]  ;;  %v3378_v54 = vld [vmem:[%s5061_s7 + $0x1c] sm:$0xf]  ;;  %v2583_v24 = vsel %vm1910_vm5, %v3372_v9, 0  ;;  %v2435_v2 = vld [vmem:[#allocation3 + $0x24] sm:$0xff]  ;;  %v2560_v33 = vpack.c.bf16 %v2434_v50, %v2433_v35 }
 0x351   : > { %3751 = vmatprep.mubr.msk.bf16.mxu0 %vm3992_vm2, %v3991_v0  ;;  %v2442_v55 = vpack.c.bf16 %v2433_v35, %v2432_v28  ;;  %v2701_v25 = vsel %vm1910_vm5, %v3378_v54, 0  ;;  %v2318_v51 = vld [vmem:[#allocation3 + $0x2b] sm:$0xff]  ;;  %v2319_v40 = vld [vmem:[#allocation3 + $0x33] sm:$0xff]  ;;  %v2320_v23 = vld [vmem:[#allocation3 + $0x3b] sm:$0xff] }
 0x352   : > { %v2436_v57 = vld [vmem:[#allocation3 + $0x2c] sm:$0xff]  ;;  %v2437_v45 = vld [vmem:[#allocation3 + $0x34] sm:$0xff]  ;;  %v2321_v46 = vld [vmem:[#allocation3 + $0x43] sm:$0xff] }
 0x353   : > { %v2438_v15 = vld [vmem:[#allocation3 + $0x3c] sm:$0xff]  ;;  %v2439_v4 = vld [vmem:[#allocation3 + $0x44] sm:$0xff]  ;;  %v2323_v63 = vld [vmem:[#allocation3 + $0x53] sm:$0xff]  ;;  %v2561_v36 = vpack.c.bf16 %v2436_v57, %v2435_v2 }
 0x354   : > { %v2322_v5 = vld [vmem:[#allocation3 + $0x4b] sm:$0xff]  ;;  %v2441_v59 = vld [vmem:[#allocation3 + $0x54] sm:$0xff]  ;;  %v2673_v42 = vld [vmem:[#allocation3 + $0x3d] sm:$0xff]  ;;  %v2562_v3 = vpack.c.bf16 %v2438_v15, %v2437_v45 }
 0x355   : > { %v2440_v13 = vld [vmem:[#allocation3 + $0x4c] sm:$0xff]  ;;  %v2328_v18 = vpack.c.bf16 %v2323_v63, %v2322_v5  ;;  %v2676_v30 = vld [vmem:[#allocation3 + $0x55] sm:$0xff]  ;;  %v2677_v9 = vld [vmem:[#allocation3 + $0x5d] sm:$0xff] }
 0x356   : > { %v2671_v32 = vld [vmem:[#allocation3 + $0x2d] sm:$0xff]  ;;  %v2563_v1 = vpack.c.bf16 %v2440_v13, %v2439_v4  ;;  %v2682_v28 = vpack.c.bf16 %v2677_v9, %v2676_v30  ;;  %v2786_v35 = vld [vmem:[#allocation3 + $0x16] sm:$0xff]  ;;  %v2787_v54 = vld [vmem:[#allocation3 + $0x1e] sm:$0xff] }
 0x357   : > { %3730 = vmatmul.mubr.msk.bf16.gmra.mxu1 %vm471_vm4, %v1890_v8  ;;  %v2325_v8 = vpack.c.bf16 %v2317_v52, %v2316_v58  ;;  %v2675_v60 = vld [vmem:[#allocation3 + $0x4d] sm:$0xff]  ;;  %v2790_v58 = vld [vmem:[#allocation3 + $0x36] sm:$0xff]  ;;  %v2791_v52 = vld [vmem:[#allocation3 + $0x3e] sm:$0xff] }
 0x358   : > { %3752 = vmatmul.mubr.msk.bf16.gmra.mxu0 %vm471_vm4, %v1874_v34  ;;  %3733 = vmatprep.mubr.msk.bf16.mxu1 %vm3992_vm2, %v3991_v0  ;;  %v2443_v34 = vpack.c.bf16 %v2435_v2, %v2434_v50  ;;  %v2798_v50 = vpack.c.bf16 %v2791_v52, %v2790_v58  ;;  %v2792_v2 = vld [vmem:[#allocation3 + $0x46] sm:$0xff] }
 0x359   : > { %3755 = vmatprep.mubr.msk.bf16.mxu0 %vm3992_vm2, %v3991_v0 }
 0x35f   : > { %3734 = vmatmul.mubr.msk.bf16.gmra.mxu1 %vm471_vm4, %v1891_v47  ;;  %v2326_v47 = vpack.c.bf16 %v2319_v40, %v2318_v51  ;;  %v2794_v51 = vld [vmem:[#allocation3 + $0x56] sm:$0xff]  ;;  %v2795_v40 = vld [vmem:[#allocation3 + $0x5e] sm:$0xff] }
 0x360   : > { %3756 = vmatmul.mubr.msk.bf16.gmra.mxu0 %vm471_vm4, %v1875_v62  ;;  %3737 = vmatprep.mubr.msk.bf16.mxu1 %vm3992_vm2, %v3991_v0  ;;  %v2444_v62 = vpack.c.bf16 %v2437_v45, %v2436_v57  ;;  %v2800_v57 = vpack.c.bf16 %v2795_v40, %v2794_v51 }
 0x361   : > { %3759 = vmatprep.mubr.msk.bf16.mxu0 %vm3992_vm2, %v3991_v0 }
 0x367   : > { %3738 = vmatmul.mubr.msk.bf16.gmra.mxu1 %vm471_vm4, %v1892_v7  ;;  %v2327_v7 = vpack.c.bf16 %v2321_v46, %v2320_v23 }
 0x368   : > { %3760 = vmatmul.mubr.msk.bf16.gmra.mxu0 %vm471_vm4, %v1876_v11  ;;  %3765 = vmatprep.mubr.msk.bf16.mxu1 %vm3992_vm2, %v3991_v0  ;;  %v2445_v11 = vpack.c.bf16 %v2439_v4, %v2438_v15 }
 0x369   : > { %3787 = vmatprep.mubr.msk.bf16.mxu0 %vm3992_vm2, %v3991_v0 }
 0x36f   : > { %3766 = vmatmul.mubr.msk.bf16.vlgmr.msra.gmra.mxu1 %vm471_vm4, %v2088_v10  ;;  %v2446_v10 = vpack.c.bf16 %v2441_v59, %v2440_v13 }
 0x370   : > { %3788 = vmatmul.mubr.msk.bf16.vlgmr.msra.gmra.mxu0 %vm471_vm4, %v2206_v29  ;;  %3808 = vmatpush3.bf16.msra.mxu1 %v2347_v16  ;;  %v2668_v29 = vld [vmem:[#allocation3 + $0x15] sm:$0xff]  ;;  %v2669_v16 = vld [vmem:[#allocation3 + $0x1d] sm:$0xff] }
 0x371   : > { %3769 = vmatprep.mubr.msk.bf16.mxu1 %vm3992_vm2, %v3991_v0  ;;  %3791 = vmatprep.mubr.msk.bf16.mxu0 %vm3992_vm2, %v3991_v0  ;;  %v2678_v26 = vpack.c.bf16 %v2669_v16, %v2668_v29 }
 0x372   : > { %3830 = vmatpush3.bf16.msra.mxu0 %v2465_v20  ;;  %3851 = vmatprep.subr.bf16.mxu1 %v3991_v0  ;;  %v3384_v20 = vld [vmem:[%s5061_s7 + $0x20] sm:$0xf] }
 0x373   : > { %3873 = vmatprep.subr.bf16.mxu0 %v3991_v0 }
 0x377   : > { %3770 = vmatmul.mubr.msk.bf16.gmra.mxu1 %vm471_vm4, %v2089_v17  ;;  %v2819_v17 = vsel %vm1910_vm5, %v3384_v20, 0 }
 0x378   : > { %3792 = vmatmul.mubr.msk.bf16.gmra.mxu0 %vm471_vm4, %v2207_v12  ;;  %3773 = vmatprep.mubr.msk.bf16.mxu1 %vm3992_vm2, %v3991_v0  ;;  %v2670_v12 = vld [vmem:[#allocation3 + $0x25] sm:$0xff] }
 0x379   : > { %3795 = vmatprep.mubr.msk.bf16.mxu0 %vm3992_vm2, %v3991_v0 }
 0x37f   : > { %3774 = vmatmul.mubr.msk.bf16.gmra.mxu1 %vm471_vm4, %v2090_v37  ;;  %v2679_v37 = vpack.c.bf16 %v2671_v32, %v2670_v12 }
 0x380   : > { %3796 = vmatmul.mubr.msk.bf16.gmra.mxu0 %vm471_vm4, %v2208_v38  ;;  %3777 = vmatprep.mubr.msk.bf16.mxu1 %vm3992_vm2, %v3991_v0  ;;  %v2672_v38 = vld [vmem:[#allocation3 + $0x35] sm:$0xff] }
 0x381   : > { %3799 = vmatprep.mubr.msk.bf16.mxu0 %vm3992_vm2, %v3991_v0 }
 0x387   : > { %3778 = vmatmul.mubr.msk.bf16.gmra.mxu1 %vm471_vm4, %v2091_v14  ;;  %v2680_v14 = vpack.c.bf16 %v2673_v42, %v2672_v38 }
 0x388   : > { %3800 = vmatmul.mubr.msk.bf16.gmra.mxu0 %vm471_vm4, %v2209_v48  ;;  %3781 = vmatprep.mubr.msk.bf16.mxu1 %vm3992_vm2, %v3991_v0  ;;  %v2674_v48 = vld [vmem:[#allocation3 + $0x45] sm:$0xff] }
 0x389   : > { %3803 = vmatprep.mubr.msk.bf16.mxu0 %vm3992_vm2, %v3991_v0 }
 0x38f   : > { %3782 = vmatmul.mubr.msk.bf16.gmra.mxu1 %vm471_vm4, %v2092_v39  ;;  %v2681_v39 = vpack.c.bf16 %v2675_v60, %v2674_v48 }
 0x390   : > { %3804 = vmatmul.mubr.msk.bf16.gmra.mxu0 %vm471_vm4, %v2210_v6  ;;  %3809 = vmatprep.mubr.msk.bf16.mxu1 %vm3992_vm2, %v3991_v0  ;;  %v2559_v6 = vld [vmem:[#allocation3 + $0x5c] sm:$0xff] }
 0x391   : > { %3831 = vmatprep.mubr.msk.bf16.mxu0 %vm3992_vm2, %v3991_v0  ;;  %v2564_v49 = vpack.c.bf16 %v2559_v6, %v2441_v59 }
 0x397   : > { %3810 = vmatmul.mubr.msk.bf16.vlgmr.msra.gmra.mxu1 %vm471_vm4, %v2324_v61  ;;  %v2796_v61 = vpack.c.bf16 %v2787_v54, %v2786_v35 }
 0x398   : > { %3832 = vmatmul.mubr.msk.bf16.vlgmr.msra.gmra.mxu0 %vm471_vm4, %v2442_v55  ;;  %3852 = vmatpush3.bf16.msra.mxu1 %v2583_v24  ;;  %v2788_v55 = vld [vmem:[#allocation3 + $0x26] sm:$0xff]  ;;  %v2789_v24 = vld [vmem:[#allocation3 + $0x2e] sm:$0xff] }
 0x399   : > { %3813 = vmatprep.mubr.msk.bf16.mxu1 %vm3992_vm2, %v3991_v0  ;;  %3835 = vmatprep.mubr.msk.bf16.mxu0 %vm3992_vm2, %v3991_v0 }
 0x39a   : > { %3874 = vmatpush3.bf16.msra.mxu0 %v2701_v25  ;;  %3895 = vmatprep.subr.bf16.mxu1 %v3991_v0  ;;  %v2797_v25 = vpack.c.bf16 %v2789_v24, %v2788_v55 }
 0x39b   : > { %3917 = vmatprep.subr.mxu0 %v3991_v0 }
 0x39f   : > { %3814 = vmatmul.mubr.msk.bf16.gmra.mxu1 %vm471_vm4, %v2325_v8  ;;  %v2793_v8 = vld [vmem:[#allocation3 + $0x4e] sm:$0xff] }
 0x3a0   : > { %3836 = vmatmul.mubr.msk.bf16.gmra.mxu0 %vm471_vm4, %v2443_v34  ;;  %3817 = vmatprep.mubr.msk.bf16.mxu1 %vm3992_vm2, %v3991_v0  ;;  %v2799_v34 = vpack.c.bf16 %v2793_v8, %v2792_v2 }
 0x3a1   : > { %3839 = vmatprep.mubr.msk.bf16.mxu0 %vm3992_vm2, %v3991_v0 }
 0x3a7   : > { %3818 = vmatmul.mubr.msk.bf16.gmra.mxu1 %vm471_vm4, %v2326_v47 }
 0x3a8   : > { %3840 = vmatmul.mubr.msk.bf16.gmra.mxu0 %vm471_vm4, %v2444_v62  ;;  %3821 = vmatprep.mubr.msk.bf16.mxu1 %vm3992_vm2, %v3991_v0 }
 0x3a9   : > { %3843 = vmatprep.mubr.msk.bf16.mxu0 %vm3992_vm2, %v3991_v0 }
 0x3af   : > { %3822 = vmatmul.mubr.msk.bf16.gmra.mxu1 %vm471_vm4, %v2327_v7 }
 0x3b0   : > { %3844 = vmatmul.mubr.msk.bf16.gmra.mxu0 %vm471_vm4, %v2445_v11  ;;  %3825 = vmatprep.mubr.msk.bf16.mxu1 %vm3992_vm2, %v3991_v0 }
 0x3b1   : > { %3847 = vmatprep.mubr.msk.bf16.mxu0 %vm3992_vm2, %v3991_v0 }
 0x3b7   : > { %3826 = vmatmul.mubr.msk.bf16.gmra.mxu1 %vm471_vm4, %v2328_v18 }
 0x3b8   : > { %3848 = vmatmul.mubr.msk.bf16.gmra.mxu0 %vm471_vm4, %v2446_v10  ;;  %3853 = vmatprep.mubr.msk.bf16.mxu1 %vm3992_vm2, %v3991_v0 }
 0x3b9   : > { %3875 = vmatprep.mubr.msk.bf16.mxu0 %vm3992_vm2, %v3991_v0 }
 0x3bf   : > { %3854 = vmatmul.mubr.msk.bf16.vlgmr.msra.gmra.mxu1 %vm471_vm4, %v2560_v33 }
 0x3c0   : > { %3876 = vmatmul.mubr.msk.bf16.vlgmr.msra.gmra.mxu0 %vm471_vm4, %v2678_v26  ;;  %3896 = vmatpush3.bf16.msra.mxu1 %v2819_v17 }
 0x3c1   : > { %3857 = vmatprep.mubr.msk.bf16.mxu1 %vm3992_vm2, %v3991_v0  ;;  %3879 = vmatprep.mubr.msk.bf16.mxu0 %vm3992_vm2, %v3991_v0 }
 0x3c7   : > { %3858 = vmatmul.mubr.msk.bf16.gmra.mxu1 %vm471_vm4, %v2561_v36 }
 0x3c8   : > { %3880 = vmatmul.mubr.msk.bf16.gmra.mxu0 %vm471_vm4, %v2679_v37  ;;  %3861 = vmatprep.mubr.msk.bf16.mxu1 %vm3992_vm2, %v3991_v0 }
 0x3c9   : > { %3883 = vmatprep.mubr.msk.bf16.mxu0 %vm3992_vm2, %v3991_v0 }
 0x3cf   : > { %3862 = vmatmul.mubr.msk.bf16.gmra.mxu1 %vm471_vm4, %v2562_v3 }
 0x3d0   : > { %3884 = vmatmul.mubr.msk.bf16.gmra.mxu0 %vm471_vm4, %v2680_v14  ;;  %3865 = vmatprep.mubr.msk.bf16.mxu1 %vm3992_vm2, %v3991_v0 }
 0x3d1   : > { %3887 = vmatprep.mubr.msk.bf16.mxu0 %vm3992_vm2, %v3991_v0 }
 0x3d7   : > { %3866 = vmatmul.mubr.msk.bf16.gmra.mxu1 %vm471_vm4, %v2563_v1 }
 0x3d8   : > { %3888 = vmatmul.mubr.msk.bf16.gmra.mxu0 %vm471_vm4, %v2681_v39  ;;  %3869 = vmatprep.mubr.msk.bf16.mxu1 %vm3992_vm2, %v3991_v0 }
 0x3d9   : > { %3891 = vmatprep.mubr.msk.bf16.mxu0 %vm3992_vm2, %v3991_v0 }
 0x3df   : > { %3870 = vmatmul.mubr.msk.bf16.gmra.mxu1 %vm471_vm4, %v2564_v49 }
 0x3e0   : > { %3892 = vmatmul.mubr.msk.bf16.gmra.mxu0 %vm471_vm4, %v2682_v28  ;;  %3897 = vmatprep.mubr.msk.bf16.mxu1 %vm3992_vm2, %v3991_v0 }
 0x3e1   : > { %3949 = vmatprep.mubr.msk.f32.mxu0 %vm3992_vm2, %v3991_v0 }
 0x3e7   : > { %3898 = vmatmul.mubr.msk.bf16.vlgmr.msra.gmra.mxu1 %vm471_vm4, %v2796_v61 }
 0x3e8   : > { %3901 = vmatprep.mubr.msk.bf16.mxu1 %vm3992_vm2, %v3991_v0 }
 0x3ef   : > { %3902 = vmatmul.mubr.msk.bf16.gmra.mxu1 %vm471_vm4, %v2797_v25 }
 0x3f0   : > { %3905 = vmatprep.mubr.msk.bf16.mxu1 %vm3992_vm2, %v3991_v0 }
 0x3f7   : > { %3906 = vmatmul.mubr.msk.bf16.gmra.mxu1 %vm471_vm4, %v2798_v50 }
 0x3f8   : > { %3909 = vmatprep.mubr.msk.bf16.mxu1 %vm3992_vm2, %v3991_v0 }
 0x3ff   : > { %3910 = vmatmul.mubr.msk.bf16.gmra.mxu1 %vm471_vm4, %v2799_v34 }
 0x400   : > { %3913 = vmatprep.mubr.msk.bf16.mxu1 %vm3992_vm2, %v3991_v0 }
 0x407   : > { %v1948_v45 = vpop.f32.mrf.mxu1  ;;  %3914 = vmatmul.mubr.msk.bf16.gmra.mxu1 %vm471_vm4, %v2800_v57 }
 0x408   : > { %v2039_v47 = vpop.f32.mrf.mxu0 }
 0x409   : > { %v2040_v62 = vadd.f32 %v2039_v47, %v1948_v45  ;;  %v3723_v23 = vpop.f32.mrf.mxu1 }
 0x40a   : > { %v3745_v46 = vpop.f32.mrf.mxu0 }
 0x40b   : > { %v1951_v15 = vpop.f32.mrf.mxu1 }
 0x40c   : > { %v2042_v4 = vpop.f32.mrf.mxu0 }
 0x40d   : > { %v2043_v7 = vadd.f32 %v2042_v4, %v1951_v15  ;;  %v3724_v11 = vpop.f32.mrf.mxu1 }
 0x40e   : > { %v3746_v5 = vpop.f32.mrf.mxu0 }
 0x40f   : > { %v1956_v63 = vpop.f32.mrf.mxu1 }
 0x410   : > { %v2047_v13 = vpop.f32.mrf.mxu0 }
 0x411   : > { %v2048_v59 = vadd.f32 %v2047_v13, %v1956_v63  ;;  %v3727_v18 = vpop.f32.mrf.mxu1 }
 0x412   : > { %v3749_v10 = vpop.f32.mrf.mxu0 }
 0x413   : > { %v1959_v29 = vpop.f32.mrf.mxu1 }
 0x414   : > { %v2050_v16 = vpop.f32.mrf.mxu0 }
 0x415   : > { %v2051_v20 = vadd.f32 %v2050_v16, %v1959_v29  ;;  %v3728_v33 = vpop.f32.mrf.mxu1 }
 0x416   : > { %v3750_v26 = vpop.f32.mrf.mxu0 }
 0x417   : > { %v1964_v17 = vpop.f32.mrf.mxu1 }
 0x418   : > { %v2055_v12 = vpop.f32.mrf.mxu0 }
 0x419   : > { %v2056_v32 = vadd.f32 %v2055_v12, %v1964_v17  ;;  %v3731_v36 = vpop.f32.mrf.mxu1 }
 0x41a   : > { %v3753_v37 = vpop.f32.mrf.mxu0 }
 0x41b   : > { %v1967_v38 = vpop.f32.mrf.mxu1 }
 0x41c   : > { %v2058_v42 = vpop.f32.mrf.mxu0 }
 0x41d   : > { %v2059_v3 = vadd.f32 %v2058_v42, %v1967_v38  ;;  %v3732_v14 = vpop.f32.mrf.mxu1 }
 0x41e   : > { %v3754_v48 = vpop.f32.mrf.mxu0 }
 0x41f   : > { %v1972_v60 = vpop.f32.mrf.mxu1 }
 0x420   : > { %v2063_v1 = vpop.f32.mrf.mxu0 }
 0x421   : > { %v2064_v39 = vadd.f32 %v2063_v1, %v1972_v60  ;;  %v3735_v6 = vpop.f32.mrf.mxu1 }
 0x422   : > { %v3757_v30 = vpop.f32.mrf.mxu0 }
 0x423   : > { %v1975_v9 = vpop.f32.mrf.mxu1 }
 0x424   : > { %v2066_v49 = vpop.f32.mrf.mxu0 }
 0x425   : > { %v2067_v28 = vadd.f32 %v2066_v49, %v1975_v9  ;;  %v3736_v35 = vpop.f32.mrf.mxu1 }
 0x426   : > { %v3758_v54 = vpop.f32.mrf.mxu0 }
 0x427   : > { %v1980_v61 = vpop.f32.mrf.mxu1 }
 0x428   : > { %v2071_v55 = vpop.f32.mrf.mxu0 }
 0x429   : > { %v2072_v24 = vadd.f32 %v2071_v55, %v1980_v61  ;;  %v3739_v25 = vpop.f32.mrf.mxu1 }
 0x42a   : > { %v3761_v58 = vpop.f32.mrf.mxu0 }
 0x42b   : > { %v1983_v52 = vpop.f32.mrf.mxu1 }
 0x42c   : > { %v2074_v50 = vpop.f32.mrf.mxu0 }
 0x42d   : > { %v2075_v2 = vadd.f32 %v2074_v50, %v1983_v52  ;;  %v3740_v8 = vpop.f32.mrf.mxu1 }
 0x42e   : > { %v3762_v34 = vpop.f32.mrf.mxu0 }
 0x42f   : > { %v2147_v51 = vpop.f32.mrf.mxu1 }
 0x430   : > { %v2265_v40 = vpop.f32.mrf.mxu0  ;;  %v2186_v57 = vadd.f32 %v2147_v51, %v2040_v62 }
 0x431   : > { %v3767_v45 = vpop.f32.mrf.mxu1 }
 0x432   : > { %v3789_v47 = vpop.f32.mrf.mxu0  ;;  %v2304_v23 = vadd.f32 %v2265_v40, %v2186_v57 }
 0x433   : > { %v2150_v46 = vpop.f32.mrf.mxu1 }
 0x434   : > { %v2268_v15 = vpop.f32.mrf.mxu0  ;;  %v2187_v4 = vadd.f32 %v2150_v46, %v2043_v7 }
 0x435   : > { %v3768_v11 = vpop.f32.mrf.mxu1 }
 0x436   : > { %v3790_v5 = vpop.f32.mrf.mxu0  ;;  %v4788_v63 = vadd.f32 %v2268_v15, %v2187_v4 }
 0x437   : > { %v2155_v13 = vpop.f32.mrf.mxu1 }
 0x438   : > { %v2273_v18 = vpop.f32.mrf.mxu0  ;;  %v2188_v10 = vadd.f32 %v2155_v13, %v2048_v59 }
 0x439   : > { %v3771_v29 = vpop.f32.mrf.mxu1 }
 0x43a   : > { %v3793_v16 = vpop.f32.mrf.mxu0  ;;  %v4790_v33 = vadd.f32 %v2273_v18, %v2188_v10  ;;  %v3098_v18 = vld [vmem:[%s5065_s11 + $0x78] sm:$0xff] }
 0x43b   : > { %v2158_v26 = vpop.f32.mrf.mxu1  ;;  %3918 = vmatpush3.msra.mxu0 %v3098_v18 }
 0x43c   : > { %v2276_v17 = vpop.f32.mrf.mxu0  ;;  %v2189_v62 = vadd.f32 %v2158_v26, %v2051_v20  ;;  %3919 = vmatprep.subr.mxu0 %v3991_v0 }
 0x43d   : > { %v3772_v12 = vpop.f32.mrf.mxu1 }
 0x43e   : > { %v3794_v36 = vpop.f32.mrf.mxu0  ;;  %v4792_v37 = vadd.f32 %v2276_v17, %v2189_v62 }
 0x43f   : > { %v2163_v38 = vpop.f32.mrf.mxu1 }
 0x440   : > { %v2281_v7 = vpop.f32.mrf.mxu0  ;;  %v2190_v42 = vadd.f32 %v2163_v38, %v2056_v32 }
 0x441   : > { %v3775_v14 = vpop.f32.mrf.mxu1 }
 0x442   : > { %v3797_v48 = vpop.f32.mrf.mxu0  ;;  %v4794_v60 = vadd.f32 %v2281_v7, %v2190_v42  ;;  %v3094_v7 = vld [vmem:[%s5065_s11 + $0x58] sm:$0xff] }
 0x443   : > { %v2166_v1 = vpop.f32.mrf.mxu1 }
 0x444   : > { %v2284_v59 = vpop.f32.mrf.mxu0  ;;  %v2191_v6 = vadd.f32 %v2166_v1, %v2059_v3 }
 0x445   : > { %v3776_v30 = vpop.f32.mrf.mxu1 }
 0x446   : > { %v3798_v9 = vpop.f32.mrf.mxu0  ;;  %v4796_v49 = vadd.f32 %v2284_v59, %v2191_v6  ;;  %v3092_v30 = vld [vmem:[%s5065_s11 + $0x48] sm:$0xff] }
 0x447   : > { %v2171_v35 = vpop.f32.mrf.mxu1 }
 0x448   : > { %v2289_v20 = vpop.f32.mrf.mxu0  ;;  %v2192_v54 = vadd.f32 %v2171_v35, %v2064_v39 }
 0x449   : > { %v3779_v61 = vpop.f32.mrf.mxu1 }
 0x44a   : > { %v3801_v55 = vpop.f32.mrf.mxu0  ;;  %v4798_v25 = vadd.f32 %v2289_v20, %v2192_v54 }
 0x44b   : > { %v2174_v58 = vpop.f32.mrf.mxu1 }
 0x44c   : > { %v2292_v32 = vpop.f32.mrf.mxu0  ;;  %v2193_v52 = vadd.f32 %v2174_v58, %v2067_v28  ;;  %v3090_v58 = vld [vmem:[%s5065_s11 + $0x38] sm:$0xff] }
 0x44d   : > { %v3780_v50 = vpop.f32.mrf.mxu1 }
 0x44e   : > { %v3802_v8 = vpop.f32.mrf.mxu0  ;;  %v4800_v34 = vadd.f32 %v2292_v32, %v2193_v52 }
 0x44f   : > { %v2179_v51 = vpop.f32.mrf.mxu1 }
 0x450   : > { %v2297_v3 = vpop.f32.mrf.mxu0  ;;  %v2194_v40 = vadd.f32 %v2179_v51, %v2072_v24  ;;  %v3097_v24 = vld [vmem:[%s5065_s11 + $0x70] sm:$0xff] }
 0x451   : > { %v3783_v57 = vpop.f32.mrf.mxu1  ;;  %3920 = vmatpush3.msra.mxu0 %v3097_v24 }
 0x452   : > { %v3805_v45 = vpop.f32.mrf.mxu0  ;;  %v4802_v47 = vadd.f32 %v2297_v3, %v2194_v40  ;;  %3921 = vmatprep.subr.mxu0 %v3991_v0  ;;  %v3088_v40 = vld [vmem:[%s5065_s11 + $0x28] sm:$0xff] }
 0x453   : > { %v2182_v46 = vpop.f32.mrf.mxu1 }
 0x454   : > { %v2300_v39 = vpop.f32.mrf.mxu0  ;;  %v2195_v15 = vadd.f32 %v2182_v46, %v2075_v2  ;;  %v3096_v2 = vld [vmem:[%s5065_s11 + $0x68] sm:$0xff] }
 0x455   : > { %v3784_v4 = vpop.f32.mrf.mxu1  ;;  %3922 = vmatpush3.msra.mxu0 %v3096_v2  ;;  %v3084_v2 = vld [vmem:[%s5065_s11 + $0x8] sm:$0xff] }
 0x456   : > { %v3806_v11 = vpop.f32.mrf.mxu0  ;;  %v4804_v5 = vadd.f32 %v2300_v39, %v2195_v15  ;;  %3923 = vmatprep.subr.mxu0 %v3991_v0 }
 0x457   : > { %v2383_v13 = vpop.f32.mrf.mxu1  ;;  %v3086_v11 = vld [vmem:[%s5065_s11 + $0x18] sm:$0xff] }
 0x458   : > { %v2501_v28 = vpop.f32.mrf.mxu0  ;;  %v2422_v10 = vadd.f32 %v2383_v13, %v2304_v23  ;;  %v3095_v23 = vld [vmem:[%s5065_s11 + $0x60] sm:$0xff] }
 0x459   : > { %v3811_v29 = vpop.f32.mrf.mxu1  ;;  %3924 = vmatpush3.msra.mxu0 %v3095_v23 }
 0x45a   : > { %v3833_v16 = vpop.f32.mrf.mxu0  ;;  %v4816_v26 = vadd.f32 %v2501_v28, %v2422_v10  ;;  %3925 = vmatprep.subr.mxu0 %v3991_v0  ;;  %v3081_v10 = vld [vmem:[%s449_s24] sm:$0x1] }
 0x45b   : > { %v2386_v17 = vpop.f32.mrf.mxu1  ;;  %3926 = vmatpush3.msra.mxu0 %v3094_v7 }
 0x45c   : > { %v2504_v62 = vpop.f32.mrf.mxu0  ;;  %v2423_v12 = vadd.f32 %v2386_v17, %v4788_v63  ;;  %v3093_v63 = vld [vmem:[%s5065_s11 + $0x50] sm:$0xff]  ;;  %3927 = vmatprep.subr.mxu0 %v3991_v0 }
 0x45d   : > { %v3812_v36 = vpop.f32.mrf.mxu1  ;;  %3928 = vmatpush3.msra.mxu0 %v3093_v63 }
 0x45e   : > { %v3834_v38 = vpop.f32.mrf.mxu0  ;;  %v4827_v42 = vadd.f32 %v2504_v62, %v2423_v12  ;;  %3929 = vmatprep.subr.mxu0 %v3991_v0  ;;  %v3082_v12 = vmax.f32 %v3081_v10, 0.0 }
 0x45f   : > { %v2391_v14 = vpop.f32.mrf.mxu1  ;;  %3930 = vmatpush3.msra.mxu0 %v3092_v30 }
 0x460   : > { %v2509_v48 = vpop.f32.mrf.mxu0  ;;  %v2424_v1 = vadd.f32 %v2391_v14, %v4790_v33  ;;  %v3091_v33 = vld [vmem:[%s5065_s11 + $0x40] sm:$0xff]  ;;  %3931 = vmatprep.subr.mxu0 %v3991_v0 }
 0x461   : > { %v3815_v59 = vpop.f32.mrf.mxu1  ;;  %3932 = vmatpush3.msra.mxu0 %v3091_v33 }
 0x462   : > { %v3837_v6 = vpop.f32.mrf.mxu0  ;;  %v4838_v9 = vadd.f32 %v2509_v48, %v2424_v1  ;;  %3933 = vmatprep.subr.mxu0 %v3991_v0 }
 0x463   : > { %v2394_v35 = vpop.f32.mrf.mxu1  ;;  %3934 = vmatpush3.msra.mxu0 %v3090_v58 }
 0x464   : > { %v2512_v20 = vpop.f32.mrf.mxu0  ;;  %v2425_v54 = vadd.f32 %v2394_v35, %v4792_v37  ;;  %v3089_v37 = vld [vmem:[%s5065_s11 + $0x30] sm:$0xff]  ;;  %3935 = vmatprep.subr.mxu0 %v3991_v0 }
 0x465   : > { %v3816_v61 = vpop.f32.mrf.mxu1  ;;  %3936 = vmatpush3.msra.mxu0 %v3089_v37 }
 0x466   : > { %v3838_v55 = vpop.f32.mrf.mxu0  ;;  %v4849_v32 = vadd.f32 %v2512_v20, %v2425_v54  ;;  %3937 = vmatprep.subr.mxu0 %v3991_v0 }
 0x467   : > { %v2399_v52 = vpop.f32.mrf.mxu1  ;;  %3938 = vmatpush3.msra.mxu0 %v3088_v40 }
 0x468   : > { %v2517_v50 = vpop.f32.mrf.mxu0  ;;  %v2426_v8 = vadd.f32 %v2399_v52, %v4794_v60  ;;  %v3087_v60 = vld [vmem:[%s5065_s11 + $0x20] sm:$0xff]  ;;  %3939 = vmatprep.subr.mxu0 %v3991_v0 }
 0x469   : > { %v3819_v51 = vpop.f32.mrf.mxu1  ;;  %3940 = vmatpush3.msra.mxu0 %v3087_v60 }
 0x46a   : > { %v3841_v3 = vpop.f32.mrf.mxu0  ;;  %v4860_v57 = vadd.f32 %v2517_v50, %v2426_v8  ;;  %3941 = vmatprep.subr.mxu0 %v3991_v0 }
 0x46b   : > { %v2402_v45 = vpop.f32.mrf.mxu1  ;;  %3942 = vmatpush3.msra.mxu0 %v3086_v11 }
 0x46c   : > { %v2520_v46 = vpop.f32.mrf.mxu0  ;;  %v2427_v39 = vadd.f32 %v2402_v45, %v4796_v49  ;;  %v3085_v49 = vld [vmem:[%s5065_s11 + $0x10] sm:$0xff]  ;;  %3943 = vmatprep.subr.mxu0 %v3991_v0 }
 0x46d   : > { %v3820_v15 = vpop.f32.mrf.mxu1  ;;  %3944 = vmatpush3.msra.mxu0 %v3085_v49 }
 0x46e   : > { %v3842_v4 = vpop.f32.mrf.mxu0  ;;  %v4875_v13 = vadd.f32 %v2520_v46, %v2427_v39  ;;  %3945 = vmatprep.subr.mxu0 %v3991_v0 }
 0x46f   : > { %v2407_v28 = vpop.f32.mrf.mxu1  ;;  %3946 = vmatpush3.msra.mxu0 %v3084_v2 }
 0x470   : > { %v2525_v18 = vpop.f32.mrf.mxu0  ;;  %v2428_v24 = vadd.f32 %v2407_v28, %v4798_v25  ;;  %v3083_v25 = vld [vmem:[%s5065_s11] sm:$0xff]  ;;  %3947 = vmatprep.subr.mxu0 %v3991_v0 }
 0x471   : > { %v3823_v29 = vpop.f32.mrf.mxu1  ;;  %3948 = vmatpush3.msra.mxu0 %v3083_v25 }
 0x472   : > { %v3845_v16 = vpop.f32.mrf.mxu0  ;;  %v4886_v17 = vadd.f32 %v2525_v18, %v2428_v24  ;;  %3950 = vmatmul.mubr.f32.vlgmr.msra.gmra.mxu0 %v3082_v12 }
 0x473   : > { %v2410_v62 = vpop.f32.mrf.mxu1 }
 0x474   : > { %v2528_v23 = vpop.f32.mrf.mxu0  ;;  %v2429_v36 = vadd.f32 %v2410_v62, %v4800_v34 }
 0x475   : > { %v3824_v38 = vpop.f32.mrf.mxu1 }
 0x476   : > { %v3846_v7 = vpop.f32.mrf.mxu0  ;;  %v4894_v14 = vadd.f32 %v2528_v23, %v2429_v36 }
 0x477   : > { %v2415_v48 = vpop.f32.mrf.mxu1 }
 0x478   : > { %v2533_v63 = vpop.f32.mrf.mxu0  ;;  %v2430_v1 = vadd.f32 %v2415_v48, %v4802_v47 }
 0x479   : > { %v3827_v59 = vpop.f32.mrf.mxu1 }
 0x47a   : > { %v3849_v6 = vpop.f32.mrf.mxu0  ;;  %v4897_v30 = vadd.f32 %v2533_v63, %v2430_v1 }
 0x47b   : > { %v2418_v35 = vpop.f32.mrf.mxu1 }
 0x47c   : > { %v2536_v20 = vpop.f32.mrf.mxu0  ;;  %v2431_v34 = vadd.f32 %v2418_v35, %v4804_v5 }
 0x47d   : > { %v3828_v33 = vpop.f32.mrf.mxu1 }
 0x47e   : > { %v3850_v54 = vpop.f32.mrf.mxu0  ;;  %v4900_v61 = vadd.f32 %v2536_v20, %v2431_v34 }
 0x47f   : > { %v2619_v0 = vpop.f32.mrf.mxu1 }
 0x480   : > { %v2737_v55 = vpop.f32.mrf.mxu0 }
 0x481   : > { %v3855_v58 = vpop.f32.mrf.mxu1 }
 0x482   : > { %v3877_v52 = vpop.f32.mrf.mxu0  ;;  %v2658_v58 = vadd.f32 %v2619_v0, %v4816_v26  ;;  %v4916_v26 = vld [vmem:[%s5062_s8] ss:$0 sm:$0xff] }
 0x483   : > { %v2622_v50 = vpop.f32.mrf.mxu1 }
 0x484   : > { %v2740_v37 = vpop.f32.mrf.mxu0  ;;  %v2659_v33 = vadd.f32 %v2622_v50, %v4827_v42 }
 0x485   : > { %v3856_v8 = vpop.f32.mrf.mxu1 }
 0x486   : > { %v3878_v47 = vpop.f32.mrf.mxu0 }
 0x487   : > { %v2627_v51 = vpop.f32.mrf.mxu1  ;;  %v2777_v47 = vadd.f32 %v2740_v37, %v2659_v33 }
 0x488   : > { %v2745_v3 = vpop.f32.mrf.mxu0  ;;  %v2660_v8 = vadd.f32 %v2627_v51, %v4838_v9 }
 0x489   : > { %v3859_v40 = vpop.f32.mrf.mxu1 }
 0x48a   : > { %v3881_v45 = vpop.f32.mrf.mxu0 }
 0x48b   : > { %v2630_v46 = vpop.f32.mrf.mxu1 }
 0x48c   : > { %v2748_v60 = vpop.f32.mrf.mxu0  ;;  %v2661_v45 = vadd.f32 %v2630_v46, %v4849_v32 }
 0x48d   : > { %v3860_v39 = vpop.f32.mrf.mxu1 }
 0x48e   : > { %v3882_v5 = vpop.f32.mrf.mxu0  ;;  %v2776_v39 = vadd.f32 %v2737_v55, %v2658_v58 }
 0x48f   : > { %v2635_v15 = vpop.f32.mrf.mxu1 }
 0x490   : > { %v2753_v4 = vpop.f32.mrf.mxu0 }
 0x491   : > { %v3863_v11 = vpop.f32.mrf.mxu1 }
 0x492   : > { %v3885_v28 = vpop.f32.mrf.mxu0 }
 0x493   : > { %v2638_v18 = vpop.f32.mrf.mxu1  ;;  %v2778_v28 = vadd.f32 %v2745_v3, %v2660_v8 }
 0x494   : > { %v2756_v49 = vpop.f32.mrf.mxu0  ;;  %v2663_v55 = vadd.f32 %v2638_v18, %v4875_v13 }
 0x495   : > { %v3864_v24 = vpop.f32.mrf.mxu1 }
 0x496   : > { %v3886_v10 = vpop.f32.mrf.mxu0  ;;  %v2662_v24 = vadd.f32 %v2635_v15, %v4860_v57  ;;  %v2781_v15 = vadd.f32 %v2756_v49, %v2663_v55 }
 0x497   : > { %v2643_v29 = vpop.f32.mrf.mxu1 }
 0x498   : > { %v2761_v16 = vpop.f32.mrf.mxu0  ;;  %v2780_v32 = vadd.f32 %v2753_v4, %v2662_v24 }
 0x499   : > { %v3867_v2 = vpop.f32.mrf.mxu1 }
 0x49a   : > { %v3889_v62 = vpop.f32.mrf.mxu0 }
 0x49b   : > { %v2646_v23 = vpop.f32.mrf.mxu1  ;;  %v2779_v62 = vadd.f32 %v2748_v60, %v2661_v45 }
 0x49c   : > { %v2764_v25 = vpop.f32.mrf.mxu0 }
 0x49d   : > { %v3868_v12 = vpop.f32.mrf.mxu1 }
 0x49e   : > { %v3890_v36 = vpop.f32.mrf.mxu0  ;;  %v2664_v12 = vadd.f32 %v2643_v29, %v4886_v17 }
 0x49f   : > { %v2651_v38 = vpop.f32.mrf.mxu1 }
 0x4a0   : > { %v4902_v7 = vpop.f32.mrf.mxu0 }
 0x4a1   : > { %v3871_v48 = vpop.f32.mrf.mxu1 }
 0x4a2   : > { %v3893_v63 = vpop.f32.mrf.mxu0 }
 0x4a3   : > { %v4904_v1 = vpop.f32.mrf.mxu1 }
 0x4a4   : > { %v4906_v59 = vpop.f32.mrf.mxu0 }
 0x4a5   : > { %v3872_v6 = vpop.f32.mrf.mxu1 }
 0x4a6   : > { %v3894_v35 = vpop.f32.mrf.mxu0  ;;  %v2665_v6 = vadd.f32 %v2646_v23, %v4894_v14  ;;  %v2666_v14 = vadd.f32 %v2651_v38, %v4897_v30 }
 0x4a7   : > { %v2855_v20 = vpop.f32.mrf.mxu1 }
 0x4a8   : > { %v2894_v10 = vadd.f32 %v2855_v20, %v2776_v39  ;;  %v2782_v20 = vadd.f32 %v2761_v16, %v2664_v12 }
 0x4a9   : > { %v3899_v34 = vpop.f32.mrf.mxu1 }
 0x4aa   : > { %v4923_v37 = vadd.f32 %v4916_v26, %v2894_v10 }
 0x4ab   : > { %v2858_v54 = vpop.f32.mrf.mxu1 }
 0x4ac   : > { %v2895_v5 = vadd.f32 %v2858_v54, %v2777_v47  ;;  %v2921_v13 = vmul.f32 %v4923_v37, %v4480_v41  ;;  %v2783_v47 = vadd.f32 %v2764_v25, %v2665_v6 }
 0x4ad   : > { %v3900_v52 = vpop.f32.mrf.mxu1 }
 0x4ae   : > { %v4919_v9 = vadd.f32 %v4916_v26, %v2895_v5  ;;  %v2959_v34 = vmul.f32 %v2921_v13, %v2921_v13  ;;  %v2931_v16 = vsel %vm471_vm4, %v2921_v13, 0.0 }
 0x4af   : > { %v2863_v40 = vpop.f32.mrf.mxu1 }
 0x4b0   : > { %v2896_v42 = vadd.f32 %v2863_v40, %v2778_v28  ;;  %v2922_v46 = vmul.f32 %v4919_v9, %v4468_v44  ;;  %v2969_v28 = vsel %vm471_vm4, %v2959_v34, 0.0 }
 0x4b1   : > { %v3903_v11 = vpop.f32.mrf.mxu1 }
 0x4b2   : > { %v4926_v51 = vadd.f32 %v4916_v26, %v2896_v42  ;;  %v2960_v35 = vmul.f32 %v2922_v46, %v2922_v46  ;;  %v2932_v58 = vsel %vm471_vm4, %v2922_v46, 0.0  ;;  %v2784_v42 = vadd.f32 %v4902_v7, %v2666_v14 }
 0x4b3   : > { %v2866_v2 = vpop.f32.mrf.mxu1  ;;  %v2933_v24 = vadd.f32 %v2932_v58, %v2931_v16 }
 0x4b4   : > { %v2897_v50 = vadd.f32 %v2866_v2, %v2779_v62  ;;  %v2923_v48 = vmul.f32 %v4926_v51, %v4485_v56  ;;  %v2970_v23 = vsel %vm471_vm4, %v2960_v35, 0.0 }
 0x4b5   : > { %v3904_v0 = vpop.f32.mrf.mxu1 }
 0x4b6   : > { %v4932_v4 = vadd.f32 %v4916_v26, %v2897_v50  ;;  %v2961_v52 = vmul.f32 %v2923_v48, %v2923_v48  ;;  %v2934_v45 = vsel %vm471_vm4, %v2923_v48, 0.0  ;;  %v2667_v0 = vadd.f32 %v4904_v1, %v4900_v61 }
 0x4b7   : > { %v2871_v57 = vpop.f32.mrf.mxu1  ;;  %v2935_v55 = vadd.f32 %v2934_v45, %v2933_v24 }
 0x4b8   : > { %v2898_v3 = vadd.f32 %v2871_v57, %v2780_v32  ;;  %v2924_v17 = vmul.f32 %v4932_v4, %v4498_v53  ;;  %v2972_v30 = vsel %vm471_vm4, %v2961_v52, 0.0  ;;  %v2971_v32 = vadd.f32 %v2970_v23, %v2969_v28 }
 0x4b9   : > { %v3907_v60 = vpop.f32.mrf.mxu1 }
 0x4ba   : > { %v4937_v18 = vadd.f32 %v4916_v26, %v2898_v3  ;;  %v2962_v39 = vmul.f32 %v2924_v17, %v2924_v17  ;;  %v2936_v38 = vsel %vm471_vm4, %v2924_v17, 0.0 }
 0x4bb   : > { %v2874_v36 = vpop.f32.mrf.mxu1  ;;  %v2937_v12 = vadd.f32 %v2936_v38, %v2935_v55 }
 0x4bc   : > { %v2899_v63 = vadd.f32 %v2874_v36, %v2781_v15  ;;  %v2925_v33 = vmul.f32 %v4937_v18, %v4506_v27  ;;  %v2974_v57 = vsel %vm471_vm4, %v2962_v39, 0.0  ;;  %v2973_v15 = vadd.f32 %v2972_v30, %v2971_v32 }
 0x4bd   : > { %v3908_v49 = vpop.f32.mrf.mxu1 }
 0x4be   : > { %v4945_v29 = vadd.f32 %v4916_v26, %v2899_v63  ;;  %v2963_v25 = vmul.f32 %v2925_v33, %v2925_v33  ;;  %v2938_v3 = vsel %vm471_vm4, %v2925_v33, 0.0  ;;  %v2785_v63 = vadd.f32 %v4906_v59, %v2667_v0 }
 0x4bf   : > { %v2879_v54 = vpop.f32.mrf.mxu1  ;;  %v2975_v6 = vadd.f32 %v2974_v57, %v2973_v15  ;;  %v2939_v35 = vadd.f32 %v2938_v3, %v2937_v12 }
 0x4c0   : > { %v2900_v8 = vadd.f32 %v2879_v54, %v2782_v20  ;;  %v2926_v5 = vmul.f32 %v4945_v29, %v4521_v22  ;;  %v2976_v13 = vsel %vm471_vm4, %v2963_v25, 0.0 }
 0x4c1   : > { %v3911_v40 = vpop.f32.mrf.mxu1  ;;  %v2977_v54 = vadd.f32 %v2976_v13, %v2975_v6 }
 0x4c2   : > { %v4957_v11 = vadd.f32 %v4916_v26, %v2900_v8  ;;  %v2964_v46 = vmul.f32 %v2926_v5, %v2926_v5  ;;  %v2940_v7 = vsel %vm471_vm4, %v2926_v5, 0.0 }
 0x4c3   : > { %v2882_v10 = vpop.f32.mrf.mxu1  ;;  %v2941_v58 = vadd.f32 %v2940_v7, %v2939_v35 }
 0x4c4   : > { %v2927_v2 = vmul.f32 %v4957_v11, %v4530_v19  ;;  %v2901_v62 = vadd.f32 %v2882_v10, %v2783_v47  ;;  %v2978_v20 = vsel %vm471_vm4, %v2964_v46, 0.0 }
 0x4c5   : > { %v3912_v50 = vpop.f32.mrf.mxu1  ;;  %v2979_v40 = vadd.f32 %v2978_v20, %v2977_v54 }
 0x4c6   : > { %v4970_v60 = vadd.f32 %v4916_v26, %v2901_v62  ;;  %v2965_v48 = vmul.f32 %v2927_v2, %v2927_v2  ;;  %v2942_v17 = vsel %vm471_vm4, %v2927_v2, 0.0 }
 0x4c7   : > { %v2887_v36 = vpop.f32.mrf.mxu1  ;;  %v2943_v23 = vadd.f32 %v2942_v17, %v2941_v58  ;;  %v3099_v58 = vld [vmem:[%s5066_s12] sm:$0x1] }
 0x4c8   : > { %v2928_v61 = vmul.f32 %v4970_v60, %v4545_v21  ;;  %v2902_v1 = vadd.f32 %v2887_v36, %v2784_v42  ;;  %v2980_v14 = vsel %vm471_vm4, %v2965_v48, 0.0 }
 0x4c9   : > { %v3915_v49 = vpop.f32.mrf.mxu1  ;;  %v2981_v25 = vadd.f32 %v2980_v14, %v2979_v40 }
 0x4ca   : > { %v2966_v34 = vmul.f32 %v2928_v61, %v2928_v61  ;;  %v4980_v33 = vadd.f32 %v4916_v26, %v2902_v1  ;;  %v2944_v59 = vsel %vm471_vm4, %v2928_v61, 0.0 }
 0x4cb   : > { %v2890_v52 = vpop.f32.mrf.mxu1  ;;  %v2945_v24 = vadd.f32 %v2944_v59, %v2943_v23 }
 0x4cc   : > { %v2929_v8 = vmul.f32 %v4980_v33, %v4556_v31  ;;  %v2903_v47 = vadd.f32 %v2890_v52, %v2785_v63  ;;  %v2982_v28 = vsel %vm471_vm4, %v2966_v34, 0.0  ;;  %v3170_v34 = vlaneseq }
 0x4cd   : > { %v3916_v16 = vpop.f32.mrf.mxu1  ;;  %v2983_v2 = vadd.f32 %v2982_v28, %v2981_v25 }
 0x4ce   : > { %v4987_v45 = vadd.f32 %v4916_v26, %v2903_v47  ;;  %v2946_v39 = vsel %vm471_vm4, %v2929_v8, 0.0  ;;  %v2967_v5 = vmul.f32 %v2929_v8, %v2929_v8  ;;  %v3171_v54 = vshrl.u32 %v3170_v34, 7 }
 0x4cf   : > { %v2947_v38 = vadd.f32 %v2946_v39, %v2945_v24 }
 0x4d0   : > { %v2930_v10 = vmul.f32 %v4987_v45, %v4567_v43  ;;  %v2984_v30 = vsel %vm471_vm4, %v2967_v5, 0.0  ;;  %v3172_v8 = vsub.s32 0, %v3171_v54 }
 0x4d1   : > { %v2985_v26 = vadd.f32 %v2984_v30, %v2983_v2 }
 0x4d2   : > { %v2948_v62 = vsel %vm471_vm4, %v2930_v10, 0.0  ;;  %v2968_v42 = vmul.f32 %v2930_v10, %v2930_v10 }
 0x4d3   : > { %v2949_v0 = vadd.f32 %v2948_v62, %v2947_v38 }
 0x4d4   : > { %v2986_v32 = vsel %vm471_vm4, %v2968_v42, 0.0 }
 0x4d5   : > { %2950 = vadd.xlane.f32.xlu0 %v2949_v0  ;;  %v2987_v55 = vadd.f32 %v2986_v32, %v2985_v26 }
 0x4d7   : > { %2988 = vadd.xlane.f32.xlu1 %v2987_v55 }
 0x532   : > { %v3166_v35 = vpop.f32.mrf.mxu0 }
 0x533   : > { %v3167_v52 = vadd.f32 %v3166_v35, %v3099_v58 }
 0x534   : > { %v3951_v49 = vpop.f32.mrf.mxu0 }
 0x535   : > { %v5002_v23 = vrot.slane %v3167_v52, %v3172_v8 }
 0x55e   : > { %v2951_v50 = vpop.xlane.xlu0 %2950 }
 0x55f   : > { %v2952_v57 = vrot.slane %v2951_v50, 4 }
 0x560   : > { %v2989_v3 = vpop.xlane.xlu1 %2988 }
 0x561   : > { %v2953_v46 = vadd.f32 %v2952_v57, %v2951_v50  ;;  %v2990_v15 = vrot.slane %v2989_v3, 4 }
 0x563   : > { %v2954_v12 = vrot.slane %v2953_v46, 2  ;;  %v2991_v13 = vadd.f32 %v2990_v15, %v2989_v3 }
 0x565   : > { %v2955_v36 = vadd.f32 %v2954_v12, %v2953_v46  ;;  %v2992_v7 = vrot.slane %v2991_v13, 2 }
 0x567   : > { %v2993_v48 = vadd.f32 %v2992_v7, %v2991_v13  ;;  %v2956_v61 = vrot.slane %v2955_v36, 1 }
 0x569   : > { %v2957_v1 = vadd.f32 %v2956_v61, %v2955_v36  ;;  %v2994_v63 = vrot.slane %v2993_v48, 1 }
 0x56b   : > { %3959 = vpush %v2957_v1  ;;  %v2995_v6 = vadd.f32 %v2994_v63, %v2993_v48 }
 0x56d   : > { %3961 = vpush %v2995_v6 }
 0x59c   : > { %s3960_s18 = spop %3959 }
 0x59d   : > { %s2997_s19 = smul.f32 0.001953125, %s3960_s18 }
 0x59e   : > { %s3962_s20 = spop %3961 }
 0x59f   : > { %s2999_s21 = smul.f32 %s2997_s19, %s2997_s19  ;;  %v3001_v47 = vstv %s2997_s19  ;;  %s454_s19 = scalar_lea.vmem %s5067_s13, %s3952_s17 }
 0x5a0   : > { %s2998_s22 = smul.f32 0.001953125, %s3962_s20  ;;  %v3002_v59 = vsub.f32 %v4923_v37, %v3001_v47  ;;  %v3003_v14 = vsub.f32 %v4919_v9, %v3001_v47  ;;  %v3004_v16 = vsub.f32 %v4926_v51, %v3001_v47  ;;  %v3005_v40 = vsub.f32 %v4932_v4, %v3001_v47  ;;  %v3391_v51 = vld [vmem:[%s5063_s9] ss:$0 sm:$0xff] }
 0x5a1   : > { %v3006_v39 = vsub.f32 %v4937_v18, %v3001_v47  ;;  %v3007_v5 = vsub.f32 %v4945_v29, %v3001_v47  ;;  %v3008_v28 = vsub.f32 %v4957_v11, %v3001_v47  ;;  %v3009_v24 = vsub.f32 %v4970_v60, %v3001_v47 }
 0x5a2   : > { %s3000_s23 = ssub.f32 %s2998_s22, %s2999_s21  ;;  %v3010_v25 = vsub.f32 %v4980_v33, %v3001_v47  ;;  %v3011_v37 = vsub.f32 %v4987_v45, %v3001_v47  ;;  %v3392_v33 = vld [vmem:[%s5064_s10] ss:$0 sm:$0xff] }
 0x5a4   : > { %s3012_s24 = sadd.f32 1e-05, %s3000_s23 }
 0x5a6   : > { %v3013_v20 = vstv %s3012_s24 }
 0x5a7   : > { %3981 = vrsqrt.f32 %v3013_v20 }
 0x5b4   : > { %v3982_v17 = vpop.eup %3981 }
 0x5b5   : > { %3963 = vpush %v3982_v17 }
 0x5e6   : > { %s3964_s29 = spop %3963 }
 0x5e7   : > { %v3016_v9 = vstv %s3964_s29 }
 0x5e8   : > { %v3017_v10 = vmul.f32 %v3016_v9, %v3002_v59  ;;  %v3018_v4 = vmul.f32 %v3016_v9, %v3003_v14  ;;  %v3019_v30 = vmul.f32 %v3016_v9, %v3004_v16  ;;  %v3020_v18 = vmul.f32 %v3016_v9, %v3005_v40 }
 0x5e9   : > { %v3021_v38 = vmul.f32 %v3016_v9, %v3006_v39  ;;  %v3022_v29 = vmul.f32 %v3016_v9, %v3007_v5  ;;  %v3023_v2 = vmul.f32 %v3016_v9, %v3008_v28  ;;  %v3024_v11 = vmul.f32 %v3016_v9, %v3009_v24 }
 0x5ea   : > { %v3025_v62 = vmul.f32 %v3016_v9, %v3010_v25  ;;  %v3026_v42 = vmul.f32 %v3016_v9, %v3011_v37  ;;  %v3034_v60 = vmul.f32 %v3391_v51, %v3017_v10  ;;  %v3035_v0 = vmul.f32 %v3391_v51, %v3018_v4 }
 0x5eb   : > { %v3036_v45 = vmul.f32 %v3391_v51, %v3019_v30  ;;  %v3037_v26 = vmul.f32 %v3391_v51, %v3020_v18  ;;  %v3038_v32 = vmul.f32 %v3391_v51, %v3021_v38  ;;  %v3039_v55 = vmul.f32 %v3391_v51, %v3022_v29 }
 0x5ec   : > { %v3040_v50 = vmul.f32 %v3391_v51, %v3023_v2  ;;  %v3041_v57 = vmul.f32 %v3391_v51, %v3024_v11  ;;  %v3042_v3 = vmul.f32 %v3391_v51, %v3025_v62  ;;  %v3043_v46 = vmul.f32 %v3391_v51, %v3026_v42 }
 0x5ed   : > { %v3051_v15 = vadd.f32 %v3392_v33, %v3034_v60  ;;  %v3052_v12 = vadd.f32 %v3392_v33, %v3035_v0  ;;  %v3053_v13 = vadd.f32 %v3392_v33, %v3036_v45  ;;  %v3054_v36 = vadd.f32 %v3392_v33, %v3037_v26 }
 0x5ee   : > { %v3055_v7 = vadd.f32 %v3392_v33, %v3038_v32  ;;  %v3056_v48 = vadd.f32 %v3392_v33, %v3039_v55  ;;  %v3057_v61 = vadd.f32 %v3392_v33, %v3040_v50  ;;  %v3058_v1 = vadd.f32 %v3392_v33, %v3041_v57 }
 0x5ef   : > { %v3059_v63 = vadd.f32 %v3392_v33, %v3042_v3  ;;  %v3060_v6 = vadd.f32 %v3392_v33, %v3043_v46  ;;  %v3061_v35 = vmax.f32 %v3051_v15, 0.0  ;;  %v3062_v49 = vmax.f32 %v3052_v12, 0.0 }
 0x5f0   : > { %v3063_v20 = vmax.f32 %v3053_v13, 0.0  ;;  %v3064_v17 = vmax.f32 %v3054_v36, 0.0  ;;  %v3065_v34 = vmax.f32 %v3055_v7, 0.0  ;;  %v3066_v54 = vmax.f32 %v3056_v48, 0.0 }
 0x5f1   : > { %v3067_v58 = vmax.f32 %v3057_v61, 0.0  ;;  %v3068_v52 = vmax.f32 %v3058_v1, 0.0  ;;  %v3069_v8 = vmax.f32 %v3059_v63, 0.0  ;;  %v3070_v47 = vmax.f32 %v3060_v6, 0.0 }
 0x5f2   : > { %v3071_v59 = vmul.f32 %v3061_v35, %v4480_v41  ;;  %v3072_v14 = vmul.f32 %v3062_v49, %v4468_v44  ;;  %v3073_v16 = vmul.f32 %v3063_v20, %v4485_v56  ;;  %v3074_v40 = vmul.f32 %v3064_v17, %v4498_v53 }
 0x5f3   : > { %v3075_v39 = vmul.f32 %v3065_v34, %v4506_v27  ;;  %v3076_v5 = vmul.f32 %v3066_v54, %v4521_v22  ;;  %v3077_v28 = vmul.f32 %v3067_v58, %v4530_v19  ;;  %v3078_v24 = vmul.f32 %v3068_v52, %v4545_v21 }
 0x5f4   : > { %v3079_v41 = vmul.f32 %v3069_v8, %v4556_v31  ;;  %v3080_v44 = vmul.f32 %v3070_v47, %v4567_v43  ;;  %v3174_v56 = vadd.f32 %v5002_v23, %v3071_v59  ;;  %v3175_v53 = vadd.f32 %v5002_v23, %v3072_v14 }
 0x5f5   : > { %v3176_v25 = vadd.f32 %v5002_v23, %v3073_v16  ;;  %v3177_v37 = vadd.f32 %v5002_v23, %v3074_v40  ;;  %v3178_v27 = vadd.f32 %v5002_v23, %v3075_v39  ;;  %v3179_v22 = vadd.f32 %v5002_v23, %v3076_v5 }
 0x5f6   : > { %v3180_v19 = vadd.f32 %v5002_v23, %v3077_v28  ;;  %v3181_v21 = vadd.f32 %v5002_v23, %v3078_v24  ;;  %v3182_v31 = vadd.f32 %v5002_v23, %v3079_v41  ;;  %v3183_v43 = vadd.f32 %v5002_v23, %v3080_v44  ;;  %3184 = vst.msk [vmem:[%s454_s19] sm:$0xff] %vm471_vm4, %v3174_v56 }
 0x5f7   : > { %3185 = vst.msk [vmem:[%s454_s19 + $0x8] sm:$0xff] %vm471_vm4, %v3175_v53  ;;  %3186 = vst.msk [vmem:[%s454_s19 + $0x10] sm:$0xff] %vm471_vm4, %v3176_v25 }
 0x5f8   : > { %3187 = vst.msk [vmem:[%s454_s19 + $0x18] sm:$0xff] %vm471_vm4, %v3177_v37  ;;  %3188 = vst.msk [vmem:[%s454_s19 + $0x20] sm:$0xff] %vm471_vm4, %v3178_v27 }
 0x5f9   : > { %3189 = vst.msk [vmem:[%s454_s19 + $0x28] sm:$0xff] %vm471_vm4, %v3179_v22  ;;  %3190 = vst.msk [vmem:[%s454_s19 + $0x30] sm:$0xff] %vm471_vm4, %v3180_v19 }
 0x5fa   : > { %3191 = vst.msk [vmem:[%s454_s19 + $0x38] sm:$0xff] %vm471_vm4, %v3181_v21  ;;  %3192 = vst.msk [vmem:[%s454_s19 + $0x40] sm:$0xff] %vm471_vm4, %v3182_v31 }
 0x5fb   : > { %3193 = vst.msk [vmem:[%s454_s19 + $0x48] sm:$0xff] %vm471_vm4, %v3183_v43 }
 0x5fc PF: > { %s23_s25 = sadd.s32 1, %s3989_s25  }
 0x5fd   : > { %p20_p4 = scmp.ge.s32.totalorder %s23_s25, 4  }
 0x5ff   :  { %22 = sbr.rel (!%p20_p4) target bundleno = 1 (0x1), region = 136 }

</bundles_post_ra>
